<compile_context>
chip_gen: v5e
topology: v5e:2x2
jax: 0.10.0
libtpu: 0.0.40
codegen_flags: <defaults>
</compile_context>

<pallas_src>
import jax
import jax.numpy as jnp
import numpy as np
from jax.experimental import pallas as pl
from jax.experimental.pallas import tpu as pltpu

LANES = 128  # padded channel width == vreg lane count


def _make_net_kernel(TB, H, W, num_classes):
    C = LANES

    def kernel(x_ref, w_ref, b_ref, m_ref, out_ref):
        # x_ref: (TB*H*W, C) NHWC rows ordered (b, h, w), channels zero-padded to C=128.
        x = x_ref[...]
        h, w = H, W
        # conv1..conv4: 1x1 conv == channel matmul, then ReLU + 2x2 stride-2 max-pool.
        for li in range(4):
            y = jnp.dot(x, w_ref[li], preferred_element_type=jnp.float32) + b_ref[li]
            y = jnp.maximum(y, 0.0)
            h2, w2 = h // 2, w // 2
            # pool over W: adjacent row pairs -> reshape + max over the size-2 axis
            y = jnp.max(y.reshape(TB * h * w2, 2, C), axis=1)
            # pool over H: rows (b, 2h', :) and (b, 2h'+1, :) are contiguous halves
            y = y.reshape(TB * h2, 2 * w2, C)
            y = jnp.maximum(y[:, :w2, :], y[:, w2:, :])
            h, w = h2, w2
            x = y.reshape(TB * h * w, C)

        # After four pools H = W = 1, so flattening is just the channel vector and
        # matches PyTorch's NCHW x.view(-1, num_flatten).
        x = x.reshape(TB, C)

        x = jnp.maximum(jnp.dot(x, w_ref[4], preferred_element_type=jnp.float32) + b_ref[4], 0.0)
        x = x * m_ref[0]  # dropout 1 (precomputed inverted keep-mask, padded lanes hit zeros)
        x = jnp.maximum(jnp.dot(x, w_ref[5], preferred_element_type=jnp.float32) + b_ref[5], 0.0)
        x = x * m_ref[1]  # dropout 2
        logits = jnp.dot(x, w_ref[6], preferred_element_type=jnp.float32) + b_ref[6]

        # Numerically stable log_softmax over the first `num_classes` lanes only;
        # padded lanes are masked to a large negative so exp() contributes ~0.
        col = jax.lax.broadcasted_iota(jnp.int32, logits.shape, 1)
        lm = jnp.where(col < num_classes, logits, jnp.full_like(logits, -1e30))
        z = lm - jnp.max(lm, axis=1, keepdims=True)
        lse = jnp.log(jnp.sum(jnp.exp(z), axis=1, keepdims=True))
        out_ref[...] = z - lse

    return kernel


def net_forward(x_nchw, params, masks):
    (w1, b1, w2, b2, w3, b3, w4, b4, fw1, fb1, fw2, fb2, fw3, fb3) = params
    m1, m2 = masks
    B, C_in, H, W = x_nchw.shape
    num_classes = fw3.shape[1]
    C = LANES

    if (H, W) != (16, 16):
        # TODO(synk): for general H,W the post-pool spatial size is >1 and the NHWC
        # flatten order no longer matches PyTorch's NCHW .view(); only 16x16 handled.
        raise NotImplementedError("net_forward assumes a 16x16 spatial input")
    assert max(m.shape[0] for m in (w1, w2, w3, w4, fw1, fw2, fw3)) <= C
    assert max(m.shape[1] for m in (w1, w2, w3, w4, fw1, fw2, fw3)) <= C

    # --- lane-dense packing: pad every channel dim to 128 and pack the params /
    #     masks into 3 buffers so the kernel sees 4 input DMAs instead of 17. ---
    def pad_w(w):
        r, c = w.shape
        return jnp.pad(w.astype(jnp.float32), ((0, C - r), (0, C - c)))

    def pad_b(b):
        return jnp.pad(b.astype(jnp.float32), (0, C - b.shape[0])).reshape(1, C)

    def pad_m(m):
        return jnp.pad(m.astype(jnp.float32), ((0, 0), (0, C - m.shape[1])))

    w_pack = jnp.stack([pad_w(w) for w in (w1, w2, w3, w4, fw1, fw2, fw3)])  # (7,128,128)
    b_pack = jnp.stack([pad_b(b) for b in (b1, b2, b3, b4, fb1, fb2, fb3)])  # (7,1,128)
    m_pack = jnp.stack([pad_m(m) for m in (m1, m2)])                         # (2,B,128)

    # NCHW -> NHWC rows, channels zero-padded to 128 lanes.
    x = jnp.transpose(x_nchw, (0, 2, 3, 1)).astype(jnp.float32).reshape(B * H * W, C_in)
    x = jnp.pad(x, ((0, 0), (0, C - C_in)))

    # Batch grid: each "parallel" step handles TB batch rows (TB=B -> single step
    # for the tiny demo batch; two steps for large even batches so v7x's 2 TCs split it).
    TB = B // 2 if (B % 16 == 0) else B
    grid = (B // TB,)

    n_rows = B * H * W
    conv_rows = n_rows + n_rows // 4 + n_rows // 16 + n_rows // 64
    flops = 2 * C * C * (conv_rows + 3 * B)
    bytes_accessed = 4 * (n_rows * C + 7 * C * C + 7 * C + 3 * B * C)

    kernel = _make_net_kernel(TB, H, W, num_classes)
    out = pl.pallas_call(
        kernel,
        out_shape=jax.ShapeDtypeStruct((B, C), jnp.float32),
        grid=grid,
        in_specs=[
            pl.BlockSpec((TB * H * W, C), lambda i: (i, 0)),   # activations (batch-tiled)
            pl.BlockSpec((7, C, C), lambda i: (0, 0, 0)),      # packed weights (resident)
            pl.BlockSpec((7, 1, C), lambda i: (0, 0, 0)),      # packed biases (resident)
            pl.BlockSpec((2, TB, C), lambda i: (0, i, 0)),     # packed dropout masks
        ],
        out_specs=pl.BlockSpec((TB, C), lambda i: (i, 0)),
        compiler_params=pltpu.CompilerParams(
            dimension_semantics=("parallel",),
            vmem_limit_bytes=32 * 1024 * 1024,
        ),
        cost_estimate=pl.CostEstimate(
            flops=int(flops),
            transcendentals=int(B * C),
            bytes_accessed=int(bytes_accessed),
        ),
    )(x, w_pack, b_pack, m_pack)

    # Drop the padded logit lanes outside the kernel (lane-dense in-kernel store).
    return out[:, :num_classes]


def net_reference(x_nchw, params, masks):
    """Independent pure-JAX reference in PyTorch's NCHW layout (for correctness check)."""
    (w1, b1, w2, b2, w3, b3, w4, b4, fw1, fb1, fw2, fb2, fw3, fb3) = params
    m1, m2 = masks
    x = x_nchw.astype(jnp.float32)  # (B, C, H, W)
    for w, b in ((w1, b1), (w2, b2), (w3, b3), (w4, b4)):
        x = jnp.einsum("bchw,cd->bdhw", x, w) + b.reshape(1, -1, 1, 1)  # 1x1 conv
        x = jnp.maximum(x, 0.0)                                          # ReLU
        Bb, Cc, Hh, Ww = x.shape
        x = x.reshape(Bb, Cc, Hh // 2, 2, Ww // 2, 2).max(axis=(3, 5))   # max_pool2d(2,2)
    x = x.reshape(x.shape[0], -1)                                        # NCHW .view flatten
    x = jnp.maximum(x @ fw1 + fb1, 0.0) * m1
    x = jnp.maximum(x @ fw2 + fb2, 0.0) * m2
    logits = x @ fw3 + fb3
    return jax.nn.log_softmax(logits, axis=1)


if __name__ == "__main__":
    # Config equivalent to: input_shape=(4,16,16), initial_filters=8,
    # num_fc1=64, num_fc2=32, num_classes=3, dropout_rate=0.25
    B, C_in, H_in, W_in = 2, 4, 16, 16
    init_f, num_fc1, num_fc2, num_classes = 8, 64, 32, 3
    dropout_rate = 0.25
    num_flatten = 1 * 1 * 8 * init_f  # 16x16 -> four 2x pools -> 1x1 spatial

    key = jax.random.PRNGKey(0)
    ks = jax.random.split(key, 20)

    def pinit(k, shape, fan_in):
        return (jax.random.normal(k, shape, jnp.float32) / np.sqrt(fan_in)).astype(jnp.float32)

    # Conv weights stored as (Cin, Cout)  (PyTorch (Cout,Cin,1,1) transposed+squeezed);
    # FC weights stored as (in, out)      (PyTorch Linear (out,in) transposed).
    w1 = pinit(ks[0], (C_in, init_f), C_in);                 b1 = pinit(ks[1], (init_f,), C_in)
    w2 = pinit(ks[2], (init_f, 2 * init_f), init_f);         b2 = pinit(ks[3], (2 * init_f,), init_f)
    w3 = pinit(ks[4], (2 * init_f, 4 * init_f), 2 * init_f); b3 = pinit(ks[5], (4 * init_f,), 2 * init_f)
    w4 = pinit(ks[6], (4 * init_f, 8 * init_f), 4 * init_f); b4 = pinit(ks[7], (8 * init_f,), 4 * init_f)
    fw1 = pinit(ks[8], (num_flatten, num_fc1), num_flatten); fb1 = pinit(ks[9], (num_fc1,), num_flatten)
    fw2 = pinit(ks[10], (num_fc1, num_fc2), num_fc1);        fb2 = pinit(ks[11], (num_fc2,), num_fc1)
    fw3 = pinit(ks[12], (num_fc2, num_classes), num_fc2);    fb3 = pinit(ks[13], (num_classes,), num_fc2)

    params = (w1, b1, w2, b2, w3, b3, w4, b4, fw1, fb1, fw2, fb2, fw3, fb3)

    # Deterministic inverted dropout keep-masks (F.dropout(training=True) semantics).
    keep = 1.0 - dropout_rate
    m1 = jax.random.bernoulli(ks[14], keep, (B, num_fc1)).astype(jnp.float32) / keep
    m2 = jax.random.bernoulli(ks[15], keep, (B, num_fc2)).astype(jnp.float32) / keep
    masks = (m1, m2)

    x = jax.random.normal(ks[16], (B, C_in, H_in, W_in), jnp.float32)

    out = jax.block_until_ready(jax.jit(net_forward)(x, params, masks))
    ref = jax.block_until_ready(net_reference(x, params, masks))
    np.testing.assert_allclose(np.asarray(out), np.asarray(ref), rtol=5e-4, atol=5e-4)
    assert out.shape == (B, num_classes)

    print("KERNEL_OK")
</pallas_src>

<mosaic_0001>
module attributes {stable_mosaic.version = 11 : i64} {
  func.func @kernel(%arg0: i32, %arg1: memref<512x128xf32, #tpu.memory_space<vmem>>, %arg2: memref<7x128x128xf32, #tpu.memory_space<vmem>>, %arg3: memref<7x1x128xf32, #tpu.memory_space<vmem>>, %arg4: memref<2x2x128xf32, #tpu.memory_space<vmem>>, %arg5: memref<2x128xf32, #tpu.memory_space<vmem>>) attributes {dimension_semantics = [#tpu.dimension_semantics<parallel>], iteration_bounds = array<i64: 1>, scalar_prefetch = 0 : i64, scratch_operands = 0 : i64, tpu.core_type = #tpu.core_type<tc>, window_params = [{transform_indices = @transform_0, window_bounds = array<i64: 512, 128>}, {pipeline_mode = #tpu.pipeline_mode<synchronous>, transform_indices = @transform_1, window_bounds = array<i64: 7, 128, 128>}, {pipeline_mode = #tpu.pipeline_mode<synchronous>, transform_indices = @transform_2, window_bounds = array<i64: 7, 1, 128>}, {transform_indices = @transform_3, window_bounds = array<i64: 2, 2, 128>}, {transform_indices = @transform_4, window_bounds = array<i64: 2, 128>}]} {
    %c0 = arith.constant 0 : index
    %c0_0 = arith.constant 0 : index
    %0 = vector.load %arg1[%c0, %c0_0] : memref<512x128xf32, #tpu.memory_space<vmem>>, vector<512x128xf32>
    %c0_1 = arith.constant 0 : index
    %c0_2 = arith.constant 0 : index
    %c0_3 = arith.constant 0 : index
    %1 = vector.load %arg2[%c0_1, %c0_2, %c0_3] : memref<7x128x128xf32, #tpu.memory_space<vmem>>, vector<1x128x128xf32>
    %2 = vector.shape_cast %1 : vector<1x128x128xf32> to vector<128x128xf32>
    %cst = arith.constant dense<0.000000e+00> : vector<512x128xf32>
    %3 = tpu.matmul %0, %2, %cst {dimension_numbers = #tpu.dot_dimension_numbers<[1], [0], [0], [1], [0, 0, 1, 1], [], []>} : vector<512x128xf32>, vector<128x128xf32>, vector<512x128xf32> -> vector<512x128xf32>
    %c0_4 = arith.constant 0 : index
    %c0_5 = arith.constant 0 : index
    %c0_6 = arith.constant 0 : index
    %4 = vector.load %arg3[%c0_4, %c0_5, %c0_6] : memref<7x1x128xf32, #tpu.memory_space<vmem>>, vector<1x1x128xf32>
    %5 = vector.shape_cast %4 : vector<1x1x128xf32> to vector<1x128xf32>
    %6 = vector.broadcast %5 : vector<1x128xf32> to vector<512x128xf32>
    %7 = arith.addf %3, %6 : vector<512x128xf32>
    %cst_7 = arith.constant 0.000000e+00 : f32
    %8 = vector.broadcast %cst_7 : f32 to vector<512x128xf32>
    %9 = arith.maximumf %7, %8 : vector<512x128xf32>
    %10 = vector.shape_cast %9 : vector<512x128xf32> to vector<256x2x128xf32>
    %cst_8 = arith.constant dense<0xFF800000> : vector<256x128xf32>
    %11 = vector.multi_reduction <maximumf>, %10, %cst_8 [1] : vector<256x2x128xf32> to vector<256x128xf32>
    %12 = vector.shape_cast %11 : vector<256x128xf32> to vector<16x16x128xf32>
    %13 = vector.extract_strided_slice %12 {offsets = [0, 0, 0], sizes = [16, 8, 128], strides = [1, 1, 1]} : vector<16x16x128xf32> to vector<16x8x128xf32>
    %14 = vector.extract_strided_slice %12 {offsets = [0, 8, 0], sizes = [16, 8, 128], strides = [1, 1, 1]} : vector<16x16x128xf32> to vector<16x8x128xf32>
    %15 = arith.maximumf %13, %14 : vector<16x8x128xf32>
    %16 = vector.shape_cast %15 : vector<16x8x128xf32> to vector<128x128xf32>
    %c1 = arith.constant 1 : index
    %c0_9 = arith.constant 0 : index
    %c0_10 = arith.constant 0 : index
    %17 = vector.load %arg2[%c1, %c0_9, %c0_10] : memref<7x128x128xf32, #tpu.memory_space<vmem>>, vector<1x128x128xf32>
    %18 = vector.shape_cast %17 : vector<1x128x128xf32> to vector<128x128xf32>
    %cst_11 = arith.constant dense<0.000000e+00> : vector<128x128xf32>
    %19 = tpu.matmul %16, %18, %cst_11 {dimension_numbers = #tpu.dot_dimension_numbers<[1], [0], [0], [1], [0, 0, 1, 1], [], []>} : vector<128x128xf32>, vector<128x128xf32>, vector<128x128xf32> -> vector<128x128xf32>
    %c1_12 = arith.constant 1 : index
    %c0_13 = arith.constant 0 : index
    %c0_14 = arith.constant 0 : index
    %20 = vector.load %arg3[%c1_12, %c0_13, %c0_14] : memref<7x1x128xf32, #tpu.memory_space<vmem>>, vector<1x1x128xf32>
    %21 = vector.shape_cast %20 : vector<1x1x128xf32> to vector<1x128xf32>
    %22 = vector.broadcast %21 : vector<1x128xf32> to vector<128x128xf32>
    %23 = arith.addf %19, %22 : vector<128x128xf32>
    %cst_15 = arith.constant 0.000000e+00 : f32
    %24 = vector.broadcast %cst_15 : f32 to vector<128x128xf32>
    %25 = arith.maximumf %23, %24 : vector<128x128xf32>
    %26 = vector.shape_cast %25 : vector<128x128xf32> to vector<64x2x128xf32>
    %cst_16 = arith.constant dense<0xFF800000> : vector<64x128xf32>
    %27 = vector.multi_reduction <maximumf>, %26, %cst_16 [1] : vector<64x2x128xf32> to vector<64x128xf32>
    %28 = vector.shape_cast %27 : vector<64x128xf32> to vector<8x8x128xf32>
    %29 = vector.extract_strided_slice %28 {offsets = [0, 0, 0], sizes = [8, 4, 128], strides = [1, 1, 1]} : vector<8x8x128xf32> to vector<8x4x128xf32>
    %30 = vector.extract_strided_slice %28 {offsets = [0, 4, 0], sizes = [8, 4, 128], strides = [1, 1, 1]} : vector<8x8x128xf32> to vector<8x4x128xf32>
    %31 = arith.maximumf %29, %30 : vector<8x4x128xf32>
    %32 = vector.shape_cast %31 : vector<8x4x128xf32> to vector<32x128xf32>
    %c2 = arith.constant 2 : index
    %c0_17 = arith.constant 0 : index
    %c0_18 = arith.constant 0 : index
    %33 = vector.load %arg2[%c2, %c0_17, %c0_18] : memref<7x128x128xf32, #tpu.memory_space<vmem>>, vector<1x128x128xf32>
    %34 = vector.shape_cast %33 : vector<1x128x128xf32> to vector<128x128xf32>
    %cst_19 = arith.constant dense<0.000000e+00> : vector<32x128xf32>
    %35 = tpu.matmul %32, %34, %cst_19 {dimension_numbers = #tpu.dot_dimension_numbers<[1], [0], [0], [1], [0, 0, 1, 1], [], []>} : vector<32x128xf32>, vector<128x128xf32>, vector<32x128xf32> -> vector<32x128xf32>
    %c2_20 = arith.constant 2 : index
    %c0_21 = arith.constant 0 : index
    %c0_22 = arith.constant 0 : index
    %36 = vector.load %arg3[%c2_20, %c0_21, %c0_22] : memref<7x1x128xf32, #tpu.memory_space<vmem>>, vector<1x1x128xf32>
    %37 = vector.shape_cast %36 : vector<1x1x128xf32> to vector<1x128xf32>
    %38 = vector.broadcast %37 : vector<1x128xf32> to vector<32x128xf32>
    %39 = arith.addf %35, %38 : vector<32x128xf32>
    %cst_23 = arith.constant 0.000000e+00 : f32
    %40 = vector.broadcast %cst_23 : f32 to vector<32x128xf32>
    %41 = arith.maximumf %39, %40 : vector<32x128xf32>
    %42 = vector.shape_cast %41 : vector<32x128xf32> to vector<16x2x128xf32>
    %cst_24 = arith.constant dense<0xFF800000> : vector<16x128xf32>
    %43 = vector.multi_reduction <maximumf>, %42, %cst_24 [1] : vector<16x2x128xf32> to vector<16x128xf32>
    %44 = vector.shape_cast %43 : vector<16x128xf32> to vector<4x4x128xf32>
    %45 = vector.extract_strided_slice %44 {offsets = [0, 0, 0], sizes = [4, 2, 128], strides = [1, 1, 1]} : vector<4x4x128xf32> to vector<4x2x128xf32>
    %46 = vector.extract_strided_slice %44 {offsets = [0, 2, 0], sizes = [4, 2, 128], strides = [1, 1, 1]} : vector<4x4x128xf32> to vector<4x2x128xf32>
    %47 = arith.maximumf %45, %46 : vector<4x2x128xf32>
    %48 = vector.shape_cast %47 : vector<4x2x128xf32> to vector<8x128xf32>
    %c3 = arith.constant 3 : index
    %c0_25 = arith.constant 0 : index
    %c0_26 = arith.constant 0 : index
    %49 = vector.load %arg2[%c3, %c0_25, %c0_26] : memref<7x128x128xf32, #tpu.memory_space<vmem>>, vector<1x128x128xf32>
    %50 = vector.shape_cast %49 : vector<1x128x128xf32> to vector<128x128xf32>
    %cst_27 = arith.constant dense<0.000000e+00> : vector<8x128xf32>
    %51 = tpu.matmul %48, %50, %cst_27 {dimension_numbers = #tpu.dot_dimension_numbers<[1], [0], [0], [1], [0, 0, 1, 1], [], []>} : vector<8x128xf32>, vector<128x128xf32>, vector<8x128xf32> -> vector<8x128xf32>
    %c3_28 = arith.constant 3 : index
    %c0_29 = arith.constant 0 : index
    %c0_30 = arith.constant 0 : index
    %52 = vector.load %arg3[%c3_28, %c0_29, %c0_30] : memref<7x1x128xf32, #tpu.memory_space<vmem>>, vector<1x1x128xf32>
    %53 = vector.shape_cast %52 : vector<1x1x128xf32> to vector<1x128xf32>
    %54 = vector.broadcast %53 : vector<1x128xf32> to vector<8x128xf32>
    %55 = arith.addf %51, %54 : vector<8x128xf32>
    %cst_31 = arith.constant 0.000000e+00 : f32
    %56 = vector.broadcast %cst_31 : f32 to vector<8x128xf32>
    %57 = arith.maximumf %55, %56 : vector<8x128xf32>
    %58 = vector.shape_cast %57 : vector<8x128xf32> to vector<4x2x128xf32>
    %cst_32 = arith.constant dense<0xFF800000> : vector<4x128xf32>
    %59 = vector.multi_reduction <maximumf>, %58, %cst_32 [1] : vector<4x2x128xf32> to vector<4x128xf32>
    %60 = vector.shape_cast %59 : vector<4x128xf32> to vector<2x2x128xf32>
    %61 = vector.extract_strided_slice %60 {offsets = [0, 0, 0], sizes = [2, 1, 128], strides = [1, 1, 1]} : vector<2x2x128xf32> to vector<2x1x128xf32>
    %62 = vector.extract_strided_slice %60 {offsets = [0, 1, 0], sizes = [2, 1, 128], strides = [1, 1, 1]} : vector<2x2x128xf32> to vector<2x1x128xf32>
    %63 = arith.maximumf %61, %62 : vector<2x1x128xf32>
    %64 = vector.shape_cast %63 : vector<2x1x128xf32> to vector<2x128xf32>
    %c4 = arith.constant 4 : index
    %c0_33 = arith.constant 0 : index
    %c0_34 = arith.constant 0 : index
    %65 = vector.load %arg2[%c4, %c0_33, %c0_34] : memref<7x128x128xf32, #tpu.memory_space<vmem>>, vector<1x128x128xf32>
    %66 = vector.shape_cast %65 : vector<1x128x128xf32> to vector<128x128xf32>
    %cst_35 = arith.constant dense<0.000000e+00> : vector<2x128xf32>
    %67 = tpu.matmul %64, %66, %cst_35 {dimension_numbers = #tpu.dot_dimension_numbers<[1], [0], [0], [1], [0, 0, 1, 1], [], []>} : vector<2x128xf32>, vector<128x128xf32>, vector<2x128xf32> -> vector<2x128xf32>
    %c4_36 = arith.constant 4 : index
    %c0_37 = arith.constant 0 : index
    %c0_38 = arith.constant 0 : index
    %68 = vector.load %arg3[%c4_36, %c0_37, %c0_38] : memref<7x1x128xf32, #tpu.memory_space<vmem>>, vector<1x1x128xf32>
    %69 = vector.shape_cast %68 : vector<1x1x128xf32> to vector<1x128xf32>
    %70 = vector.broadcast %69 : vector<1x128xf32> to vector<2x128xf32>
    %71 = arith.addf %67, %70 : vector<2x128xf32>
    %cst_39 = arith.constant 0.000000e+00 : f32
    %72 = vector.broadcast %cst_39 : f32 to vector<2x128xf32>
    %73 = arith.maximumf %71, %72 : vector<2x128xf32>
    %c0_40 = arith.constant 0 : index
    %c0_41 = arith.constant 0 : index
    %c0_42 = arith.constant 0 : index
    %74 = vector.load %arg4[%c0_40, %c0_41, %c0_42] : memref<2x2x128xf32, #tpu.memory_space<vmem>>, vector<1x2x128xf32>
    %75 = vector.shape_cast %74 : vector<1x2x128xf32> to vector<2x128xf32>
    %76 = arith.mulf %73, %75 : vector<2x128xf32>
    %c5 = arith.constant 5 : index
    %c0_43 = arith.constant 0 : index
    %c0_44 = arith.constant 0 : index
    %77 = vector.load %arg2[%c5, %c0_43, %c0_44] : memref<7x128x128xf32, #tpu.memory_space<vmem>>, vector<1x128x128xf32>
    %78 = vector.shape_cast %77 : vector<1x128x128xf32> to vector<128x128xf32>
    %cst_45 = arith.constant dense<0.000000e+00> : vector<2x128xf32>
    %79 = tpu.matmul %76, %78, %cst_45 {dimension_numbers = #tpu.dot_dimension_numbers<[1], [0], [0], [1], [0, 0, 1, 1], [], []>} : vector<2x128xf32>, vector<128x128xf32>, vector<2x128xf32> -> vector<2x128xf32>
    %c5_46 = arith.constant 5 : index
    %c0_47 = arith.constant 0 : index
    %c0_48 = arith.constant 0 : index
    %80 = vector.load %arg3[%c5_46, %c0_47, %c0_48] : memref<7x1x128xf32, #tpu.memory_space<vmem>>, vector<1x1x128xf32>
    %81 = vector.shape_cast %80 : vector<1x1x128xf32> to vector<1x128xf32>
    %82 = vector.broadcast %81 : vector<1x128xf32> to vector<2x128xf32>
    %83 = arith.addf %79, %82 : vector<2x128xf32>
    %cst_49 = arith.constant 0.000000e+00 : f32
    %84 = vector.broadcast %cst_49 : f32 to vector<2x128xf32>
    %85 = arith.maximumf %83, %84 : vector<2x128xf32>
    %c1_50 = arith.constant 1 : index
    %c0_51 = arith.constant 0 : index
    %c0_52 = arith.constant 0 : index
    %86 = vector.load %arg4[%c1_50, %c0_51, %c0_52] : memref<2x2x128xf32, #tpu.memory_space<vmem>>, vector<1x2x128xf32>
    %87 = vector.shape_cast %86 : vector<1x2x128xf32> to vector<2x128xf32>
    %88 = arith.mulf %85, %87 : vector<2x128xf32>
    %c6 = arith.constant 6 : index
    %c0_53 = arith.constant 0 : index
    %c0_54 = arith.constant 0 : index
    %89 = vector.load %arg2[%c6, %c0_53, %c0_54] : memref<7x128x128xf32, #tpu.memory_space<vmem>>, vector<1x128x128xf32>
    %90 = vector.shape_cast %89 : vector<1x128x128xf32> to vector<128x128xf32>
    %cst_55 = arith.constant dense<0.000000e+00> : vector<2x128xf32>
    %91 = tpu.matmul %88, %90, %cst_55 {dimension_numbers = #tpu.dot_dimension_numbers<[1], [0], [0], [1], [0, 0, 1, 1], [], []>} : vector<2x128xf32>, vector<128x128xf32>, vector<2x128xf32> -> vector<2x128xf32>
    %c6_56 = arith.constant 6 : index
    %c0_57 = arith.constant 0 : index
    %c0_58 = arith.constant 0 : index
    %92 = vector.load %arg3[%c6_56, %c0_57, %c0_58] : memref<7x1x128xf32, #tpu.memory_space<vmem>>, vector<1x1x128xf32>
    %93 = vector.shape_cast %92 : vector<1x1x128xf32> to vector<1x128xf32>
    %94 = vector.broadcast %93 : vector<1x128xf32> to vector<2x128xf32>
    %95 = arith.addf %91, %94 : vector<2x128xf32>
    %96 = tpu.iota {dimensions = array<i32: 1>} : vector<2x128xi32>
    %c3_i32 = arith.constant 3 : i32
    %97 = vector.broadcast %c3_i32 : i32 to vector<2x128xi32>
    %98 = arith.cmpi slt, %96, %97 : vector<2x128xi32>
    %cst_59 = arith.constant -1.000000e+30 : f32
    %99 = vector.broadcast %cst_59 : f32 to vector<2x128xf32>
    %100 = arith.select %98, %95, %99 : vector<2x128xi1>, vector<2x128xf32>
    %cst_60 = arith.constant dense<0xFF800000> : vector<2xf32>
    %101 = vector.multi_reduction <maximumf>, %100, %cst_60 [1] : vector<2x128xf32> to vector<2xf32>
    %102 = vector.shape_cast %101 : vector<2xf32> to vector<2x1xf32>
    %103 = vector.broadcast %102 : vector<2x1xf32> to vector<2x128xf32>
    %104 = arith.subf %100, %103 : vector<2x128xf32>
    %105 = math.exp %104 : vector<2x128xf32>
    %cst_61 = arith.constant dense<0.000000e+00> : vector<2xf32>
    %106 = vector.multi_reduction <add>, %105, %cst_61 [1] : vector<2x128xf32> to vector<2xf32>
    %107 = vector.shape_cast %106 : vector<2xf32> to vector<2x1xf32>
    %108 = math.log %107 : vector<2x1xf32>
    %109 = vector.broadcast %108 : vector<2x1xf32> to vector<2x128xf32>
    %110 = arith.subf %104, %109 : vector<2x128xf32>
    %c0_62 = arith.constant 0 : index
    %c0_63 = arith.constant 0 : index
    %111 = vector.load %arg5[%c0_62, %c0_63] : memref<2x128xf32, #tpu.memory_space<vmem>>, vector<2x128xf32>
    tpu.vector_store %arg5[%c0_62, %c0_63], %110 {strides = array<i32>} : memref<2x128xf32, #tpu.memory_space<vmem>>, vector<2x128xf32>,
    return
  }
  func.func @transform_0(%arg0: i32) -> (i32, i32) {
    %c0_i32 = arith.constant 0 : i32
    %c0_i32_0 = arith.constant 0 : i32
    return %arg0, %c0_i32 : i32, i32
  }
  func.func @transform_1(%arg0: i32) -> (i32, i32, i32) {
    %c0_i32 = arith.constant 0 : i32
    %c0_i32_0 = arith.constant 0 : i32
    %c0_i32_1 = arith.constant 0 : i32
    %c0_i32_2 = arith.constant 0 : i32
    return %c0_i32, %c0_i32_0, %c0_i32_1 : i32, i32, i32
  }
  func.func @transform_2(%arg0: i32) -> (i32, i32, i32) {
    %c0_i32 = arith.constant 0 : i32
    %c0_i32_0 = arith.constant 0 : i32
    %c0_i32_1 = arith.constant 0 : i32
    %c0_i32_2 = arith.constant 0 : i32
    return %c0_i32, %c0_i32_0, %c0_i32_1 : i32, i32, i32
  }
  func.func @transform_3(%arg0: i32) -> (i32, i32, i32) {
    %c0_i32 = arith.constant 0 : i32
    %c0_i32_0 = arith.constant 0 : i32
    %c0_i32_1 = arith.constant 0 : i32
    return %c0_i32, %arg0, %c0_i32_0 : i32, i32, i32
  }
  func.func @transform_4(%arg0: i32) -> (i32, i32) {
    %c0_i32 = arith.constant 0 : i32
    %c0_i32_0 = arith.constant 0 : i32
    return %arg0, %c0_i32 : i32, i32
  }
}

</mosaic_0001>

<bundles_post_ra>
// kernel: net_forward.1
= control target key start
LH: loop header
LB: loop body
LE: loop exit
PB: predicated region body
PF: predicated region fallthrough
CT: control target
= control target key end

     0   :  { %s7113_s0 = inlined_call_operand.vmem [shape: f32[512,128], index: 0, kind: input, shape index: {}]   ;;  %s7114_s1 = inlined_call_operand.vmem [shape: f32[7,128,128], index: 1, kind: input, shape index: {}]   ;;  %s7115_s2 = inlined_call_operand.vmem [shape: f32[7,1,128], index: 2, kind: input, shape index: {}]   ;;  %s7116_s3 = inlined_call_operand.vmem [shape: f32[2,2,128], index: 3, kind: input, shape index: {}]   ;;  %s7117_s4 = inlined_call_operand.hbm [shape: f32[2,128], index: 4, kind: output, shape index: {}]  }
   0x1   :  { %v97_v0 = vld [vmem:[%s7114_s1 + $0x78] sm:$0xff]  ;;  %v96_v1 = vld [vmem:[%s7114_s1 + $0x70] sm:$0xff]  ;;  %v95_v2 = vld [vmem:[%s7114_s1 + $0x68] sm:$0xff] }
   0x2   :  { %102 = vmatpush.msra.mxu0 %v97_v0  ;;  %4339 = vmatpush.msra.mxu2 %v97_v0  ;;  %v94_v3 = vld [vmem:[%s7114_s1 + $0x60] sm:$0xff]  ;;  %v93_v4 = vld [vmem:[%s7114_s1 + $0x58] sm:$0xff]  ;;  %v92_v5 = vld [vmem:[%s7114_s1 + $0x50] sm:$0xff] }
   0x3   :  { %4338 = vmatpush.msra.mxu1 %v97_v0  ;;  %4340 = vmatpush.msra.mxu3 %v97_v0 }
   0x4   :  { %103 = vmatpush.msra.mxu0 %v96_v1  ;;  %4342 = vmatpush.msra.mxu2 %v96_v1 }
   0x5   :  { %4341 = vmatpush.msra.mxu1 %v96_v1  ;;  %4343 = vmatpush.msra.mxu3 %v96_v1 }
   0x6   :  { %104 = vmatpush.msra.mxu0 %v95_v2  ;;  %4345 = vmatpush.msra.mxu2 %v95_v2 }
   0x7   :  { %4344 = vmatpush.msra.mxu1 %v95_v2  ;;  %4346 = vmatpush.msra.mxu3 %v95_v2 }
   0x8   :  { %105 = vmatpush.msra.mxu0 %v94_v3  ;;  %4348 = vmatpush.msra.mxu2 %v94_v3 }
   0x9   :  { %4347 = vmatpush.msra.mxu1 %v94_v3  ;;  %4349 = vmatpush.msra.mxu3 %v94_v3 }
   0xa   :  { %106 = vmatpush.msra.mxu0 %v93_v4  ;;  %4351 = vmatpush.msra.mxu2 %v93_v4 }
   0xb   :  { %9 = vsyncpa [#allocation3], 0  ;;  %v91_v6 = vld [vmem:[%s7114_s1 + $0x48] sm:$0xff]  ;;  %4350 = vmatpush.msra.mxu1 %v93_v4  ;;  %4352 = vmatpush.msra.mxu3 %v93_v4  ;;  %v90_v7 = vld [vmem:[%s7114_s1 + $0x40] sm:$0xff]  ;;  %vm823_vm0 = vcmask 1041408   ;;  %vm2894_vm1 = vcmask 1041409  }
   0xc   :  { %107 = vmatpush.msra.mxu0 %v92_v5  ;;  %4354 = vmatpush.msra.mxu2 %v92_v5  ;;  %v89_v8 = vld [vmem:[%s7114_s1 + $0x38] sm:$0xff]  ;;  %v88_v9 = vld [vmem:[%s7114_s1 + $0x30] sm:$0xff]  ;;  %v87_v10 = vld [vmem:[%s7114_s1 + $0x28] sm:$0xff]  ;;  %vm2896_vm2 = vcmask 1042434   ;;  %vm2898_vm3 = vcmask 1043459   ;;  %vm2900_vm4 = vcmask 1044484  }
   0xd   :  { %4353 = vmatpush.msra.mxu1 %v92_v5  ;;  %4355 = vmatpush.msra.mxu3 %v92_v5  ;;  %v86_v11 = vld [vmem:[%s7114_s1 + $0x20] sm:$0xff]  ;;  %v85_v12 = vld [vmem:[%s7114_s1 + $0x18] sm:$0xff]  ;;  %v84_v13 = vld [vmem:[%s7114_s1 + $0x10] sm:$0xff]  ;;  %vm2902_vm5 = vcmask 1045509   ;;  %vm2904_vm6 = vcmask 1046534   ;;  %vm2906_vm7 = vcmask 1047559  }
   0xe   :  { %108 = vmatpush.msra.mxu0 %v91_v6  ;;  %4357 = vmatpush.msra.mxu2 %v91_v6  ;;  %v83_v14 = vld [vmem:[%s7114_s1 + $0x8] sm:$0xff]  ;;  %v82_v15 = vld [vmem:[%s7114_s1] sm:$0xff]  ;;  %v48_v17 = vld [vmem:[%s7113_s0 + $0xf0] sm:$0xff]  ;;  %s4226_s27 = sshll.u32 %s7117_s4, 4  ;;  %s4227_s27 = int_to_ptr.hbm [resolvable:$true] %s4226_s27 }
   0xf   :  { %4356 = vmatpush.msra.mxu1 %v91_v6  ;;  %4358 = vmatpush.msra.mxu3 %v91_v6  ;;  %v18_v16 = vld [vmem:[%s7113_s0] sm:$0xff]  ;;  %v19_v18 = vld [vmem:[%s7113_s0 + $0x8] sm:$0xff]  ;;  %v49_v19 = vld [vmem:[%s7113_s0 + $0xf8] sm:$0xff] }
  0x10   :  { %109 = vmatpush.msra.mxu0 %v90_v7  ;;  %4360 = vmatpush.msra.mxu2 %v90_v7  ;;  %v20_v20 = vld [vmem:[%s7113_s0 + $0x10] sm:$0xff]  ;;  %v50_v21 = vld [vmem:[%s7113_s0 + $0x100] sm:$0xff]  ;;  %v21_v22 = vld [vmem:[%s7113_s0 + $0x18] sm:$0xff] }
  0x11   :  { %4359 = vmatpush.msra.mxu1 %v90_v7  ;;  %4361 = vmatpush.msra.mxu3 %v90_v7  ;;  %v51_v23 = vld [vmem:[%s7113_s0 + $0x108] sm:$0xff]  ;;  %v22_v24 = vld [vmem:[%s7113_s0 + $0x20] sm:$0xff]  ;;  %v52_v25 = vld [vmem:[%s7113_s0 + $0x110] sm:$0xff] }
  0x12   :  { %110 = vmatpush.msra.mxu0 %v89_v8  ;;  %4363 = vmatpush.msra.mxu2 %v89_v8  ;;  %v23_v26 = vld [vmem:[%s7113_s0 + $0x28] sm:$0xff]  ;;  %v53_v27 = vld [vmem:[%s7113_s0 + $0x118] sm:$0xff]  ;;  %v42_v28 = vld [vmem:[%s7113_s0 + $0xc0] sm:$0xff] }
  0x13   :  { %4362 = vmatpush.msra.mxu1 %v89_v8  ;;  %4364 = vmatpush.msra.mxu3 %v89_v8  ;;  %v24_v29 = vld [vmem:[%s7113_s0 + $0x30] sm:$0xff]  ;;  %v54_v30 = vld [vmem:[%s7113_s0 + $0x120] sm:$0xff]  ;;  %v43_v31 = vld [vmem:[%s7113_s0 + $0xc8] sm:$0xff] }
  0x14   :  { %111 = vmatpush.msra.mxu0 %v88_v9  ;;  %4366 = vmatpush.msra.mxu2 %v88_v9  ;;  %v63_v32 = vld [vmem:[%s7113_s0 + $0x168] sm:$0xff]  ;;  %v25_v33 = vld [vmem:[%s7113_s0 + $0x38] sm:$0xff]  ;;  %v44_v35 = vld [vmem:[%s7113_s0 + $0xd0] sm:$0xff] }
  0x15   :  { %4365 = vmatpush.msra.mxu1 %v88_v9  ;;  %4367 = vmatpush.msra.mxu3 %v88_v9  ;;  %v55_v34 = vld [vmem:[%s7113_s0 + $0x128] sm:$0xff]  ;;  %v64_v36 = vld [vmem:[%s7113_s0 + $0x170] sm:$0xff]  ;;  %v26_v37 = vld [vmem:[%s7113_s0 + $0x40] sm:$0xff] }
  0x16   :  { %112 = vmatpush.msra.mxu0 %v87_v10  ;;  %4369 = vmatpush.msra.mxu2 %v87_v10  ;;  %v56_v38 = vld [vmem:[%s7113_s0 + $0x130] sm:$0xff]  ;;  %v45_v39 = vld [vmem:[%s7113_s0 + $0xd8] sm:$0xff]  ;;  %v27_v41 = vld [vmem:[%s7113_s0 + $0x48] sm:$0xff] }
  0x17   :  { %4368 = vmatpush.msra.mxu1 %v87_v10  ;;  %4370 = vmatpush.msra.mxu3 %v87_v10  ;;  %v65_v40 = vld [vmem:[%s7113_s0 + $0x178] sm:$0xff]  ;;  %v46_v43 = vld [vmem:[%s7113_s0 + $0xe0] sm:$0xff]  ;;  %v28_v45 = vld [vmem:[%s7113_s0 + $0x50] sm:$0xff] }
  0x18   :  { %113 = vmatpush.msra.mxu0 %v86_v11  ;;  %4372 = vmatpush.msra.mxu2 %v86_v11  ;;  %v57_v42 = vld [vmem:[%s7113_s0 + $0x138] sm:$0xff]  ;;  %v66_v44 = vld [vmem:[%s7113_s0 + $0x180] sm:$0xff]  ;;  %v47_v47 = vld [vmem:[%s7113_s0 + $0xe8] sm:$0xff] }
  0x19   :  { %4371 = vmatpush.msra.mxu1 %v86_v11  ;;  %4373 = vmatpush.msra.mxu3 %v86_v11  ;;  %v58_v46 = vld [vmem:[%s7113_s0 + $0x140] sm:$0xff]  ;;  %v67_v48 = vld [vmem:[%s7113_s0 + $0x188] sm:$0xff]  ;;  %v29_v49 = vld [vmem:[%s7113_s0 + $0x58] sm:$0xff] }
  0x1a   :  { %114 = vmatpush.msra.mxu0 %v85_v12  ;;  %4375 = vmatpush.msra.mxu2 %v85_v12  ;;  %v59_v50 = vld [vmem:[%s7113_s0 + $0x148] sm:$0xff]  ;;  %v30_v51 = vld [vmem:[%s7113_s0 + $0x60] sm:$0xff]  ;;  %v60_v52 = vld [vmem:[%s7113_s0 + $0x150] sm:$0xff] }
  0x1b   :  { %4374 = vmatpush.msra.mxu1 %v85_v12  ;;  %4376 = vmatpush.msra.mxu3 %v85_v12  ;;  %v68_v53 = vld [vmem:[%s7113_s0 + $0x190] sm:$0xff]  ;;  %v31_v54 = vld [vmem:[%s7113_s0 + $0x68] sm:$0xff]  ;;  %v61_v55 = vld [vmem:[%s7113_s0 + $0x158] sm:$0xff] }
  0x1c   :  { %115 = vmatpush.msra.mxu0 %v84_v13  ;;  %4378 = vmatpush.msra.mxu2 %v84_v13  ;;  %v32_v56 = vld [vmem:[%s7113_s0 + $0x70] sm:$0xff]  ;;  %v62_v57 = vld [vmem:[%s7113_s0 + $0x160] sm:$0xff]  ;;  %v69_v58 = vld [vmem:[%s7113_s0 + $0x198] sm:$0xff] }
  0x1d   :  { %4377 = vmatpush.msra.mxu1 %v84_v13  ;;  %4379 = vmatpush.msra.mxu3 %v84_v13  ;;  %v33_v59 = vld [vmem:[%s7113_s0 + $0x78] sm:$0xff]  ;;  %v4639_v60 = vld [vmem:[%s7115_s2] ss:$0 sm:$0xff]  ;;  %v4249_v1 = vld [vmem:[%s7114_s1 + $0xf0] sm:$0xff] }
  0x1e   :  { %116 = vmatpush.msra.mxu0 %v83_v14  ;;  %4381 = vmatpush.msra.mxu2 %v83_v14  ;;  %v70_v61 = vld [vmem:[%s7113_s0 + $0x1a0] sm:$0xff]  ;;  %v4250_v62 = vld [vmem:[%s7114_s1 + $0xf8] sm:$0xff]  ;;  %v4248_v3 = vld [vmem:[%s7114_s1 + $0xe8] sm:$0xff] }
  0x1f   :  { %4380 = vmatpush.msra.mxu1 %v83_v14  ;;  %4382 = vmatpush.msra.mxu3 %v83_v14  ;;  %v34_v0 = vld [vmem:[%s7113_s0 + $0x80] sm:$0xff] }
  0x20   :  { %117 = vmatpush.msra.mxu0 %v82_v15  ;;  %4384 = vmatpush.msra.mxu2 %v82_v15 }
  0x21   :  { %118 = vmatmul.f32.vlgmr.msra.gmra.mxu0 %v18_v16  ;;  %208 = vmatmul.f32.vlgmr.msra.gmra.mxu2 %v48_v17 }
  0x22   :  { %4383 = vmatpush.msra.mxu1 %v82_v15  ;;  %4385 = vmatpush.msra.mxu3 %v82_v15 }
  0x23   :  { %190 = vmatmul.f32.vlgmr.msra.gmra.mxu1 %v42_v28  ;;  %253 = vmatmul.f32.vlgmr.msra.gmra.mxu3 %v63_v32 }
  0x24   :  { %3029 = vmatpush.msrb.mxu1 %v4250_v62 }
  0x26   :  { %3030 = vmatpush.msrb.mxu1 %v4249_v1 }
  0x28   :  { %3031 = vmatpush.msrb.mxu1 %v4248_v3 }
  0x29   :  { %121 = vmatmul.f32.gmra.mxu0 %v19_v18  ;;  %211 = vmatmul.f32.gmra.mxu2 %v49_v19 }
  0x2b   :  { %193 = vmatmul.f32.gmra.mxu1 %v43_v31  ;;  %256 = vmatmul.f32.gmra.mxu3 %v64_v36 }
  0x31   :  { %124 = vmatmul.f32.gmra.mxu0 %v20_v20  ;;  %214 = vmatmul.f32.gmra.mxu2 %v50_v21  ;;  %v35_v20 = vld [vmem:[%s7113_s0 + $0x88] sm:$0xff] }
  0x33   :  { %196 = vmatmul.f32.gmra.mxu1 %v44_v35  ;;  %259 = vmatmul.f32.gmra.mxu3 %v65_v40 }
  0x39   :  { %127 = vmatmul.f32.gmra.mxu0 %v21_v22  ;;  %217 = vmatmul.f32.gmra.mxu2 %v51_v23 }
  0x3b   :  { %199 = vmatmul.f32.gmra.mxu1 %v45_v39  ;;  %262 = vmatmul.f32.gmra.mxu3 %v66_v44  ;;  %v4247_v39 = vld [vmem:[%s7114_s1 + $0xe0] sm:$0xff]  ;;  %v71_v44 = vld [vmem:[%s7113_s0 + $0x1a8] sm:$0xff] }
  0x3c   :  { %3032 = vmatpush.msrb.mxu1 %v4247_v39 }
  0x41   :  { %130 = vmatmul.f32.gmra.mxu0 %v22_v24  ;;  %220 = vmatmul.f32.gmra.mxu2 %v52_v25 }
  0x43   :  { %202 = vmatmul.f32.gmra.mxu1 %v46_v43  ;;  %265 = vmatmul.f32.gmra.mxu3 %v67_v48 }
  0x49   :  { %133 = vmatmul.f32.gmra.mxu0 %v23_v26  ;;  %223 = vmatmul.f32.gmra.mxu2 %v53_v27 }
  0x4b   :  { %205 = vmatmul.f32.gmra.mxu1 %v47_v47  ;;  %268 = vmatmul.f32.gmra.mxu3 %v68_v53 }
  0x51   :  { %136 = vmatmul.f32.gmra.mxu0 %v24_v29  ;;  %226 = vmatmul.f32.gmra.mxu2 %v54_v30 }
  0x53   :  { %271 = vmatmul.f32.gmra.mxu3 %v69_v58  ;;  %v4245_v58 = vld [vmem:[%s7114_s1 + $0xd0] sm:$0xff] }
  0x59   :  { %139 = vmatmul.f32.gmra.mxu0 %v25_v33  ;;  %229 = vmatmul.f32.gmra.mxu2 %v55_v34 }
  0x5b   :  { %274 = vmatmul.f32.gmra.mxu3 %v70_v61 }
  0x61   :  { %142 = vmatmul.f32.gmra.mxu0 %v26_v37  ;;  %232 = vmatmul.f32.gmra.mxu2 %v56_v38 }
  0x63   :  { %277 = vmatmul.f32.gmra.mxu3 %v71_v44 }
  0x69   :  { %145 = vmatmul.f32.gmra.mxu0 %v27_v41  ;;  %235 = vmatmul.f32.gmra.mxu2 %v57_v42 }
  0x71   :  { %148 = vmatmul.f32.gmra.mxu0 %v28_v45  ;;  %238 = vmatmul.f32.gmra.mxu2 %v58_v46 }
  0x79   :  { %151 = vmatmul.f32.gmra.mxu0 %v29_v49  ;;  %241 = vmatmul.f32.gmra.mxu2 %v59_v50  ;;  %v4246_v49 = vld [vmem:[%s7114_s1 + $0xd8] sm:$0xff] }
  0x7a   :  { %3033 = vmatpush.msrb.mxu1 %v4246_v49 }
  0x7c   :  { %3034 = vmatpush.msrb.mxu1 %v4245_v58 }
  0x81   :  { %154 = vmatmul.f32.gmra.mxu0 %v30_v51  ;;  %244 = vmatmul.f32.gmra.mxu2 %v60_v52  ;;  %v36_v51 = vld [vmem:[%s7113_s0 + $0x90] sm:$0xff] }
  0x89   :  { %157 = vmatmul.f32.gmra.mxu0 %v31_v54  ;;  %247 = vmatmul.f32.gmra.mxu2 %v61_v55 }
  0x91   :  { %160 = vmatmul.f32.gmra.mxu0 %v32_v56  ;;  %250 = vmatmul.f32.gmra.mxu2 %v62_v57 }
  0x99   :  { %163 = vmatmul.f32.gmra.mxu0 %v33_v59 }
  0x9e   :  { %v119_v63 = vpop.f32.mrf.mxu0 }
  0x9f   :  { %v120_v2 = vadd.f32 %v4639_v60, %v119_v63 }
  0xa1   :  { %v311_v4 = vmax.f32 %v120_v2, 0.0  ;;  %166 = vmatmul.f32.gmra.mxu0 %v34_v0 }
  0xa3   :  { %v439_v5 = vrot.slane %v311_v4, 2  ;;  %v440_v6 = vrot.slane %v311_v4, 4  ;;  %v441_v7 = vrot.slane %v311_v4, 6  ;;  %v824_v8 = vsel %vm823_vm0, %v311_v4, -inf  ;;  %v4244_v4 = vld [vmem:[%s7114_s1 + $0xc8] sm:$0xff] }
  0xa4   :  { %v825_v9 = vrot.slane %v824_v8, 4  ;;  %v209_v10 = vpop.f32.mrf.mxu2  ;;  %3035 = vmatpush.msrb.mxu1 %v4244_v4 }
  0xa5   :  { %v831_v11 = vsel %vm823_vm0, %v439_v5, -inf  ;;  %v838_v12 = vsel %vm823_vm0, %v440_v6, -inf  ;;  %v845_v13 = vsel %vm823_vm0, %v441_v7, -inf  ;;  %v210_v14 = vadd.f32 %v4639_v60, %v209_v10 }
  0xa6   :  { %v826_v15 = vmax.f32 %v824_v8, %v825_v9  ;;  %v832_v16 = vrot.slane %v831_v11, 4  ;;  %v839_v17 = vrot.slane %v838_v12, 4  ;;  %v846_v18 = vrot.slane %v845_v13, 4  ;;  %v122_v19 = vpop.f32.mrf.mxu0 }
  0xa7   :  { %v341_v21 = vmax.f32 %v210_v14, 0.0  ;;  %v123_v22 = vadd.f32 %v4639_v60, %v122_v19 }
  0xa8   :  { %v827_v23 = vrot.slane %v826_v15, 2  ;;  %v833_v24 = vmax.f32 %v831_v11, %v832_v16  ;;  %v840_v25 = vmax.f32 %v838_v12, %v839_v17  ;;  %v847_v26 = vmax.f32 %v845_v13, %v846_v18 }
  0xa9   :  { %v529_v27 = vrot.slane %v341_v21, 2  ;;  %v530_v28 = vrot.slane %v341_v21, 4  ;;  %v531_v29 = vrot.slane %v341_v21, 6  ;;  %v1664_v30 = vsel %vm823_vm0, %v341_v21, -inf  ;;  %169 = vmatmul.f32.gmra.mxu0 %v35_v20 }
  0xaa   :  { %v828_v31 = vmax.f32 %v826_v15, %v827_v23  ;;  %v834_v32 = vrot.slane %v833_v24, 2  ;;  %v841_v33 = vrot.slane %v840_v25, 2  ;;  %v848_v34 = vrot.slane %v847_v26, 2 }
  0xab   :  { %v1665_v35 = vrot.slane %v1664_v30, 4  ;;  %v1671_v36 = vsel %vm823_vm0, %v529_v27, -inf  ;;  %v1678_v37 = vsel %vm823_vm0, %v530_v28, -inf  ;;  %v1685_v38 = vsel %vm823_vm0, %v531_v29, -inf }
  0xac   :  { %v829_v40 = vrot.slane %v828_v31, 1  ;;  %v835_v41 = vmax.f32 %v833_v24, %v834_v32  ;;  %v842_v42 = vmax.f32 %v840_v25, %v841_v33  ;;  %v849_v43 = vmax.f32 %v847_v26, %v848_v34  ;;  %v212_v56 = vpop.f32.mrf.mxu2  ;;  %v37_v25 = vld [vmem:[%s7113_s0 + $0x98] sm:$0xff]  ;;  %v4243_v26 = vld [vmem:[%s7114_s1 + $0xc0] sm:$0xff] }
  0xad   :  { %v1666_v45 = vmax.f32 %v1664_v30, %v1665_v35  ;;  %v1672_v46 = vrot.slane %v1671_v36, 4  ;;  %v1679_v47 = vrot.slane %v1678_v37, 4  ;;  %v1686_v48 = vrot.slane %v1685_v38, 4  ;;  %3036 = vmatpush.msrb.mxu1 %v4243_v26 }
  0xae   :  { %v4679_v50 = vmax.f32 %v828_v31, %v829_v40  ;;  %v125_v57 = vpop.f32.mrf.mxu0  ;;  %v836_v59 = vrot.slane %v835_v41, 1  ;;  %v843_v61 = vrot.slane %v842_v42, 1  ;;  %v850_v62 = vrot.slane %v849_v43, 1  ;;  %v72_v31 = vld [vmem:[%s7113_s0 + $0x1b0] sm:$0xff] }
  0xaf   :  { %v1667_v52 = vrot.slane %v1666_v45, 2  ;;  %v1673_v53 = vmax.f32 %v1671_v36, %v1672_v46  ;;  %v1680_v54 = vmax.f32 %v1678_v37, %v1679_v47  ;;  %v1687_v55 = vmax.f32 %v1685_v38, %v1686_v48  ;;  %280 = vmatmul.f32.gmra.mxu3 %v72_v31  ;;  %v4242_v36 = vld [vmem:[%s7114_s1 + $0xb8] sm:$0xff]  ;;  %v4241_v47 = vld [vmem:[%s7114_s1 + $0xb0] sm:$0xff] }
  0xb0   :  { %v312_v63 = vmax.f32 %v123_v22, 0.0  ;;  %v4696_v17 = vmax.f32 %v835_v41, %v836_v59  ;;  %v4698_v18 = vmax.f32 %v842_v42, %v843_v61  ;;  %v4706_v27 = vmax.f32 %v849_v43, %v850_v62  ;;  %3037 = vmatpush.msrb.mxu1 %v4242_v36 }
  0xb1   :  { %v1668_v0 = vmax.f32 %v1666_v45, %v1667_v52  ;;  %v1674_v1 = vrot.slane %v1673_v53, 2  ;;  %v1681_v2 = vrot.slane %v1680_v54, 2  ;;  %v1688_v3 = vrot.slane %v1687_v55, 2  ;;  %172 = vmatmul.f32.gmra.mxu0 %v36_v51 }
  0xb2   :  { %v442_v5 = vrot.slane %v312_v63, 2  ;;  %v443_v6 = vrot.slane %v312_v63, 4  ;;  %v444_v7 = vrot.slane %v312_v63, 6  ;;  %v852_v8 = vsel %vm823_vm0, %v312_v63, -inf  ;;  %3038 = vmatpush.msrb.mxu1 %v4241_v47 }
  0xb3   :  { %v1669_v9 = vrot.slane %v1668_v0, 1  ;;  %v1675_v10 = vmax.f32 %v1673_v53, %v1674_v1  ;;  %v1682_v11 = vmax.f32 %v1680_v54, %v1681_v2  ;;  %v4691_v12 = vmax.f32 %v1687_v55, %v1688_v3  ;;  %v38_v3 = vld [vmem:[%s7113_s0 + $0xa0] sm:$0xff] }
  0xb4   :  { %v853_v13 = vrot.slane %v852_v8, 4  ;;  %v859_v14 = vsel %vm823_vm0, %v442_v5, -inf  ;;  %v866_v15 = vsel %vm823_vm0, %v443_v6, -inf  ;;  %v873_v16 = vsel %vm823_vm0, %v444_v7, -inf  ;;  %v215_v41 = vpop.f32.mrf.mxu2 }
  0xb5   :  { %7293 = vst [vmem:[#allocation5_spill] sm:$0xff] %v4691_v12  ;;  %v1676_v19 = vrot.slane %v1675_v10, 1  ;;  %v1683_v20 = vrot.slane %v1682_v11, 1  ;;  %v860_v22 = vrot.slane %v859_v14, 4  ;;  %v867_v23 = vrot.slane %v866_v15, 4 }
  0xb6   :  { %v854_v21 = vmax.f32 %v852_v8, %v853_v13  ;;  %v874_v24 = vrot.slane %v873_v16, 4  ;;  %v4708_v28 = vmax.f32 %v1668_v0, %v1669_v9  ;;  %v213_v29 = vadd.f32 %v4639_v60, %v212_v56  ;;  %v128_v42 = vpop.f32.mrf.mxu0 }
  0xb7   :  { %v126_v30 = vadd.f32 %v4639_v60, %v125_v57  ;;  %v4715_v32 = vmax.f32 %v1675_v10, %v1676_v19  ;;  %v861_v35 = vmax.f32 %v859_v14, %v860_v22  ;;  %v4721_v37 = vmax.f32 %v1682_v11, %v1683_v20  ;;  %v4240_v57 = vld [vmem:[%s7114_s1 + $0xa8] sm:$0xff] }
  0xb8   :  { %7294 = vst [vmem:[#allocation6_spill] sm:$0xff] %v4708_v28  ;;  %v855_v34 = vrot.slane %v854_v21, 2  ;;  %v4723_v38 = vmax.f32 %v866_v15, %v867_v23  ;;  %v342_v39 = vmax.f32 %v213_v29, 0.0  ;;  %v4725_v45 = vmax.f32 %v873_v16, %v874_v24  ;;  %3039 = vmatpush.msrb.mxu1 %v4240_v57 }
  0xb9   :  { %7295 = vst [vmem:[#allocation7_spill] sm:$0xff] %v4715_v32  ;;  %v313_v40 = vmax.f32 %v126_v30, 0.0  ;;  %175 = vmatmul.f32.gmra.mxu0 %v37_v25  ;;  %v862_v44 = vrot.slane %v861_v35, 2  ;;  %v216_v46 = vadd.f32 %v4639_v60, %v215_v41  ;;  %v4733_v56 = vadd.f32 %v4639_v60, %v128_v42 }
  0xba   :  { %7296 = vst [vmem:[#allocation8_spill] sm:$0xff] %v4721_v37  ;;  %v856_v43 = vmax.f32 %v854_v21, %v855_v34  ;;  %v532_v48 = vrot.slane %v342_v39, 2  ;;  %v533_v49 = vrot.slane %v342_v39, 4  ;;  %v534_v51 = vrot.slane %v342_v39, 6 }
  0xbb   :  { %v1692_v52 = vsel %vm823_vm0, %v342_v39, -inf  ;;  %v445_v55 = vrot.slane %v313_v40, 2  ;;  %v446_v62 = vrot.slane %v313_v40, 4  ;;  %v4747_v4 = vmax.f32 %v861_v35, %v862_v44 }
  0xbc   :  { %v857_v53 = vrot.slane %v856_v43, 1  ;;  %v1693_v54 = vrot.slane %v1692_v52, 4  ;;  %v1699_v58 = vsel %vm823_vm0, %v532_v48, -inf  ;;  %v1706_v59 = vsel %vm823_vm0, %v533_v49, -inf  ;;  %v218_v41 = vpop.f32.mrf.mxu2 }
  0xbd   :  { %v4741_v61 = vsel %vm823_vm0, %v534_v51, -inf  ;;  %v1700_v1 = vrot.slane %v1699_v58, 4  ;;  %v1707_v2 = vrot.slane %v1706_v59, 4  ;;  %v447_v5 = vrot.slane %v313_v40, 6 }
  0xbe   :  { %7297 = vst [vmem:[#allocation9_spill] sm:$0xff] %v4741_v61  ;;  %v1694_v0 = vmax.f32 %v1692_v52, %v1693_v54  ;;  %v880_v6 = vsel %vm823_vm0, %v313_v40, -inf  ;;  %v887_v7 = vsel %vm823_vm0, %v445_v55, -inf  ;;  %v4751_v8 = vmax.f32 %v856_v43, %v857_v53  ;;  %v4239_v52 = vld [vmem:[%s7114_s1 + $0xa0] sm:$0xff] }
  0xbf   :  { %v881_v11 = vrot.slane %v880_v6, 4  ;;  %v888_v13 = vrot.slane %v887_v7, 4  ;;  %v894_v14 = vsel %vm823_vm0, %v446_v62, -inf  ;;  %v901_v15 = vsel %vm823_vm0, %v447_v5, -inf  ;;  %3040 = vmatpush.msrb.mxu1 %v4239_v52 }
  0xc0   :  { %v1695_v9 = vrot.slane %v1694_v0, 2  ;;  %v343_v16 = vmax.f32 %v216_v46, 0.0  ;;  %v4756_v19 = vmax.f32 %v1699_v58, %v1700_v1  ;;  %v4758_v20 = vmax.f32 %v1706_v59, %v1707_v2  ;;  %v73_v58 = vld [vmem:[%s7113_s0 + $0x1b8] sm:$0xff] }
  0xc1   :  { %178 = vmatmul.f32.gmra.mxu0 %v38_v3  ;;  %v882_v21 = vmax.f32 %v880_v6, %v881_v11  ;;  %v895_v22 = vrot.slane %v894_v14, 4  ;;  %v889_v23 = vmax.f32 %v887_v7, %v888_v13  ;;  %v902_v24 = vrot.slane %v901_v15, 4  ;;  %283 = vmatmul.f32.gmra.mxu3 %v73_v58  ;;  %v4238_v2 = vld [vmem:[%s7114_s1 + $0x98] sm:$0xff] }
  0xc2   :  { %7298 = vst [vmem:[#allocation10_spill] sm:$0xff] %v4756_v19  ;;  %v535_v25 = vrot.slane %v343_v16, 2  ;;  %v536_v26 = vrot.slane %v343_v16, 4  ;;  %v4760_v29 = vmax.f32 %v1694_v0, %v1695_v9  ;;  %v537_v34 = vrot.slane %v343_v16, 6  ;;  %3041 = vmatpush.msrb.mxu1 %v4238_v2  ;;  %v39_v9 = vld [vmem:[%s7113_s0 + $0xa8] sm:$0xff] }
  0xc3   :  { %7299 = vst [vmem:[#allocation11_spill] sm:$0xff] %v4758_v20  ;;  %v883_v30 = vrot.slane %v882_v21, 2  ;;  %v896_v31 = vmax.f32 %v894_v14, %v895_v22  ;;  %v890_v35 = vrot.slane %v889_v23, 2  ;;  %v903_v36 = vmax.f32 %v901_v15, %v902_v24 }
  0xc4   :  { %7300 = vst [vmem:[#allocation12_spill] sm:$0xff] %v4760_v29  ;;  %v1720_v39 = vsel %vm823_vm0, %v343_v16, -inf  ;;  %v1727_v40 = vsel %vm823_vm0, %v535_v25, -inf  ;;  %v1734_v49 = vsel %vm823_vm0, %v536_v26, -inf  ;;  %v1741_v51 = vsel %vm823_vm0, %v537_v34, -inf  ;;  %v4237_v16 = vld [vmem:[%s7114_s1 + $0x90] sm:$0xff]  ;;  %v131_v34 = vpop.f32.mrf.mxu0 }
  0xc5   :  { %v884_v42 = vmax.f32 %v882_v21, %v883_v30  ;;  %v897_v43 = vrot.slane %v896_v31, 2  ;;  %v1721_v44 = vrot.slane %v1720_v39, 4  ;;  %v1728_v46 = vrot.slane %v1727_v40, 4  ;;  %3042 = vmatpush.msrb.mxu1 %v4237_v16 }
  0xc6   :  { %v891_v47 = vmax.f32 %v889_v23, %v890_v35  ;;  %v904_v48 = vrot.slane %v903_v36, 2  ;;  %v1735_v0 = vrot.slane %v1734_v49, 4  ;;  %v1742_v1 = vrot.slane %v1741_v51, 4  ;;  %v4236_v35 = vld [vmem:[%s7114_s1 + $0x88] sm:$0xff] }
  0xc7   :  { %v885_v53 = vrot.slane %v884_v42, 1  ;;  %v898_v54 = vmax.f32 %v896_v31, %v897_v43  ;;  %v1722_v55 = vmax.f32 %v1720_v39, %v1721_v44  ;;  %v1729_v57 = vmax.f32 %v1727_v40, %v1728_v46  ;;  %3043 = vmatpush.msrb.mxu1 %v4236_v35 }
  0xc8   :  { %v892_v59 = vrot.slane %v891_v47, 1  ;;  %v905_v62 = vmax.f32 %v903_v36, %v904_v48  ;;  %v1736_v14 = vmax.f32 %v1734_v49, %v1735_v0  ;;  %v1743_v15 = vmax.f32 %v1741_v51, %v1742_v1  ;;  %v221_v48 = vpop.f32.mrf.mxu2  ;;  %v74_v1 = vld [vmem:[%s7113_s0 + $0x1c0] sm:$0xff] }
  0xc9   :  { %v4775_v3 = vmax.f32 %v884_v42, %v885_v53  ;;  %v899_v5 = vrot.slane %v898_v54, 1  ;;  %v1723_v6 = vrot.slane %v1722_v55, 2  ;;  %v1730_v7 = vrot.slane %v1729_v57, 2  ;;  %181 = vmatmul.f32.gmra.mxu0 %v39_v9  ;;  %286 = vmatmul.f32.gmra.mxu3 %v74_v1 }
  0xca   :  { %v4780_v11 = vmax.f32 %v891_v47, %v892_v59  ;;  %v906_v13 = vrot.slane %v905_v62, 1  ;;  %v1737_v30 = vrot.slane %v1736_v14, 2  ;;  %v1744_v31 = vrot.slane %v1743_v15, 2 }
  0xcb   :  { %v1724_v23 = vmax.f32 %v1722_v55, %v1723_v6  ;;  %v1731_v24 = vmax.f32 %v1729_v57, %v1730_v7  ;;  %v4787_v25 = vmax.f32 %v898_v54, %v899_v5  ;;  %v314_v40 = vmax.f32 %v4733_v56, 0.0  ;;  %v4235_v57 = vld [vmem:[%s7114_s1 + $0x80] sm:$0xff] }
  0xcc   :  { %v219_v42 = vadd.f32 %v4639_v60, %v218_v41  ;;  %v4796_v43 = vmax.f32 %v905_v62, %v906_v13  ;;  %v1738_v46 = vmax.f32 %v1736_v14, %v1737_v30  ;;  %v4800_v47 = vmax.f32 %v1743_v15, %v1744_v31  ;;  %3044 = vmatpush.msrb.mxu1 %v4235_v57 }
  0xcd   :  { %v1725_v36 = vrot.slane %v1724_v23, 1  ;;  %v1732_v39 = vrot.slane %v1731_v24, 1  ;;  %v448_v49 = vrot.slane %v314_v40, 2  ;;  %v449_v51 = vrot.slane %v314_v40, 4 }
  0xce   :  { %7301 = vst [vmem:[#allocation13_spill] sm:$0xff] %v4800_v47  ;;  %v132_v52 = vadd.f32 %v4639_v60, %v131_v34  ;;  %v222_v53 = vadd.f32 %v4639_v60, %v221_v48  ;;  %v450_v41 = vrot.slane %v314_v40, 6  ;;  %v908_v55 = vsel %vm823_vm0, %v314_v40, -inf }
  0xcf   :  { %v4804_v54 = vmax.f32 %v1724_v23, %v1725_v36  ;;  %v4806_v56 = vmax.f32 %v1731_v24, %v1732_v39  ;;  %v909_v58 = vrot.slane %v908_v55, 4  ;;  %v915_v59 = vsel %vm823_vm0, %v448_v49, -inf }
  0xd0   :  { %v922_v62 = vsel %vm823_vm0, %v449_v51, -inf  ;;  %v344_v0 = vmax.f32 %v219_v42, 0.0  ;;  %v1739_v2 = vrot.slane %v1738_v46, 1  ;;  %v916_v5 = vrot.slane %v915_v59, 4 }
  0xd1   :  { %7302 = vst [vmem:[#allocation14_spill] sm:$0xff] %v4804_v54  ;;  %v923_v6 = vrot.slane %v922_v62, 4  ;;  %v929_v7 = vsel %vm823_vm0, %v450_v41, -inf  ;;  %v910_v9 = vmax.f32 %v908_v55, %v909_v58 }
  0xd2   :  { %7303 = vst [vmem:[#allocation15_spill] sm:$0xff] %v4806_v56  ;;  %v930_v13 = vrot.slane %v929_v7, 4  ;;  %v538_v14 = vrot.slane %v344_v0, 2  ;;  %v539_v15 = vrot.slane %v344_v0, 4  ;;  %v917_v16 = vmax.f32 %v915_v59, %v916_v5 }
  0xd3   :  { %v4818_v23 = vmax.f32 %v922_v62, %v923_v6  ;;  %v540_v24 = vrot.slane %v344_v0, 6  ;;  %v1748_v30 = vsel %vm823_vm0, %v344_v0, -inf  ;;  %v911_v34 = vrot.slane %v910_v9, 2 }
  0xd4   :  { %v1749_v35 = vrot.slane %v1748_v30, 4  ;;  %v1755_v36 = vsel %vm823_vm0, %v538_v14, -inf  ;;  %v4823_v39 = vmax.f32 %v1738_v46, %v1739_v2  ;;  %v918_v40 = vrot.slane %v917_v16, 2 }
  0xd5   :  { %v1756_v42 = vrot.slane %v1755_v36, 4  ;;  %v1762_v48 = vsel %vm823_vm0, %v539_v15, -inf  ;;  %v912_v49 = vmax.f32 %v910_v9, %v911_v34  ;;  %v4827_v55 = vsel %vm823_vm0, %v540_v24, -inf }
  0xd6   :  { %7304 = vst [vmem:[#allocation16_spill] sm:$0xff] %v4823_v39  ;;  %v1750_v51 = vmax.f32 %v1748_v30, %v1749_v35  ;;  %v1763_v41 = vrot.slane %v1762_v48, 4  ;;  %v4830_v58 = vmax.f32 %v929_v7, %v930_v13  ;;  %v315_v62 = vmax.f32 %v132_v52, 0.0 }
  0xd7   :  { %7305 = vst [vmem:[#allocation17_spill] sm:$0xff] %v4827_v55  ;;  %v4832_v59 = vmax.f32 %v1755_v36, %v1756_v42  ;;  %v4834_v0 = vmax.f32 %v917_v16, %v918_v40  ;;  %v345_v2 = vmax.f32 %v222_v53, 0.0  ;;  %v913_v5 = vrot.slane %v912_v49, 1  ;;  %v134_v42 = vpop.f32.mrf.mxu0 }
  0xd8   :  { %v1751_v46 = vrot.slane %v1750_v51, 2  ;;  %v451_v6 = vrot.slane %v315_v62, 2  ;;  %v452_v9 = vrot.slane %v315_v62, 4  ;;  %v453_v14 = vrot.slane %v315_v62, 6 }
  0xd9   :  { %7306 = vst [vmem:[#allocation18_spill] sm:$0xff] %v4832_v59  ;;  %v4838_v24 = vmax.f32 %v1762_v48, %v1763_v41  ;;  %v936_v7 = vsel %vm823_vm0, %v315_v62, -inf  ;;  %v541_v13 = vrot.slane %v345_v2, 2  ;;  %v542_v15 = vrot.slane %v345_v2, 4 }
  0xda   :  { %v937_v30 = vrot.slane %v936_v7, 4  ;;  %v943_v52 = vsel %vm823_vm0, %v451_v6, -inf  ;;  %v950_v16 = vsel %vm823_vm0, %v452_v9, -inf  ;;  %v957_v34 = vsel %vm823_vm0, %v453_v14, -inf }
  0xdb   :  { %7307 = vst [vmem:[#allocation19_spill] sm:$0xff] %v4838_v24  ;;  %v4844_v35 = vmax.f32 %v1750_v51, %v1751_v46  ;;  %v944_v53 = vrot.slane %v943_v52, 4  ;;  %v951_v36 = vrot.slane %v950_v16, 4  ;;  %v958_v40 = vrot.slane %v957_v34, 4 }
  0xdc   :  { %v938_v1 = vmax.f32 %v936_v7, %v937_v30  ;;  %v543_v48 = vrot.slane %v345_v2, 6  ;;  %v1776_v41 = vsel %vm823_vm0, %v345_v2, -inf  ;;  %v1783_v9 = vsel %vm823_vm0, %v541_v13, -inf }
  0xdd   :  { %7308 = vst [vmem:[#allocation20_spill] sm:$0xff] %v4844_v35  ;;  %v945_v62 = vmax.f32 %v943_v52, %v944_v53  ;;  %v952_v31 = vmax.f32 %v950_v16, %v951_v36  ;;  %v959_v10 = vmax.f32 %v957_v34, %v958_v40  ;;  %v1777_v22 = vrot.slane %v1776_v41, 4 }
  0xde   :  { %v939_v6 = vrot.slane %v938_v1, 2  ;;  %v1790_v14 = vsel %vm823_vm0, %v542_v15, -inf  ;;  %v1797_v51 = vsel %vm823_vm0, %v543_v48, -inf  ;;  %v1784_v30 = vrot.slane %v1783_v9, 4 }
  0xdf   :  { %v946_v46 = vrot.slane %v945_v62, 2  ;;  %v953_v21 = vrot.slane %v952_v31, 2  ;;  %v960_v33 = vrot.slane %v959_v10, 2  ;;  %v1778_v44 = vmax.f32 %v1776_v41, %v1777_v22 }
  0xe0   :  { %v940_v7 = vmax.f32 %v938_v1, %v939_v6  ;;  %v1791_v26 = vrot.slane %v1790_v14, 4  ;;  %v1798_v57 = vrot.slane %v1797_v51, 4  ;;  %v1785_v36 = vmax.f32 %v1783_v9, %v1784_v30 }
  0xe1   :  { %v947_v2 = vmax.f32 %v945_v62, %v946_v46  ;;  %v954_v52 = vmax.f32 %v952_v31, %v953_v21  ;;  %v4850_v16 = vmax.f32 %v959_v10, %v960_v33  ;;  %v1779_v34 = vrot.slane %v1778_v44, 2  ;;  %v224_v31 = vpop.f32.mrf.mxu2  ;;  %v40_v46 = vld [vmem:[%s7113_s0 + $0xb0] sm:$0xff] }
  0xe2   :  { %v941_v53 = vrot.slane %v940_v7, 1  ;;  %v1792_v13 = vmax.f32 %v1790_v14, %v1791_v26  ;;  %v1799_v40 = vmax.f32 %v1797_v51, %v1798_v57  ;;  %v4852_v15 = vmax.f32 %v912_v49, %v913_v5  ;;  %v137_v26 = vpop.f32.mrf.mxu0  ;;  %184 = vmatmul.f32.gmra.mxu0 %v40_v46 }
  0xe3   :  { %v948_v48 = vrot.slane %v947_v2, 1  ;;  %v955_v63 = vrot.slane %v954_v52, 1  ;;  %v1780_v39 = vmax.f32 %v1778_v44, %v1779_v34  ;;  %v1786_v1 = vrot.slane %v1785_v36, 2 }
  0xe4   :  { %v1793_v41 = vrot.slane %v1792_v13, 2  ;;  %v1800_v6 = vrot.slane %v1799_v40, 2  ;;  %v4855_v55 = vmax.f32 %v940_v7, %v941_v53  ;;  %v135_v21 = vadd.f32 %v4639_v60, %v134_v42 }
  0xe5   :  { %v1781_v10 = vrot.slane %v1780_v39, 1  ;;  %v1787_v57 = vmax.f32 %v1785_v36, %v1786_v1  ;;  %v225_v44 = vadd.f32 %v4639_v60, %v224_v31  ;;  %v4862_v62 = vmax.f32 %v947_v2, %v948_v48 }
  0xe6   :  { %v1794_v49 = vmax.f32 %v1792_v13, %v1793_v41  ;;  %v4859_v5 = vmax.f32 %v1799_v40, %v1800_v6  ;;  %v4864_v9 = vmax.f32 %v954_v52, %v955_v63  ;;  %v316_v51 = vmax.f32 %v135_v21, 0.0 }
  0xe7   :  { %v4866_v14 = vmax.f32 %v1780_v39, %v1781_v10  ;;  %v1788_v42 = vrot.slane %v1787_v57, 1  ;;  %v346_v30 = vmax.f32 %v225_v44, 0.0  ;;  %v138_v34 = vadd.f32 %v4639_v60, %v137_v26 }
  0xe8   :  { %7309 = vst [vmem:[#allocation21_spill] sm:$0xff] %v4859_v5  ;;  %v1795_v7 = vrot.slane %v1794_v49, 1  ;;  %v454_v53 = vrot.slane %v316_v51, 2  ;;  %v455_v36 = vrot.slane %v316_v51, 4  ;;  %v456_v13 = vrot.slane %v316_v51, 6 }
  0xe9   :  { %7310 = vst [vmem:[#allocation22_spill] sm:$0xff] %v4866_v14  ;;  %v864_v2 = vrot.slane %v4747_v4, 1  ;;  %v4873_v63 = vmax.f32 %v1787_v57, %v1788_v42  ;;  %v964_v52 = vsel %vm823_vm0, %v316_v51, -inf  ;;  %v544_v40 = vrot.slane %v346_v30, 2  ;;  %v4903_v42 = vpop.f32.mrf.mxu2 }
  0xea   :  { %v965_v1 = vrot.slane %v964_v52, 4  ;;  %v971_v41 = vsel %vm823_vm0, %v454_v53, -inf  ;;  %v978_v6 = vsel %vm823_vm0, %v455_v36, -inf  ;;  %v4881_v10 = vmax.f32 %v1794_v49, %v1795_v7 }
  0xeb   :  { %7311 = vst [vmem:[#allocation23_spill] sm:$0xff] %v4873_v63  ;;  %v972_v21 = vrot.slane %v971_v41, 4  ;;  %v979_v31 = vrot.slane %v978_v6, 4  ;;  %v4884_v26 = vsel %vm823_vm0, %v456_v13, -inf  ;;  %v545_v44 = vrot.slane %v346_v30, 4 }
  0xec   :  { %7312 = vst [vmem:[#allocation24_spill] sm:$0xff] %v4881_v10  ;;  %v966_v57 = vmax.f32 %v964_v52, %v965_v1  ;;  %v546_v46 = vrot.slane %v346_v30, 6  ;;  %v1804_v51 = vsel %vm823_vm0, %v346_v30, -inf  ;;  %v1811_v36 = vsel %vm823_vm0, %v544_v40, -inf }
  0xed   :  { %v4889_v48 = vmax.f32 %v971_v41, %v972_v21  ;;  %v1805_v53 = vrot.slane %v1804_v51, 4  ;;  %v1812_v7 = vrot.slane %v1811_v36, 4  ;;  %v1818_v39 = vsel %vm823_vm0, %v545_v44, -inf }
  0xee   :  { %v967_v49 = vrot.slane %v966_v57, 2  ;;  %v4894_v13 = vsel %vm823_vm0, %v546_v46, -inf  ;;  %v4896_v52 = vmax.f32 %v978_v6, %v979_v31  ;;  %v1819_v22 = vrot.slane %v1818_v39, 4 }
  0xef   :  { %7313 = vst [vmem:[#allocation25_spill] sm:$0xff] %v4894_v13  ;;  %v1806_v30 = vmax.f32 %v1804_v51, %v1805_v53  ;;  %v317_v40 = vmax.f32 %v138_v34, 0.0  ;;  %v4905_v44 = vmax.f32 %v1811_v36, %v1812_v7  ;;  %v7315_v46 = vrot.slane %v4723_v38, 2 }
  0xf0   :  { %v4899_v33 = vmax.f32 %v966_v57, %v967_v49  ;;  %v876_v31 = vrot.slane %v4725_v45, 2  ;;  %v4911_v51 = vmax.f32 %v1818_v39, %v1819_v22  ;;  %v4914_v49 = vmax.f32 %v4747_v4, %v864_v2  ;;  %v41_v22 = vld [vmem:[%s7113_s0 + $0xb8] sm:$0xff] }
  0xf1   :  { %v1807_v63 = vrot.slane %v1806_v30, 2  ;;  %7314 = vst [vmem:[#allocation26_spill] sm:$0xff] %v4905_v44  ;;  %v870_v6 = vmax.f32 %v4723_v38, %v7315_v46  ;;  %v457_v57 = vrot.slane %v317_v40, 2  ;;  %v458_v53 = vrot.slane %v317_v40, 4  ;;  %v75_v38 = vld [vmem:[%s7113_s0 + $0x1c8] sm:$0xff]  ;;  %187 = vmatmul.f32.gmra.mxu0 %v41_v22 }
  0xf2   :  { %7316 = vst [vmem:[#allocation27_spill] sm:$0xff] %v4911_v51  ;;  %v459_v1 = vrot.slane %v317_v40, 6  ;;  %v992_v36 = vsel %vm823_vm0, %v317_v40, -inf  ;;  %v877_v2 = vmax.f32 %v4725_v45, %v876_v31  ;;  %289 = vmatmul.f32.gmra.mxu3 %v75_v38  ;;  %v140_v31 = vpop.f32.mrf.mxu0 }
  0xf3   :  { %v4917_v21 = vmax.f32 %v1806_v30, %v1807_v63  ;;  %v993_v39 = vrot.slane %v992_v36, 4  ;;  %v999_v7 = vsel %vm823_vm0, %v457_v57, -inf  ;;  %v1006_v4 = vsel %vm823_vm0, %v458_v53, -inf }
  0xf4   :  { %v1000_v63 = vrot.slane %v999_v7, 4  ;;  %v1007_v30 = vrot.slane %v1006_v4, 4  ;;  %v1013_v40 = vsel %vm823_vm0, %v459_v1, -inf  ;;  %v871_v46 = vrot.slane %v870_v6, 1 }
  0xf5   :  { %7317 = vst [vmem:[#allocation28_spill] sm:$0xff] %v4917_v21  ;;  %v994_v41 = vmax.f32 %v992_v36, %v993_v39  ;;  %v1014_v56 = vrot.slane %v1013_v40, 4  ;;  %v878_v14 = vrot.slane %v877_v2, 1  ;;  %v920_v57 = vrot.slane %v4834_v0, 1 }
  0xf6   :  { %v1001_v54 = vmax.f32 %v999_v7, %v1000_v63  ;;  %v1008_v10 = vmax.f32 %v1006_v4, %v1007_v30  ;;  %v7318_v53 = vrot.slane %v4818_v23, 2  ;;  %v932_v1 = vrot.slane %v4830_v58, 2  ;;  %v230_v30 = vpop.f32.mrf.mxu2 }
  0xf7   :  { %v995_v22 = vrot.slane %v994_v41, 2  ;;  %v1015_v13 = vmax.f32 %v1013_v40, %v1014_v56  ;;  %v872_v36 = vmax.f32 %v870_v6, %v871_v46  ;;  %v921_v4 = vmax.f32 %v4834_v0, %v920_v57 }
  0xf8   :  { %v926_v45 = vmax.f32 %v4818_v23, %v7318_v53  ;;  %v1002_v51 = vrot.slane %v1001_v54, 2  ;;  %v1009_v34 = vrot.slane %v1008_v10, 2  ;;  %v933_v63 = vmax.f32 %v4830_v58, %v932_v1 }
  0xf9   :  { %v996_v44 = vmax.f32 %v994_v41, %v995_v22  ;;  %v1016_v7 = vrot.slane %v1015_v13, 2  ;;  %v879_v53 = vmax.f32 %v877_v2, %v878_v14  ;;  %v2618_v40 = vmax.f32 %v4698_v18, %v4787_v25 }
  0xfa   :  { %v927_v39 = vrot.slane %v926_v45, 1  ;;  %v1003_v5 = vmax.f32 %v1001_v54, %v1002_v51  ;;  %v1010_v23 = vmax.f32 %v1008_v10, %v1009_v34  ;;  %v934_v56 = vrot.slane %v933_v63, 1  ;;  %v76_v10 = vld [vmem:[%s7113_s0 + $0x1d0] sm:$0xff] }
  0xfb   :  { %v997_v38 = vrot.slane %v996_v44, 1  ;;  %v4939_v21 = vmax.f32 %v1015_v13, %v1016_v7  ;;  %v2619_v41 = vmax.f32 %v4706_v27, %v4796_v43  ;;  %v2620_v58 = vmax.f32 %v4751_v8, %v4852_v15  ;;  %292 = vmatmul.f32.gmra.mxu3 %v76_v10 }
  0xfc   :  { %v928_v35 = vmax.f32 %v926_v45, %v927_v39  ;;  %v1004_v6 = vrot.slane %v1003_v5, 1  ;;  %v1011_v46 = vrot.slane %v1010_v23, 1  ;;  %v2621_v54 = vmax.f32 %v4914_v49, %v921_v4 }
  0xfd   :  { %v4947_v0 = vmax.f32 %v996_v44, %v997_v38  ;;  %v935_v18 = vmax.f32 %v933_v63, %v934_v56  ;;  %v7319_v25 = vmax.f32 %v4679_v50, %v4775_v3  ;;  %v7320_v27 = vmax.f32 %v4696_v17, %v4780_v11  ;;  %v143_v50 = vpop.f32.mrf.mxu0 }
  0xfe   :  { %v2622_v14 = vmax.f32 %v872_v36, %v928_v35  ;;  %v4953_v13 = vmax.f32 %v1003_v5, %v1004_v6  ;;  %v4962_v43 = vmax.f32 %v1010_v23, %v1011_v46  ;;  %v228_v3 = vadd.f32 %v4639_v60, %v4903_v42  ;;  %v233_v22 = vpop.f32.mrf.mxu2  ;;  %v77_v23 = vld [vmem:[%s7113_s0 + $0x1d8] sm:$0xff] }
  0xff   :  { %v2895_v8 = vsel %vm2894_vm1, %v7320_v27, %v7319_v25  ;;  %v2623_v51 = vmax.f32 %v879_v53, %v935_v18  ;;  %v141_v34 = vadd.f32 %v4639_v60, %v140_v31  ;;  %v231_v45 = vadd.f32 %v4639_v60, %v230_v30 }
 0x100   :  { %v2897_v15 = vsel %vm2896_vm2, %v2618_v40, %v2895_v8  ;;  %v347_v57 = vmax.f32 %v228_v3, 0.0  ;;  %v144_v38 = vadd.f32 %v4639_v60, %v143_v50  ;;  %v4981_v42 = vadd.f32 %v4639_v60, %v233_v22 }
 0x101   :  { %v2899_v44 = vsel %vm2898_vm3, %v2619_v41, %v2897_v15  ;;  %v318_v36 = vmax.f32 %v141_v34, 0.0  ;;  %v7321_v39 = vrot.slane %v4850_v16, 1  ;;  %v348_v8 = vmax.f32 %v231_v45, 0.0 }
 0x102   :  { %v2901_v17 = vsel %vm2900_vm4, %v2620_v58, %v2899_v44  ;;  %v547_v31 = vrot.slane %v347_v57, 2  ;;  %v548_v4 = vrot.slane %v347_v57, 4  ;;  %v549_v63 = vrot.slane %v347_v57, 6 }
 0x103   :  { %v2903_v49 = vsel %vm2902_vm5, %v2621_v54, %v2901_v17  ;;  %v4986_v7 = vmax.f32 %v4850_v16, %v7321_v39  ;;  %v1832_v30 = vsel %vm823_vm0, %v347_v57, -inf  ;;  %v460_v56 = vrot.slane %v318_v36, 2  ;;  %295 = vmatmul.f32.gmra.mxu3 %v77_v23 }
 0x104   :  { %v2905_v2 = vsel %vm2904_vm6, %v2622_v14, %v2903_v49  ;;  %v1833_v53 = vrot.slane %v1832_v30, 4  ;;  %v461_v40 = vrot.slane %v318_v36, 4  ;;  %v462_v60 = vrot.slane %v318_v36, 6 }
 0x105   :  { %v2907_v1 = vsel %vm2906_vm7, %v2623_v51, %v2905_v2  ;;  %v1839_v6 = vsel %vm823_vm0, %v547_v31, -inf  ;;  %v1846_v16 = vsel %vm823_vm0, %v548_v4, -inf  ;;  %v1853_v46 = vsel %vm823_vm0, %v549_v63, -inf }
 0x106   :  { %3045 = vmatmul.f32.vlgmr.msrb.gmra.mxu1 %v2907_v1  ;;  %v1020_v41 = vsel %vm823_vm0, %v318_v36, -inf  ;;  %v1834_v58 = vmax.f32 %v1832_v30, %v1833_v53  ;;  %v1840_v54 = vrot.slane %v1839_v6, 4  ;;  %v1847_v14 = vrot.slane %v1846_v16, 4 }
 0x107   :  { %v1854_v10 = vrot.slane %v1853_v46, 4  ;;  %v1021_v18 = vrot.slane %v1020_v41, 4  ;;  %v1027_v25 = vsel %vm823_vm0, %v460_v56, -inf  ;;  %v1034_v27 = vsel %vm823_vm0, %v461_v40, -inf }
 0x108   :  { %v1835_v15 = vrot.slane %v1834_v58, 2  ;;  %v1841_v44 = vmax.f32 %v1839_v6, %v1840_v54  ;;  %v1848_v50 = vmax.f32 %v1846_v16, %v1847_v14  ;;  %v1028_v51 = vrot.slane %v1027_v25, 4 }
 0x109   :  { %v1855_v17 = vmax.f32 %v1853_v46, %v1854_v10  ;;  %v1022_v3 = vmax.f32 %v1020_v41, %v1021_v18  ;;  %v1035_v49 = vrot.slane %v1034_v27, 4  ;;  %v4999_v34 = vsel %vm823_vm0, %v462_v60, -inf }
 0x10a   :  { %v1836_v2 = vmax.f32 %v1834_v58, %v1835_v15  ;;  %v1842_v57 = vrot.slane %v1841_v44, 2  ;;  %v1849_v22 = vrot.slane %v1848_v50, 2  ;;  %v5001_v39 = vmax.f32 %v1027_v25, %v1028_v51 }
 0x10b   :  { %v1856_v1 = vrot.slane %v1855_v17, 2  ;;  %v1023_v36 = vrot.slane %v1022_v3, 2  ;;  %v550_v31 = vrot.slane %v348_v8, 2  ;;  %v319_v4 = vmax.f32 %v144_v38, 0.0 }
 0x10c   :  { %v1837_v45 = vrot.slane %v1836_v2, 1  ;;  %v1843_v63 = vmax.f32 %v1841_v44, %v1842_v57  ;;  %v1850_v30 = vmax.f32 %v1848_v50, %v1849_v22  ;;  %v551_v40 = vrot.slane %v348_v8, 4  ;;  %v78_v44 = vld [vmem:[%s7113_s0 + $0x1e0] sm:$0xff] }
 0x10d   :  { %v5003_v23 = vmax.f32 %v1855_v17, %v1856_v1  ;;  %v5005_v53 = vmax.f32 %v1022_v3, %v1023_v36  ;;  %v552_v60 = vrot.slane %v348_v8, 6  ;;  %v5009_v41 = vmax.f32 %v1034_v27, %v1035_v49  ;;  %298 = vmatmul.f32.gmra.mxu3 %v78_v44 }
 0x10e   :  { %v1844_v6 = vrot.slane %v1843_v63, 1  ;;  %v1851_v16 = vrot.slane %v1850_v30, 1  ;;  %v5011_v58 = vmax.f32 %v1836_v2, %v1837_v45  ;;  %v1860_v38 = vsel %vm823_vm0, %v348_v8, -inf }
 0x10f   :  { %7322 = vst [vmem:[#allocation29_spill] sm:$0xff] %v5003_v23  ;;  %v1867_v54 = vsel %vm823_vm0, %v550_v31, -inf  ;;  %v1874_v14 = vsel %vm823_vm0, %v551_v40, -inf  ;;  %v1861_v25 = vrot.slane %v1860_v38, 4  ;;  %v5022_v50 = vsel %vm823_vm0, %v552_v60, -inf  ;;  %v146_v31 = vpop.f32.mrf.mxu0 }
 0x110   :  { %7323 = vst [vmem:[#allocation30_spill] sm:$0xff] %v5011_v58  ;;  %v1868_v15 = vrot.slane %v1867_v54, 4  ;;  %v1875_v27 = vrot.slane %v1874_v14, 4  ;;  %v463_v17 = vrot.slane %v319_v4, 2  ;;  %v464_v8 = vrot.slane %v319_v4, 4 }
 0x111   :  { %7324 = vst [vmem:[#allocation31_spill] sm:$0xff] %v5022_v50  ;;  %v5024_v3 = vmax.f32 %v1843_v63, %v1844_v6  ;;  %v5026_v51 = vmax.f32 %v1850_v30, %v1851_v16  ;;  %v1862_v49 = vmax.f32 %v1860_v38, %v1861_v25  ;;  %v465_v2 = vrot.slane %v319_v4, 6  ;;  %v5041_v25 = vld [vmem:[%s7115_s2] ss:$0 sm:$0xff]  ;;  %v191_v50 = vpop.f32.mrf.mxu1 }
 0x112   :  { %v5028_v57 = vmax.f32 %v1867_v54, %v1868_v15  ;;  %v1048_v22 = vsel %vm823_vm0, %v319_v4, -inf  ;;  %v1055_v1 = vsel %vm823_vm0, %v463_v17, -inf  ;;  %v1062_v36 = vsel %vm823_vm0, %v464_v8, -inf }
 0x113   :  { %7325 = vst [vmem:[#allocation32_spill] sm:$0xff] %v5024_v3  ;;  %v1863_v45 = vrot.slane %v1862_v49, 2  ;;  %v1049_v60 = vrot.slane %v1048_v22, 4  ;;  %v1056_v44 = vrot.slane %v1055_v1, 4  ;;  %v5034_v63 = vmax.f32 %v1874_v14, %v1875_v27 }
 0x114   :  { %7326 = vst [vmem:[#allocation33_spill] sm:$0xff] %v5026_v51  ;;  %v1063_v30 = vrot.slane %v1062_v36, 4  ;;  %v1069_v6 = vsel %vm823_vm0, %v465_v2, -inf  ;;  %v349_v16 = vmax.f32 %v4981_v42, 0.0  ;;  %v147_v15 = vadd.f32 %v5041_v25, %v146_v31 }
 0x115   :  { %7327 = vst [vmem:[#allocation34_spill] sm:$0xff] %v5028_v57  ;;  %v1050_v38 = vmax.f32 %v1048_v22, %v1049_v60  ;;  %v1057_v54 = vmax.f32 %v1055_v1, %v1056_v44  ;;  %v1070_v4 = vrot.slane %v1069_v6, 4  ;;  %v5044_v27 = vmax.f32 %v1862_v49, %v1863_v45 }
 0x116   :  { %7328 = vst [vmem:[#allocation35_spill] sm:$0xff] %v5034_v63  ;;  %v1064_v17 = vmax.f32 %v1062_v36, %v1063_v30  ;;  %v553_v8 = vrot.slane %v349_v16, 2  ;;  %v554_v40 = vrot.slane %v349_v16, 4  ;;  %v555_v14 = vrot.slane %v349_v16, 6 }
 0x117   :  { %7329 = vst [vmem:[#allocation36_spill] sm:$0xff] %v5044_v27  ;;  %v1051_v10 = vrot.slane %v1050_v38, 2  ;;  %v1058_v2 = vrot.slane %v1057_v54, 2  ;;  %v1071_v11 = vmax.f32 %v1069_v6, %v1070_v4  ;;  %v1888_v22 = vsel %vm823_vm0, %v349_v16, -inf }
 0x118   :  { %v1065_v42 = vrot.slane %v1064_v17, 2  ;;  %v1895_v1 = vsel %vm823_vm0, %v553_v8, -inf  ;;  %v1902_v60 = vsel %vm823_vm0, %v554_v40, -inf  ;;  %v1889_v31 = vrot.slane %v1888_v22, 4 }
 0x119   :  { %v1052_v44 = vmax.f32 %v1050_v38, %v1051_v10  ;;  %v1059_v5 = vmax.f32 %v1057_v54, %v1058_v2  ;;  %v1072_v56 = vrot.slane %v1071_v11, 2  ;;  %v1896_v30 = vrot.slane %v1895_v1, 4  ;;  %v149_v10 = vpop.f32.mrf.mxu0 }
 0x11a   :  { %v1066_v36 = vmax.f32 %v1064_v17, %v1065_v42  ;;  %v1903_v46 = vrot.slane %v1902_v60, 4  ;;  %v1909_v49 = vsel %vm823_vm0, %v555_v14, -inf  ;;  %v1890_v6 = vmax.f32 %v1888_v22, %v1889_v31 }
 0x11b   :  { %v1053_v45 = vrot.slane %v1052_v44, 1  ;;  %v1060_v18 = vrot.slane %v1059_v5, 1  ;;  %v5050_v35 = vmax.f32 %v1071_v11, %v1072_v56  ;;  %v1897_v4 = vmax.f32 %v1895_v1, %v1896_v30 }
 0x11c   :  { %v1904_v8 = vmax.f32 %v1902_v60, %v1903_v46  ;;  %v1910_v51 = vrot.slane %v1909_v49, 4  ;;  %v1067_v38 = vrot.slane %v1066_v36, 1  ;;  %v1891_v54 = vrot.slane %v1890_v6, 2  ;;  %v236_v46 = vpop.f32.mrf.mxu2 }
 0x11d   :  { %v5054_v40 = vmax.f32 %v1052_v44, %v1053_v45  ;;  %v5056_v17 = vmax.f32 %v1059_v5, %v1060_v18  ;;  %v1898_v2 = vrot.slane %v1897_v4, 2  ;;  %v320_v22 = vmax.f32 %v147_v15, 0.0 }
 0x11e   :  { %v1905_v14 = vrot.slane %v1904_v8, 2  ;;  %v1911_v42 = vmax.f32 %v1909_v49, %v1910_v51  ;;  %v1892_v56 = vmax.f32 %v1890_v6, %v1891_v54  ;;  %v192_v1 = vadd.f32 %v5041_v25, %v191_v50 }
 0x11f   :  { %v1899_v60 = vmax.f32 %v1897_v4, %v1898_v2  ;;  %v237_v44 = vadd.f32 %v5041_v25, %v236_v46  ;;  %v466_v16 = vrot.slane %v320_v22, 2  ;;  %v467_v5 = vrot.slane %v320_v22, 4 }
 0x120   :  { %v1906_v31 = vmax.f32 %v1904_v8, %v1905_v14  ;;  %v1912_v30 = vrot.slane %v1911_v42, 2  ;;  %v1893_v45 = vrot.slane %v1892_v56, 1  ;;  %v468_v18 = vrot.slane %v320_v22, 6 }
 0x121   :  { %v1900_v63 = vrot.slane %v1899_v60, 1  ;;  %v1076_v6 = vsel %vm823_vm0, %v320_v22, -inf  ;;  %v1083_v4 = vsel %vm823_vm0, %v466_v16, -inf  ;;  %v1090_v8 = vsel %vm823_vm0, %v467_v5, -inf }
 0x122   :  { %v1907_v51 = vrot.slane %v1906_v31, 1  ;;  %v5061_v49 = vmax.f32 %v1911_v42, %v1912_v30  ;;  %v5064_v15 = vmax.f32 %v1892_v56, %v1893_v45  ;;  %v1077_v50 = vrot.slane %v1076_v6, 4 }
 0x123   :  { %v5068_v54 = vmax.f32 %v1066_v36, %v1067_v38  ;;  %v5070_v2 = vmax.f32 %v1899_v60, %v1900_v63  ;;  %v1084_v14 = vrot.slane %v1083_v4, 4  ;;  %v150_v46 = vadd.f32 %v5041_v25, %v149_v10 }
 0x124   :  { %7330 = vst [vmem:[#allocation37_spill] sm:$0xff] %v5061_v49  ;;  %v5073_v11 = vmax.f32 %v1906_v31, %v1907_v51  ;;  %v1078_v42 = vmax.f32 %v1076_v6, %v1077_v50  ;;  %v1091_v30 = vrot.slane %v1090_v8, 4  ;;  %v5076_v22 = vsel %vm823_vm0, %v468_v18, -inf }
 0x125   :  { %7331 = vst [vmem:[#allocation38_spill] sm:$0xff] %v5064_v15  ;;  %v335_v63 = vmax.f32 %v192_v1, 0.0  ;;  %v5083_v60 = vmax.f32 %v1083_v4, %v1084_v14  ;;  %v350_v31 = vmax.f32 %v237_v44, 0.0  ;;  %v321_v16 = vmax.f32 %v150_v46, 0.0 }
 0x126   :  { %7332 = vst [vmem:[#allocation39_spill] sm:$0xff] %v5070_v2  ;;  %v1079_v38 = vrot.slane %v1078_v42, 2  ;;  %v5086_v45 = vmax.f32 %v1090_v8, %v1091_v30 }
 0x127   :  { %7333 = vst [vmem:[#allocation40_spill] sm:$0xff] %v5073_v11  ;;  %v511_v5 = vrot.slane %v335_v63, 2  ;;  %v512_v18 = vrot.slane %v335_v63, 4  ;;  %v513_v51 = vrot.slane %v335_v63, 6  ;;  %v1496_v6 = vsel %vm823_vm0, %v335_v63, -inf }
 0x128   :  { %v556_v50 = vrot.slane %v350_v31, 2  ;;  %v557_v56 = vrot.slane %v350_v31, 4  ;;  %v1497_v15 = vrot.slane %v1496_v6, 4  ;;  %v5092_v14 = vmax.f32 %v1078_v42, %v1079_v38 }
 0x129   :  { %v1503_v36 = vsel %vm823_vm0, %v511_v5, -inf  ;;  %v1510_v1 = vsel %vm823_vm0, %v512_v18, -inf  ;;  %v1517_v4 = vsel %vm823_vm0, %v513_v51, -inf  ;;  %v558_v2 = vrot.slane %v350_v31, 6 }
 0x12a   :  { %v1504_v44 = vrot.slane %v1503_v36, 4  ;;  %v1511_v8 = vrot.slane %v1510_v1, 4  ;;  %v1518_v30 = vrot.slane %v1517_v4, 4  ;;  %v1498_v10 = vmax.f32 %v1496_v6, %v1497_v15 }
 0x12b   :  { %v1916_v3 = vsel %vm823_vm0, %v350_v31, -inf  ;;  %v1923_v63 = vsel %vm823_vm0, %v556_v50, -inf  ;;  %v1930_v18 = vsel %vm823_vm0, %v557_v56, -inf  ;;  %v5098_v42 = vsel %vm823_vm0, %v558_v2, -inf }
 0x12c   :  { %v1505_v58 = vmax.f32 %v1503_v36, %v1504_v44  ;;  %v1512_v46 = vmax.f32 %v1510_v1, %v1511_v8  ;;  %v1519_v11 = vmax.f32 %v1517_v4, %v1518_v30  ;;  %v1917_v49 = vrot.slane %v1916_v3, 4  ;;  %7334 = vst [vmem:[#allocation41_spill] sm:$0xff] %v5098_v42 }
 0x12d   :  { %v1499_v5 = vrot.slane %v1498_v10, 2  ;;  %v1924_v57 = vrot.slane %v1923_v63, 4  ;;  %v1931_v36 = vrot.slane %v1930_v18, 4  ;;  %v469_v30 = vrot.slane %v321_v16, 2 }
 0x12e   :  { %v1506_v38 = vrot.slane %v1505_v58, 2  ;;  %v1513_v51 = vrot.slane %v1512_v46, 2  ;;  %v1520_v27 = vrot.slane %v1519_v11, 2  ;;  %v1918_v15 = vmax.f32 %v1916_v3, %v1917_v49 }
 0x12f   :  { %v1500_v31 = vmax.f32 %v1498_v10, %v1499_v5  ;;  %v5101_v23 = vmax.f32 %v1923_v63, %v1924_v57  ;;  %v5108_v49 = vmax.f32 %v1930_v18, %v1931_v36  ;;  %v470_v10 = vrot.slane %v321_v16, 4 }
 0x130   :  { %v1507_v50 = vmax.f32 %v1505_v58, %v1506_v38  ;;  %v1514_v1 = vmax.f32 %v1512_v46, %v1513_v51  ;;  %v5103_v4 = vmax.f32 %v1519_v11, %v1520_v27  ;;  %v1919_v44 = vrot.slane %v1918_v15, 2  ;;  %v194_v38 = vpop.f32.mrf.mxu1 }
 0x131   :  { %7335 = vst [vmem:[#allocation42_spill] sm:$0xff] %v5101_v23  ;;  %v1501_v8 = vrot.slane %v1500_v31, 1  ;;  %v471_v58 = vrot.slane %v321_v16, 6  ;;  %v1104_v27 = vsel %vm823_vm0, %v321_v16, -inf  ;;  %v1111_v51 = vsel %vm823_vm0, %v469_v30, -inf }
 0x132   :  { %v1508_v24 = vrot.slane %v1507_v50, 1  ;;  %v1515_v59 = vrot.slane %v1514_v1, 1  ;;  %7336 = vst [vmem:[#allocation43_spill] sm:$0xff] %v5108_v49  ;;  %v5116_v46 = vmax.f32 %v1918_v15, %v1919_v44  ;;  %v1105_v5 = vrot.slane %v1104_v27, 4 }
 0x133   :  { %v5112_v11 = vmax.f32 %v1500_v31, %v1501_v8  ;;  %v1118_v2 = vsel %vm823_vm0, %v470_v10, -inf  ;;  %v1125_v18 = vsel %vm823_vm0, %v471_v58, -inf  ;;  %v195_v36 = vadd.f32 %v5041_v25, %v194_v38 }
 0x134   :  { %v5114_v63 = vmax.f32 %v1507_v50, %v1508_v24  ;;  %7339 = vst [vmem:[#allocation46_spill] sm:$0xff] %v5116_v46  ;;  %v1106_v3 = vmax.f32 %v1104_v27, %v1105_v5  ;;  %v1112_v57 = vrot.slane %v1111_v51, 4  ;;  %v1119_v56 = vrot.slane %v1118_v2, 4 }
 0x135   :  { %7337 = vst [vmem:[#allocation44_spill] sm:$0xff] %v5112_v11  ;;  %v1126_v16 = vrot.slane %v1125_v18, 4  ;;  %v5122_v31 = vmax.f32 %v1514_v1, %v1515_v59  ;;  %v336_v24 = vmax.f32 %v195_v36, 0.0  ;;  %v7341_v15 = vrot.slane %v4889_v48, 2 }
 0x136   :  { %7338 = vst [vmem:[#allocation45_spill] sm:$0xff] %v5114_v63  ;;  %v981_v44 = vrot.slane %v4896_v52, 2  ;;  %v1107_v8 = vrot.slane %v1106_v3, 2  ;;  %v1113_v30 = vmax.f32 %v1111_v51, %v1112_v57  ;;  %v1120_v10 = vmax.f32 %v1118_v2, %v1119_v56 }
 0x137   :  { %7340 = vst [vmem:[#allocation47_spill] sm:$0xff] %v5122_v31  ;;  %v975_v50 = vmax.f32 %v4889_v48, %v7341_v15  ;;  %v1127_v6 = vmax.f32 %v1125_v18, %v1126_v16  ;;  %v514_v58 = vrot.slane %v336_v24, 2  ;;  %v515_v42 = vrot.slane %v336_v24, 4  ;;  %v239_v18 = vpop.f32.mrf.mxu2 }
 0x138   :  { %v516_v38 = vrot.slane %v336_v24, 6  ;;  %v1524_v27 = vsel %vm823_vm0, %v336_v24, -inf  ;;  %v1108_v5 = vmax.f32 %v1106_v3, %v1107_v8  ;;  %v1114_v49 = vrot.slane %v1113_v30, 2 }
 0x139   :  { %v1121_v59 = vrot.slane %v1120_v10, 2  ;;  %v1128_v1 = vrot.slane %v1127_v6, 2  ;;  %v1525_v36 = vrot.slane %v1524_v27, 4  ;;  %v1531_v23 = vsel %vm823_vm0, %v514_v58, -inf }
 0x13a   :  { %v1538_v48 = vsel %vm823_vm0, %v515_v42, -inf  ;;  %v5132_v15 = vsel %vm823_vm0, %v516_v38, -inf  ;;  %v1109_v57 = vrot.slane %v1108_v5, 1  ;;  %v1115_v56 = vmax.f32 %v1113_v30, %v1114_v49 }
 0x13b   :  { %7342 = vst [vmem:[#allocation48_spill] sm:$0xff] %v5132_v15  ;;  %v1122_v2 = vmax.f32 %v1120_v10, %v1121_v59  ;;  %v5134_v51 = vmax.f32 %v1127_v6, %v1128_v1  ;;  %v1526_v16 = vmax.f32 %v1524_v27, %v1525_v36  ;;  %v1532_v3 = vrot.slane %v1531_v23, 4 }
 0x13c   :  { %v1539_v24 = vrot.slane %v1538_v48, 4  ;;  %v5137_v8 = vmax.f32 %v1108_v5, %v1109_v57  ;;  %v1116_v47 = vrot.slane %v1115_v56, 1  ;;  %v7343_v58 = vrot.slane %v4899_v33, 1 }
 0x13d   :  { %v1123_v37 = vrot.slane %v1122_v2, 1  ;;  %v1527_v38 = vrot.slane %v1526_v16, 2  ;;  %v5142_v61 = vmax.f32 %v1531_v23, %v1532_v3  ;;  %v976_v6 = vrot.slane %v975_v50, 1 }
 0x13e   :  { %v970_v42 = vmax.f32 %v4899_v33, %v7343_v58  ;;  %v5145_v30 = vmax.f32 %v1115_v56, %v1116_v47  ;;  %v5148_v27 = vmax.f32 %v1538_v48, %v1539_v24  ;;  %v982_v5 = vmax.f32 %v4896_v52, %v981_v44 }
 0x13f   :  { %v5151_v59 = vmax.f32 %v1122_v2, %v1123_v37  ;;  %v5155_v33 = vmax.f32 %v1526_v16, %v1527_v38  ;;  %v7344_v23 = vrot.slane %v4884_v26, 4  ;;  %v7345_v56 = vrot.slane %v4939_v21, 1 }
 0x140   :  { %v983_v57 = vrot.slane %v982_v5, 1  ;;  %v7346_v52 = vrot.slane %v5005_v53, 1  ;;  %v977_v44 = vmax.f32 %v975_v50, %v976_v6  ;;  %v7347_v16 = vrot.slane %v5001_v39, 2 }
 0x141   :  { %v987_v36 = vmax.f32 %v4884_v26, %v7344_v23  ;;  %v1019_v48 = vmax.f32 %v4939_v21, %v7345_v56  ;;  %v1037_v24 = vrot.slane %v5009_v41, 2  ;;  %v152_v26 = vpop.f32.mrf.mxu0  ;;  %v7348_v38 = vrot.slane %v4999_v34, 4 }
 0x142   :  { %v1026_v37 = vmax.f32 %v5005_v53, %v7346_v52  ;;  %v1031_v3 = vmax.f32 %v5001_v39, %v7347_v16  ;;  %v984_v58 = vmax.f32 %v982_v5, %v983_v57  ;;  %v2626_v21 = vmax.f32 %v4864_v9, %v4962_v43 }
 0x143   :  { %v988_v2 = vrot.slane %v987_v36, 2  ;;  %v1043_v23 = vmax.f32 %v4999_v34, %v7348_v38  ;;  %v2627_v56 = vmax.f32 %v4986_v7, %v1019_v48  ;;  %v1038_v6 = vmax.f32 %v5009_v41, %v1037_v24 }
 0x144   :  { %v1032_v50 = vrot.slane %v1031_v3, 1  ;;  %v2628_v52 = vmax.f32 %v970_v42, %v1026_v37  ;;  %v7349_v16 = vmax.f32 %v4855_v55, %v4947_v0  ;;  %v7350_v5 = vmax.f32 %v4862_v62, %v4953_v13  ;;  %v79_v42 = vld [vmem:[%s7113_s0 + $0x1e8] sm:$0xff] }
 0x145   :  { %v989_v53 = vmax.f32 %v987_v36, %v988_v2  ;;  %v1044_v39 = vrot.slane %v1043_v23, 2  ;;  %v240_v57 = vadd.f32 %v5041_v25, %v239_v18  ;;  %v153_v9 = vadd.f32 %v5041_v25, %v152_v26  ;;  %301 = vmatmul.f32.gmra.mxu3 %v79_v42 }
 0x146   :  { %v2908_v34 = vsel %vm2894_vm1, %v7350_v5, %v7349_v16  ;;  %v1033_v7 = vmax.f32 %v1031_v3, %v1032_v50  ;;  %v1039_v36 = vrot.slane %v1038_v6, 1 }
 0x147   :  { %v990_v43 = vrot.slane %v989_v53, 1  ;;  %v2909_v41 = vsel %vm2896_vm2, %v2626_v21, %v2908_v34  ;;  %v1045_v48 = vmax.f32 %v1043_v23, %v1044_v39  ;;  %v351_v0 = vmax.f32 %v240_v57, 0.0 }
 0x148   :  { %v2910_v55 = vsel %vm2898_vm3, %v2627_v56, %v2909_v41  ;;  %v322_v62 = vmax.f32 %v153_v9, 0.0  ;;  %v1040_v37 = vmax.f32 %v1038_v6, %v1039_v36  ;;  %v2629_v18 = vmax.f32 %v977_v44, %v1033_v7  ;;  %v197_v7 = vpop.f32.mrf.mxu1 }
 0x149   :  { %v991_v13 = vmax.f32 %v989_v53, %v990_v43  ;;  %v2911_v2 = vsel %vm2900_vm4, %v2628_v52, %v2910_v55  ;;  %v1046_v24 = vrot.slane %v1045_v48, 1  ;;  %v559_v3 = vrot.slane %v351_v0, 2  ;;  %v254_v55 = vpop.f32.mrf.mxu3 }
 0x14a   :  { %v560_v26 = vrot.slane %v351_v0, 4  ;;  %v561_v38 = vrot.slane %v351_v0, 6  ;;  %v2630_v21 = vmax.f32 %v984_v58, %v1040_v37  ;;  %v2912_v50 = vsel %vm2902_vm5, %v2629_v18, %v2911_v2  ;;  %v80_v37 = vld [vmem:[%s7113_s0 + $0x1f0] sm:$0xff] }
 0x14b   :  { %v1944_v16 = vsel %vm823_vm0, %v351_v0, -inf  ;;  %v472_v23 = vrot.slane %v322_v62, 2  ;;  %v1047_v39 = vmax.f32 %v1045_v48, %v1046_v24  ;;  %v1951_v5 = vsel %vm823_vm0, %v559_v3, -inf  ;;  %v155_v0 = vpop.f32.mrf.mxu0 }
 0x14c   :  { %v1945_v56 = vrot.slane %v1944_v16, 4  ;;  %v1958_v53 = vsel %vm823_vm0, %v560_v26, -inf  ;;  %v2913_v44 = vsel %vm2904_vm6, %v2630_v21, %v2912_v50  ;;  %v1952_v6 = vrot.slane %v1951_v5, 4 }
 0x14d   :  { %v1959_v52 = vrot.slane %v1958_v53, 4  ;;  %v1965_v34 = vsel %vm823_vm0, %v561_v38, -inf  ;;  %v2631_v57 = vmax.f32 %v991_v13, %v1047_v39  ;;  %v473_v43 = vrot.slane %v322_v62, 4  ;;  %304 = vmatmul.f32.gmra.mxu3 %v80_v37 }
 0x14e   :  { %v1946_v9 = vmax.f32 %v1944_v16, %v1945_v56  ;;  %v1966_v58 = vrot.slane %v1965_v34, 4  ;;  %v1953_v36 = vmax.f32 %v1951_v5, %v1952_v6  ;;  %v474_v42 = vrot.slane %v322_v62, 6 }
 0x14f   :  { %v1960_v41 = vmax.f32 %v1958_v53, %v1959_v52  ;;  %v1132_v48 = vsel %vm823_vm0, %v322_v62, -inf  ;;  %v2914_v18 = vsel %vm2906_vm7, %v2631_v57, %v2913_v44  ;;  %v1139_v38 = vsel %vm823_vm0, %v472_v23, -inf }
 0x150   :  { %v1947_v2 = vrot.slane %v1946_v9, 2  ;;  %v1967_v24 = vmax.f32 %v1965_v34, %v1966_v58  ;;  %v1133_v13 = vrot.slane %v1132_v48, 4  ;;  %3048 = vmatmul.f32.gmra.mxu1 %v2914_v18  ;;  %v1954_v3 = vrot.slane %v1953_v36, 2 }
 0x151   :  { %v1961_v26 = vrot.slane %v1960_v41, 2  ;;  %v1146_v21 = vsel %vm823_vm0, %v473_v43, -inf  ;;  %v1140_v39 = vrot.slane %v1139_v38, 4  ;;  %v5207_v44 = vsel %vm823_vm0, %v474_v42, -inf }
 0x152   :  { %v1948_v62 = vmax.f32 %v1946_v9, %v1947_v2  ;;  %v1968_v50 = vrot.slane %v1967_v24, 2  ;;  %v1134_v16 = vmax.f32 %v1132_v48, %v1133_v13  ;;  %v1955_v56 = vmax.f32 %v1953_v36, %v1954_v3  ;;  %v242_v13 = vpop.f32.mrf.mxu2 }
 0x153   :  { %v1962_v5 = vmax.f32 %v1960_v41, %v1961_v26  ;;  %v1147_v53 = vrot.slane %v1146_v21, 4  ;;  %v5211_v57 = vmax.f32 %v1139_v38, %v1140_v39  ;;  %v198_v2 = vadd.f32 %v5041_v25, %v197_v7  ;;  %v158_v3 = vpop.f32.mrf.mxu0  ;;  %v257_v7 = vpop.f32.mrf.mxu3 }
 0x154   :  { %v1949_v6 = vrot.slane %v1948_v62, 1  ;;  %v5209_v52 = vmax.f32 %v1967_v24, %v1968_v50  ;;  %v1135_v34 = vrot.slane %v1134_v16, 2  ;;  %v1956_v58 = vrot.slane %v1955_v56, 1  ;;  %v200_v50 = vpop.f32.mrf.mxu1 }
 0x155   :  { %v1963_v43 = vrot.slane %v1962_v5, 1  ;;  %v5220_v41 = vmax.f32 %v1146_v21, %v1147_v53  ;;  %v255_v24 = vadd.f32 %v5041_v25, %v254_v55  ;;  %v156_v21 = vadd.f32 %v5041_v25, %v155_v0 }
 0x156   :  { %7351 = vst [vmem:[#allocation49_spill] sm:$0xff] %v5209_v52  ;;  %v5216_v48 = vmax.f32 %v1948_v62, %v1949_v6  ;;  %v5218_v36 = vmax.f32 %v1134_v16, %v1135_v34  ;;  %v5227_v26 = vmax.f32 %v1955_v56, %v1956_v58  ;;  %v243_v62 = vadd.f32 %v5041_v25, %v242_v13 }
 0x157   :  { %v5229_v38 = vmax.f32 %v1962_v5, %v1963_v43  ;;  %v337_v39 = vmax.f32 %v198_v2, 0.0  ;;  %v356_v53 = vmax.f32 %v255_v24, 0.0  ;;  %v201_v6 = vadd.f32 %v5041_v25, %v200_v50 }
 0x158   :  { %7352 = vst [vmem:[#allocation50_spill] sm:$0xff] %v5216_v48  ;;  %v5235_v34 = vmax.f32 %v243_v62, 0.0  ;;  %v5237_v55 = vmax.f32 %v156_v21, 0.0  ;;  %v5240_v56 = vadd.f32 %v5041_v25, %v257_v7  ;;  %v5243_v5 = vadd.f32 %v5041_v25, %v158_v3 }
 0x159   :  { %7353 = vst [vmem:[#allocation51_spill] sm:$0xff] %v5227_v26  ;;  %v517_v58 = vrot.slane %v337_v39, 2  ;;  %v518_v0 = vrot.slane %v337_v39, 4  ;;  %v519_v43 = vrot.slane %v337_v39, 6  ;;  %v1552_v13 = vsel %vm823_vm0, %v337_v39, -inf }
 0x15a   :  { %7354 = vst [vmem:[#allocation52_spill] sm:$0xff] %v5229_v38  ;;  %v1553_v2 = vrot.slane %v1552_v13, 4  ;;  %v574_v24 = vrot.slane %v356_v53, 2  ;;  %v575_v37 = vrot.slane %v356_v53, 4  ;;  %v576_v50 = vrot.slane %v356_v53, 6 }
 0x15b   :  { %v1559_v62 = vsel %vm823_vm0, %v517_v58, -inf  ;;  %v1566_v21 = vsel %vm823_vm0, %v518_v0, -inf  ;;  %v1573_v49 = vsel %vm823_vm0, %v519_v43, -inf  ;;  %v2084_v7 = vsel %vm823_vm0, %v356_v53, -inf }
 0x15c   :  { %v1554_v47 = vmax.f32 %v1552_v13, %v1553_v2  ;;  %v1560_v3 = vrot.slane %v1559_v62, 4  ;;  %v1567_v9 = vrot.slane %v1566_v21, 4  ;;  %v1574_v23 = vrot.slane %v1573_v49, 4 }
 0x15d   :  { %v2085_v1 = vrot.slane %v2084_v7, 4  ;;  %v2091_v42 = vsel %vm823_vm0, %v574_v24, -inf  ;;  %v2098_v39 = vsel %vm823_vm0, %v575_v37, -inf  ;;  %v5253_v18 = vsel %vm823_vm0, %v576_v50, -inf }
 0x15e   :  { %7355 = vst [vmem:[#allocation53_spill] sm:$0xff] %v5253_v18  ;;  %v1555_v16 = vrot.slane %v1554_v47, 2  ;;  %v1561_v58 = vmax.f32 %v1559_v62, %v1560_v3  ;;  %v1568_v10 = vmax.f32 %v1566_v21, %v1567_v9  ;;  %v1575_v0 = vmax.f32 %v1573_v49, %v1574_v23 }
 0x15f   :  { %v2086_v38 = vmax.f32 %v2084_v7, %v2085_v1  ;;  %v2092_v43 = vrot.slane %v2091_v42, 4  ;;  %v2099_v52 = vrot.slane %v2098_v39, 4  ;;  %v5255_v53 = vmax.f32 %v201_v6, 0.0 }
 0x160   :  { %v1556_v13 = vmax.f32 %v1554_v47, %v1555_v16  ;;  %v1562_v2 = vrot.slane %v1561_v58, 2  ;;  %v1569_v46 = vrot.slane %v1568_v10, 2  ;;  %v1576_v20 = vrot.slane %v1575_v0, 2 }
 0x161   :  { %v2087_v19 = vrot.slane %v2086_v38, 2  ;;  %v5257_v24 = vmax.f32 %v2091_v42, %v2092_v43  ;;  %v562_v50 = vrot.slane %v5235_v34, 2  ;;  %v5265_v23 = vmax.f32 %v2098_v39, %v2099_v52  ;;  %v81_v42 = vld [vmem:[%s7113_s0 + $0x1f8] sm:$0xff] }
 0x162   :  { %v1557_v29 = vrot.slane %v1556_v13, 1  ;;  %v1563_v62 = vmax.f32 %v1561_v58, %v1562_v2  ;;  %v1570_v9 = vmax.f32 %v1568_v10, %v1569_v46  ;;  %v5261_v49 = vmax.f32 %v1575_v0, %v1576_v20  ;;  %307 = vmatmul.f32.gmra.mxu3 %v81_v42 }
 0x163   :  { %7356 = vst [vmem:[#allocation54_spill] sm:$0xff] %v5257_v24  ;;  %v5263_v1 = vmax.f32 %v2086_v38, %v2087_v19  ;;  %v563_v47 = vrot.slane %v5235_v34, 4  ;;  %v564_v16 = vrot.slane %v5235_v34, 6  ;;  %v1972_v20 = vsel %vm823_vm0, %v5235_v34, -inf }
 0x164   :  { %7357 = vst [vmem:[#allocation55_spill] sm:$0xff] %v5261_v49  ;;  %v5272_v6 = vmax.f32 %v1556_v13, %v1557_v29  ;;  %v1564_v21 = vrot.slane %v1563_v62, 1  ;;  %v1571_v7 = vrot.slane %v1570_v9, 1  ;;  %v1979_v10 = vsel %vm823_vm0, %v562_v50, -inf }
 0x165   :  { %7358 = vst [vmem:[#allocation56_spill] sm:$0xff] %v5263_v1  ;;  %v1986_v52 = vsel %vm823_vm0, %v563_v47, -inf  ;;  %v1973_v39 = vrot.slane %v1972_v20, 4  ;;  %v1980_v58 = vrot.slane %v1979_v10, 4  ;;  %v5286_v43 = vsel %vm823_vm0, %v564_v16, -inf }
 0x166   :  { %7359 = vst [vmem:[#allocation57_spill] sm:$0xff] %v5265_v23  ;;  %v5280_v38 = vmax.f32 %v1563_v62, %v1564_v21  ;;  %v5282_v3 = vmax.f32 %v1570_v9, %v1571_v7  ;;  %v1987_v0 = vrot.slane %v1986_v52, 4  ;;  %v475_v13 = vrot.slane %v5237_v55, 2 }
 0x167   :  { %7360 = vst [vmem:[#allocation58_spill] sm:$0xff] %v5272_v6  ;;  %v1974_v50 = vmax.f32 %v1972_v20, %v1973_v39  ;;  %v476_v62 = vrot.slane %v5237_v55, 4  ;;  %v5294_v9 = vmax.f32 %v1979_v10, %v1980_v58  ;;  %v477_v42 = vrot.slane %v5237_v55, 6 }
 0x168   :  { %7361 = vst [vmem:[#allocation59_spill] sm:$0xff] %v5280_v38  ;;  %v1160_v16 = vsel %vm823_vm0, %v5237_v55, -inf  ;;  %v1167_v37 = vsel %vm823_vm0, %v475_v13, -inf  ;;  %v5302_v29 = vmax.f32 %v1986_v52, %v1987_v0  ;;  %v520_v34 = vrot.slane %v5255_v53, 2 }
 0x169   :  { %7362 = vst [vmem:[#allocation60_spill] sm:$0xff] %v5282_v3  ;;  %v1975_v21 = vrot.slane %v1974_v50, 2  ;;  %v1161_v7 = vrot.slane %v1160_v16, 4  ;;  %v1174_v46 = vsel %vm823_vm0, %v476_v62, -inf  ;;  %v1168_v20 = vrot.slane %v1167_v37, 4 }
 0x16a   :  { %7363 = vst [vmem:[#allocation61_spill] sm:$0xff] %v5286_v43  ;;  %v1175_v39 = vrot.slane %v1174_v46, 4  ;;  %v1181_v10 = vsel %vm823_vm0, %v477_v42, -inf  ;;  %v521_v13 = vrot.slane %v5255_v53, 4  ;;  %v522_v52 = vrot.slane %v5255_v53, 6 }
 0x16b   :  { %7364 = vst [vmem:[#allocation62_spill] sm:$0xff] %v5294_v9  ;;  %v1162_v47 = vmax.f32 %v1160_v16, %v1161_v7  ;;  %v1182_v2 = vrot.slane %v1181_v10, 4  ;;  %v5307_v19 = vmax.f32 %v1974_v50, %v1975_v21  ;;  %v1169_v55 = vmax.f32 %v1167_v37, %v1168_v20 }
 0x16c   :  { %7365 = vst [vmem:[#allocation63_spill] sm:$0xff] %v5302_v29  ;;  %v1176_v18 = vmax.f32 %v1174_v46, %v1175_v39  ;;  %v1580_v0 = vsel %vm823_vm0, %v5255_v53, -inf  ;;  %v1587_v16 = vsel %vm823_vm0, %v520_v34, -inf  ;;  %v1594_v37 = vsel %vm823_vm0, %v521_v13, -inf }
 0x16d   :  { %7366 = vst [vmem:[#allocation64_spill] sm:$0xff] %v5307_v19  ;;  %v1163_v23 = vrot.slane %v1162_v47, 2  ;;  %v1183_v62 = vmax.f32 %v1181_v10, %v1182_v2  ;;  %v1170_v42 = vrot.slane %v1169_v55, 2  ;;  %v1581_v58 = vrot.slane %v1580_v0, 4 }
 0x16e   :  { %v1177_v24 = vrot.slane %v1176_v18, 2  ;;  %v1588_v50 = vrot.slane %v1587_v16, 4  ;;  %v1595_v39 = vrot.slane %v1594_v37, 4  ;;  %v5320_v53 = vsel %vm823_vm0, %v522_v52, -inf  ;;  %v245_v52 = vpop.f32.mrf.mxu2 }
 0x16f   :  { %v1164_v7 = vmax.f32 %v1162_v47, %v1163_v23  ;;  %v1184_v1 = vrot.slane %v1183_v62, 2  ;;  %v1171_v46 = vmax.f32 %v1169_v55, %v1170_v42  ;;  %v1582_v20 = vmax.f32 %v1580_v0, %v1581_v58  ;;  %7368 = vst [vmem:[#allocation66_spill] sm:$0xff] %v5320_v53  ;;  %v203_v0 = vpop.f32.mrf.mxu1 }
 0x170   :  { %v1178_v21 = vmax.f32 %v1176_v18, %v1177_v24  ;;  %v5317_v43 = vmax.f32 %v1587_v16, %v1588_v50  ;;  %v5327_v24 = vmax.f32 %v1594_v37, %v1595_v39  ;;  %v246_v16 = vadd.f32 %v5041_v25, %v245_v52  ;;  %v260_v37 = vpop.f32.mrf.mxu3 }
 0x171   :  { %v1165_v2 = vrot.slane %v1164_v7, 1  ;;  %v5315_v10 = vmax.f32 %v1183_v62, %v1184_v1  ;;  %v1172_v34 = vrot.slane %v1171_v46, 1  ;;  %v1583_v47 = vrot.slane %v1582_v20, 2 }
 0x172   :  { %7367 = vst [vmem:[#allocation65_spill] sm:$0xff] %v5317_v43  ;;  %v1179_v23 = vrot.slane %v1178_v21, 1  ;;  %v357_v62 = vmax.f32 %v5240_v56, 0.0  ;;  %v5342_v50 = vadd.f32 %v5041_v25, %v203_v0 }
 0x173   :  { %v5323_v9 = vmax.f32 %v1164_v7, %v1165_v2  ;;  %7369 = vst [vmem:[#allocation67_spill] sm:$0xff] %v5327_v24  ;;  %v5329_v1 = vmax.f32 %v1171_v46, %v1172_v34  ;;  %v5331_v58 = vmax.f32 %v1582_v20, %v1583_v47  ;;  %v5339_v7 = vmax.f32 %v5243_v5, 0.0 }
 0x174   :  { %v5335_v42 = vmax.f32 %v1178_v21, %v1179_v23  ;;  %v577_v46 = vrot.slane %v357_v62, 2  ;;  %v578_v20 = vrot.slane %v357_v62, 4  ;;  %v579_v39 = vrot.slane %v357_v62, 6 }
 0x175   :  { %7370 = vst [vmem:[#allocation68_spill] sm:$0xff] %v5331_v58  ;;  %v5345_v2 = vadd.f32 %v5041_v25, %v260_v37  ;;  %v2112_v21 = vsel %vm823_vm0, %v357_v62, -inf  ;;  %v353_v34 = vmax.f32 %v246_v16, 0.0  ;;  %v478_v23 = vrot.slane %v5339_v7, 2 }
 0x176   :  { %v2113_v47 = vrot.slane %v2112_v21, 4  ;;  %v2119_v5 = vsel %vm823_vm0, %v577_v46, -inf  ;;  %v2126_v52 = vsel %vm823_vm0, %v578_v20, -inf  ;;  %v2133_v0 = vsel %vm823_vm0, %v579_v39, -inf }
 0x177   :  { %v2120_v29 = vrot.slane %v2119_v5, 4  ;;  %v2127_v13 = vrot.slane %v2126_v52, 4  ;;  %v2134_v18 = vrot.slane %v2133_v0, 4  ;;  %v565_v55 = vrot.slane %v353_v34, 2 }
 0x178   :  { %v2114_v37 = vmax.f32 %v2112_v21, %v2113_v47  ;;  %v566_v19 = vrot.slane %v353_v34, 4  ;;  %v567_v12 = vrot.slane %v353_v34, 6  ;;  %v2000_v56 = vsel %vm823_vm0, %v353_v34, -inf }
 0x179   :  { %v2121_v62 = vmax.f32 %v2119_v5, %v2120_v29  ;;  %v2128_v16 = vmax.f32 %v2126_v52, %v2127_v13  ;;  %v2135_v38 = vmax.f32 %v2133_v0, %v2134_v18  ;;  %v2001_v63 = vrot.slane %v2000_v56, 4 }
 0x17a   :  { %v2115_v6 = vrot.slane %v2114_v37, 2  ;;  %v2007_v46 = vsel %vm823_vm0, %v565_v55, -inf  ;;  %v2014_v20 = vsel %vm823_vm0, %v566_v19, -inf  ;;  %v2021_v39 = vsel %vm823_vm0, %v567_v12, -inf }
 0x17b   :  { %v2122_v11 = vrot.slane %v2121_v62, 2  ;;  %v2129_v31 = vrot.slane %v2128_v16, 2  ;;  %v2136_v3 = vrot.slane %v2135_v38, 2  ;;  %v2002_v53 = vmax.f32 %v2000_v56, %v2001_v63 }
 0x17c   :  { %v2116_v21 = vmax.f32 %v2114_v37, %v2115_v6  ;;  %v2008_v47 = vrot.slane %v2007_v46, 4  ;;  %v2015_v58 = vrot.slane %v2014_v20, 4  ;;  %v2022_v24 = vrot.slane %v2021_v39, 4 }
 0x17d   :  { %v2123_v34 = vmax.f32 %v2121_v62, %v2122_v11  ;;  %v2130_v29 = vmax.f32 %v2128_v16, %v2129_v31  ;;  %v5357_v13 = vmax.f32 %v2135_v38, %v2136_v3  ;;  %v2003_v18 = vrot.slane %v2002_v53, 2 }
 0x17e   :  { %v2117_v5 = vrot.slane %v2116_v21, 1  ;;  %v2009_v52 = vmax.f32 %v2007_v46, %v2008_v47  ;;  %v2016_v55 = vmax.f32 %v2014_v20, %v2015_v58  ;;  %v2023_v0 = vmax.f32 %v2021_v39, %v2022_v24 }
 0x17f   :  { %7371 = vst [vmem:[#allocation69_spill] sm:$0xff] %v5357_v13  ;;  %v2124_v19 = vrot.slane %v2123_v34, 1  ;;  %v2131_v43 = vrot.slane %v2130_v29, 1  ;;  %v2004_v12 = vmax.f32 %v2002_v53, %v2003_v18  ;;  %v479_v49 = vrot.slane %v5339_v7, 4 }
 0x180   :  { %v2010_v6 = vrot.slane %v2009_v52, 2  ;;  %v2017_v56 = vrot.slane %v2016_v55, 2  ;;  %v2024_v37 = vrot.slane %v2023_v0, 2  ;;  %v5361_v15 = vmax.f32 %v2116_v21, %v2117_v5 }
 0x181   :  { %v5363_v11 = vmax.f32 %v2123_v34, %v2124_v19  ;;  %v2005_v31 = vrot.slane %v2004_v12, 1  ;;  %v480_v38 = vrot.slane %v5339_v7, 6  ;;  %v1188_v53 = vsel %vm823_vm0, %v5339_v7, -inf }
 0x182   :  { %7372 = vst [vmem:[#allocation70_spill] sm:$0xff] %v5361_v15  ;;  %v2011_v3 = vmax.f32 %v2009_v52, %v2010_v6  ;;  %v2018_v58 = vmax.f32 %v2016_v55, %v2017_v56  ;;  %v5366_v24 = vmax.f32 %v2023_v0, %v2024_v37  ;;  %v1189_v16 = vrot.slane %v1188_v53, 4  ;;  %v248_v56 = vpop.f32.mrf.mxu2 }
 0x183   :  { %7373 = vst [vmem:[#allocation71_spill] sm:$0xff] %v5363_v11  ;;  %v5370_v62 = vmax.f32 %v2004_v12, %v2005_v31  ;;  %v1195_v46 = vsel %vm823_vm0, %v478_v23, -inf  ;;  %v1202_v20 = vsel %vm823_vm0, %v479_v49, -inf  ;;  %v5374_v39 = vmax.f32 %v2130_v29, %v2131_v43  ;;  %v161_v43 = vpop.f32.mrf.mxu0 }
 0x184   :  { %7374 = vst [vmem:[#allocation72_spill] sm:$0xff] %v5366_v24  ;;  %v2012_v21 = vrot.slane %v2011_v3, 1  ;;  %v2019_v47 = vrot.slane %v2018_v58, 1  ;;  %v1196_v34 = vrot.slane %v1195_v46, 4  ;;  %v1190_v5 = vmax.f32 %v1188_v53, %v1189_v16 }
 0x185   :  { %7375 = vst [vmem:[#allocation73_spill] sm:$0xff] %v5370_v62  ;;  %v1203_v52 = vrot.slane %v1202_v20, 4  ;;  %v5378_v55 = vsel %vm823_vm0, %v480_v38, -inf  ;;  %v339_v12 = vmax.f32 %v5342_v50, 0.0  ;;  %v358_v6 = vmax.f32 %v5345_v2, 0.0 }
 0x186   :  { %7376 = vst [vmem:[#allocation74_spill] sm:$0xff] %v5374_v39  ;;  %v5380_v7 = vmax.f32 %v2011_v3, %v2012_v21  ;;  %v5382_v0 = vmax.f32 %v2018_v58, %v2019_v47  ;;  %v5386_v49 = vmax.f32 %v1195_v46, %v1196_v34  ;;  %v1191_v29 = vrot.slane %v1190_v5, 2  ;;  %v5400_v46 = vld [vmem:[%s7115_s2] ss:$0 sm:$0xff] }
 0x187   :  { %v5394_v38 = vmax.f32 %v1202_v20, %v1203_v52  ;;  %v249_v3 = vadd.f32 %v5041_v25, %v248_v56  ;;  %v523_v58 = vrot.slane %v339_v12, 2  ;;  %v524_v53 = vrot.slane %v339_v12, 4 }
 0x188   :  { %7377 = vst [vmem:[#allocation75_spill] sm:$0xff] %v5380_v7  ;;  %v525_v16 = vrot.slane %v339_v12, 6  ;;  %v162_v50 = vadd.f32 %v5400_v46, %v161_v43  ;;  %v5403_v2 = vmax.f32 %v1190_v5, %v1191_v29  ;;  %v1608_v21 = vsel %vm823_vm0, %v339_v12, -inf }
 0x189   :  { %7378 = vst [vmem:[#allocation76_spill] sm:$0xff] %v5382_v0  ;;  %v580_v47 = vrot.slane %v358_v6, 2  ;;  %v581_v34 = vrot.slane %v358_v6, 4  ;;  %v1609_v20 = vrot.slane %v1608_v21, 4  ;;  %v1615_v52 = vsel %vm823_vm0, %v523_v58, -inf }
 0x18a   :  { %v1622_v25 = vsel %vm823_vm0, %v524_v53, -inf  ;;  %v582_v56 = vrot.slane %v358_v6, 6  ;;  %v1616_v63 = vrot.slane %v1615_v52, 4  ;;  %v1629_v23 = vsel %vm823_vm0, %v525_v16, -inf }
 0x18b   :  { %v1623_v37 = vrot.slane %v1622_v25, 4  ;;  %v2140_v18 = vsel %vm823_vm0, %v358_v6, -inf  ;;  %v1610_v19 = vmax.f32 %v1608_v21, %v1609_v20  ;;  %v1630_v43 = vrot.slane %v1629_v23, 4 }
 0x18c   :  { %v2141_v5 = vrot.slane %v2140_v18, 4  ;;  %v2147_v29 = vsel %vm823_vm0, %v580_v47, -inf  ;;  %v1617_v12 = vmax.f32 %v1615_v52, %v1616_v63  ;;  %v2154_v13 = vsel %vm823_vm0, %v581_v34, -inf }
 0x18d   :  { %v1624_v31 = vmax.f32 %v1622_v25, %v1623_v37  ;;  %v2148_v39 = vrot.slane %v2147_v29, 4  ;;  %v1611_v58 = vrot.slane %v1610_v19, 2  ;;  %v1631_v7 = vmax.f32 %v1629_v23, %v1630_v43 }
 0x18e   :  { %v2142_v53 = vmax.f32 %v2140_v18, %v2141_v5  ;;  %v2155_v26 = vrot.slane %v2154_v13, 4  ;;  %v1618_v48 = vrot.slane %v1617_v12, 2  ;;  %v5416_v47 = vsel %vm823_vm0, %v582_v56, -inf  ;;  %v206_v18 = vpop.f32.mrf.mxu1 }
 0x18f   :  { %v1625_v16 = vrot.slane %v1624_v31, 2  ;;  %v5413_v0 = vmax.f32 %v2147_v29, %v2148_v39  ;;  %v1612_v6 = vmax.f32 %v1610_v19, %v1611_v58  ;;  %v1632_v21 = vrot.slane %v1631_v7, 2  ;;  %7380 = vst [vmem:[#allocation78_spill] sm:$0xff] %v5416_v47 }
 0x190   :  { %v2143_v20 = vrot.slane %v2142_v53, 2  ;;  %v1619_v63 = vmax.f32 %v1617_v12, %v1618_v48  ;;  %v5419_v52 = vmax.f32 %v2154_v13, %v2155_v26  ;;  %v354_v39 = vmax.f32 %v249_v3, 0.0 }
 0x191   :  { %7379 = vst [vmem:[#allocation77_spill] sm:$0xff] %v5413_v0  ;;  %v1626_v37 = vmax.f32 %v1624_v31, %v1625_v16  ;;  %v1613_v23 = vrot.slane %v1612_v6, 1  ;;  %v5421_v25 = vmax.f32 %v1631_v7, %v1632_v21  ;;  %v325_v58 = vmax.f32 %v162_v50, 0.0 }
 0x192   :  { %7381 = vst [vmem:[#allocation79_spill] sm:$0xff] %v5419_v52  ;;  %v5423_v43 = vmax.f32 %v2142_v53, %v2143_v20  ;;  %v1620_v5 = vrot.slane %v1619_v63, 1  ;;  %v568_v31 = vrot.slane %v354_v39, 2  ;;  %v207_v26 = vadd.f32 %v5400_v46, %v206_v18 }
 0x193   :  { %v1627_v19 = vrot.slane %v1626_v37, 1  ;;  %v5426_v56 = vmax.f32 %v1612_v6, %v1613_v23  ;;  %v569_v12 = vrot.slane %v354_v39, 4  ;;  %v570_v53 = vrot.slane %v354_v39, 6 }
 0x194   :  { %7382 = vst [vmem:[#allocation80_spill] sm:$0xff] %v5423_v43  ;;  %v5430_v13 = vmax.f32 %v1619_v63, %v1620_v5  ;;  %v2028_v3 = vsel %vm823_vm0, %v354_v39, -inf  ;;  %v2035_v21 = vsel %vm823_vm0, %v568_v31, -inf  ;;  %v481_v50 = vrot.slane %v325_v58, 2 }
 0x195   :  { %7383 = vst [vmem:[#allocation81_spill] sm:$0xff] %v5426_v56  ;;  %v5433_v16 = vmax.f32 %v1626_v37, %v1627_v19  ;;  %v2029_v20 = vrot.slane %v2028_v3, 4  ;;  %v2036_v23 = vrot.slane %v2035_v21, 4  ;;  %v2042_v18 = vsel %vm823_vm0, %v569_v12, -inf }
 0x196   :  { %7384 = vst [vmem:[#allocation82_spill] sm:$0xff] %v5430_v13  ;;  %v2043_v63 = vrot.slane %v2042_v18, 4  ;;  %v5441_v5 = vsel %vm823_vm0, %v570_v53, -inf  ;;  %v482_v29 = vrot.slane %v325_v58, 4  ;;  %v483_v34 = vrot.slane %v325_v58, 6 }
 0x197   :  { %7385 = vst [vmem:[#allocation83_spill] sm:$0xff] %v5433_v16  ;;  %v2030_v39 = vmax.f32 %v2028_v3, %v2029_v20  ;;  %v5445_v19 = vmax.f32 %v2035_v21, %v2036_v23  ;;  %v1216_v31 = vsel %vm823_vm0, %v325_v58, -inf  ;;  %v1223_v48 = vsel %vm823_vm0, %v481_v50, -inf }
 0x198   :  { %7386 = vst [vmem:[#allocation84_spill] sm:$0xff] %v5441_v5  ;;  %v1217_v6 = vrot.slane %v1216_v31, 4  ;;  %v1230_v12 = vsel %vm823_vm0, %v482_v29, -inf  ;;  %v5451_v53 = vmax.f32 %v2042_v18, %v2043_v63  ;;  %v1224_v47 = vrot.slane %v1223_v48, 4 }
 0x199   :  { %7387 = vst [vmem:[#allocation85_spill] sm:$0xff] %v5445_v19  ;;  %v2031_v62 = vrot.slane %v2030_v39, 2  ;;  %v1231_v52 = vrot.slane %v1230_v12, 4  ;;  %v1237_v3 = vsel %vm823_vm0, %v483_v34, -inf  ;;  %v340_v21 = vmax.f32 %v207_v26, 0.0 }
 0x19a   :  { %7388 = vst [vmem:[#allocation86_spill] sm:$0xff] %v5451_v53  ;;  %v1218_v37 = vmax.f32 %v1216_v31, %v1217_v6  ;;  %v1225_v20 = vmax.f32 %v1223_v48, %v1224_v47  ;;  %v1238_v23 = vrot.slane %v1237_v3, 4  ;;  %v7389_v7 = vrot.slane %v5050_v35, 1 }
 0x19b   :  { %v1232_v58 = vmax.f32 %v1230_v12, %v1231_v52  ;;  %v526_v43 = vrot.slane %v340_v21, 2  ;;  %v527_v18 = vrot.slane %v340_v21, 4  ;;  %v528_v63 = vrot.slane %v340_v21, 6 }
 0x19c   :  { %v5458_v50 = vmax.f32 %v5050_v35, %v7389_v7  ;;  %v1219_v29 = vrot.slane %v1218_v37, 2  ;;  %v5460_v5 = vmax.f32 %v2030_v39, %v2031_v62  ;;  %v1226_v53 = vrot.slane %v1225_v20, 2 }
 0x19d   :  { %v1233_v0 = vrot.slane %v1232_v58, 2  ;;  %v1239_v6 = vmax.f32 %v1237_v3, %v1238_v23  ;;  %v1636_v34 = vsel %vm823_vm0, %v340_v21, -inf  ;;  %v1643_v47 = vsel %vm823_vm0, %v526_v43, -inf }
 0x19e   :  { %7390 = vst [vmem:[#allocation87_spill] sm:$0xff] %v5460_v5  ;;  %v1220_v31 = vmax.f32 %v1218_v37, %v1219_v29  ;;  %v1650_v52 = vsel %vm823_vm0, %v527_v18, -inf  ;;  %v1227_v48 = vmax.f32 %v1225_v20, %v1226_v53  ;;  %v1637_v7 = vrot.slane %v1636_v34, 4 }
 0x19f   :  { %v1234_v26 = vmax.f32 %v1232_v58, %v1233_v0  ;;  %v1240_v35 = vrot.slane %v1239_v6, 2  ;;  %v1644_v19 = vrot.slane %v1643_v47, 4  ;;  %v1651_v24 = vrot.slane %v1650_v52, 4 }
 0x1a0   :  { %v1221_v12 = vrot.slane %v1220_v31, 1  ;;  %v5466_v62 = vsel %vm823_vm0, %v528_v63, -inf  ;;  %v1228_v39 = vrot.slane %v1227_v48, 1  ;;  %v1638_v37 = vmax.f32 %v1636_v34, %v1637_v7  ;;  %v164_v34 = vpop.f32.mrf.mxu0 }
 0x1a1   :  { %7391 = vst [vmem:[#allocation88_spill] sm:$0xff] %v5466_v62  ;;  %v1235_v32 = vrot.slane %v1234_v26, 1  ;;  %v5468_v3 = vmax.f32 %v1239_v6, %v1240_v35  ;;  %v5473_v23 = vmax.f32 %v1643_v47, %v1644_v19  ;;  %v5475_v0 = vmax.f32 %v1650_v52, %v1651_v24  ;;  %v263_v24 = vpop.f32.mrf.mxu3 }
 0x1a2   :  { %v5471_v43 = vmax.f32 %v1220_v31, %v1221_v12  ;;  %v5477_v53 = vmax.f32 %v1227_v48, %v1228_v39  ;;  %v1639_v58 = vrot.slane %v1638_v37, 2  ;;  %v7393_v31 = vrot.slane %v5083_v60, 2 }
 0x1a3   :  { %7392 = vst [vmem:[#allocation89_spill] sm:$0xff] %v5475_v0  ;;  %v5479_v20 = vmax.f32 %v1234_v26, %v1235_v32  ;;  %v7394_v47 = vrot.slane %v5092_v14, 1  ;;  %v1093_v48 = vrot.slane %v5086_v45, 2  ;;  %v7395_v26 = vrot.slane %v5076_v22, 4 }
 0x1a4   :  { %v1087_v19 = vmax.f32 %v5083_v60, %v7393_v31  ;;  %v7396_v12 = vrot.slane %v5134_v51, 1  ;;  %v7397_v39 = vrot.slane %v5218_v36, 1  ;;  %v7398_v21 = vrot.slane %v5211_v57, 2 }
 0x1a5   :  { %v1082_v52 = vmax.f32 %v5092_v14, %v7394_v47  ;;  %v1099_v35 = vmax.f32 %v5076_v22, %v7395_v26  ;;  %v5507_v14 = vmax.f32 %v1638_v37, %v1639_v58  ;;  %v1094_v47 = vmax.f32 %v5086_v45, %v1093_v48 }
 0x1a6   :  { %v1088_v7 = vrot.slane %v1087_v19, 1  ;;  %v1131_v60 = vmax.f32 %v5134_v51, %v7396_v12  ;;  %v1138_v31 = vmax.f32 %v5218_v36, %v7397_v39  ;;  %v1143_v29 = vmax.f32 %v5211_v57, %v7398_v21 }
 0x1a7   :  { %7399 = vst [vmem:[#allocation90_spill] sm:$0xff] %v5507_v14  ;;  %v1100_v6 = vrot.slane %v1099_v35, 2  ;;  %v1149_v22 = vrot.slane %v5220_v41, 2  ;;  %v7400_v63 = vrot.slane %v5207_v44, 4  ;;  %v2634_v36 = vmax.f32 %v5068_v54, %v5151_v59 }
 0x1a8   :  { %v1089_v26 = vmax.f32 %v1087_v19, %v1088_v7  ;;  %v1144_v32 = vrot.slane %v1143_v29, 1  ;;  %v1095_v12 = vrot.slane %v1094_v47, 1  ;;  %v2635_v37 = vmax.f32 %v5458_v50, %v1131_v60 }
 0x1a9   :  { %v1155_v51 = vmax.f32 %v5207_v44, %v7400_v63  ;;  %v1101_v39 = vmax.f32 %v1099_v35, %v1100_v6  ;;  %v1150_v57 = vmax.f32 %v5220_v41, %v1149_v22  ;;  %v2636_v58 = vmax.f32 %v1082_v52, %v1138_v31  ;;  %v251_v63 = vpop.f32.mrf.mxu2  ;;  %v167_v22 = vpop.f32.mrf.mxu0 }
 0x1aa   :  { %v1145_v21 = vmax.f32 %v1143_v29, %v1144_v32  ;;  %v7401_v19 = vmax.f32 %v5054_v40, %v5137_v8  ;;  %v7402_v48 = vmax.f32 %v5056_v17, %v5145_v30  ;;  %v1096_v7 = vmax.f32 %v1094_v47, %v1095_v12  ;;  %v266_v47 = vpop.f32.mrf.mxu3 }
 0x1ab   :  { %v1156_v45 = vrot.slane %v1155_v51, 2  ;;  %v1102_v54 = vrot.slane %v1101_v39, 1  ;;  %v1151_v59 = vrot.slane %v1150_v57, 1  ;;  %v264_v29 = vadd.f32 %v5400_v46, %v263_v24 }
 0x1ac   :  { %v2915_v44 = vsel %vm2894_vm1, %v7402_v48, %v7401_v19  ;;  %v2637_v35 = vmax.f32 %v1089_v26, %v1145_v21  ;;  %v252_v17 = vadd.f32 %v5400_v46, %v251_v63  ;;  %v5532_v31 = vadd.f32 %v5400_v46, %v164_v34 }
 0x1ad   :  { %v2916_v6 = vsel %vm2896_vm2, %v2634_v36, %v2915_v44  ;;  %v1157_v41 = vmax.f32 %v1155_v51, %v1156_v45  ;;  %v1103_v32 = vmax.f32 %v1101_v39, %v1102_v54  ;;  %v1152_v52 = vmax.f32 %v1150_v57, %v1151_v59 }
 0x1ae   :  { %v2917_v50 = vsel %vm2898_vm3, %v2635_v37, %v2916_v6  ;;  %v359_v60 = vmax.f32 %v264_v29, 0.0  ;;  %v355_v51 = vmax.f32 %v252_v17, 0.0  ;;  %v5535_v36 = vadd.f32 %v5400_v46, %v266_v47 }
 0x1af   :  { %v2918_v40 = vsel %vm2900_vm4, %v2636_v58, %v2917_v50  ;;  %v1158_v8 = vrot.slane %v1157_v41, 1  ;;  %v2638_v26 = vmax.f32 %v1096_v7, %v1152_v52  ;;  %v5538_v24 = vadd.f32 %v5400_v46, %v167_v22 }
 0x1b0   :  { %v2919_v30 = vsel %vm2902_vm5, %v2637_v35, %v2918_v40  ;;  %v583_v39 = vrot.slane %v359_v60, 2  ;;  %v584_v57 = vrot.slane %v359_v60, 4  ;;  %v585_v37 = vrot.slane %v359_v60, 6 }
 0x1b1   :  { %v1159_v12 = vmax.f32 %v1157_v41, %v1158_v8  ;;  %v2920_v21 = vsel %vm2904_vm6, %v2638_v26, %v2919_v30  ;;  %v2168_v45 = vsel %vm823_vm0, %v359_v60, -inf  ;;  %v571_v34 = vrot.slane %v355_v51, 2  ;;  %v170_v18 = vpop.f32.mrf.mxu0 }
 0x1b2   :  { %v572_v58 = vrot.slane %v355_v51, 4  ;;  %v2169_v48 = vrot.slane %v2168_v45, 4  ;;  %v2175_v44 = vsel %vm823_vm0, %v583_v39, -inf  ;;  %v2182_v63 = vsel %vm823_vm0, %v584_v57, -inf }
 0x1b3   :  { %v2639_v19 = vmax.f32 %v1103_v32, %v1159_v12  ;;  %v2176_v7 = vrot.slane %v2175_v44, 4  ;;  %v2183_v54 = vrot.slane %v2182_v63, 4  ;;  %v2189_v59 = vsel %vm823_vm0, %v585_v37, -inf }
 0x1b4   :  { %v573_v6 = vrot.slane %v355_v51, 6  ;;  %v2170_v35 = vmax.f32 %v2168_v45, %v2169_v48  ;;  %v2190_v50 = vrot.slane %v2189_v59, 4  ;;  %v2056_v29 = vsel %vm823_vm0, %v355_v51, -inf }
 0x1b5   :  { %v2921_v41 = vsel %vm2906_vm7, %v2639_v19, %v2920_v21  ;;  %v2177_v52 = vmax.f32 %v2175_v44, %v2176_v7  ;;  %v2184_v40 = vmax.f32 %v2182_v63, %v2183_v54  ;;  %v2057_v32 = vrot.slane %v2056_v29, 4 }
 0x1b6   :  { %3051 = vmatmul.f32.gmra.mxu1 %v2921_v41  ;;  %v2063_v17 = vsel %vm823_vm0, %v571_v34, -inf  ;;  %v2171_v8 = vrot.slane %v2170_v35, 2  ;;  %v2191_v30 = vmax.f32 %v2189_v59, %v2190_v50  ;;  %v2070_v47 = vsel %vm823_vm0, %v572_v58, -inf }
 0x1b7   :  { %v2064_v60 = vrot.slane %v2063_v17, 4  ;;  %v2178_v22 = vrot.slane %v2177_v52, 2  ;;  %v2185_v26 = vrot.slane %v2184_v40, 2  ;;  %v2058_v12 = vmax.f32 %v2056_v29, %v2057_v32 }
 0x1b8   :  { %v2071_v39 = vrot.slane %v2070_v47, 4  ;;  %v2172_v57 = vmax.f32 %v2170_v35, %v2171_v8  ;;  %v2192_v37 = vrot.slane %v2191_v30, 2  ;;  %v2077_v51 = vsel %vm823_vm0, %v573_v6, -inf }
 0x1b9   :  { %v2065_v21 = vmax.f32 %v2063_v17, %v2064_v60  ;;  %v2179_v45 = vmax.f32 %v2177_v52, %v2178_v22  ;;  %v2186_v19 = vmax.f32 %v2184_v40, %v2185_v26  ;;  %v2059_v48 = vrot.slane %v2058_v12, 2 }
 0x1ba   :  { %v2072_v44 = vmax.f32 %v2070_v47, %v2071_v39  ;;  %v2173_v63 = vrot.slane %v2172_v57, 1  ;;  %v5550_v34 = vmax.f32 %v2191_v30, %v2192_v37  ;;  %v2078_v54 = vrot.slane %v2077_v51, 4 }
 0x1bb   :  { %v2066_v7 = vrot.slane %v2065_v21, 2  ;;  %v2180_v59 = vrot.slane %v2179_v45, 1  ;;  %v2187_v58 = vrot.slane %v2186_v19, 1  ;;  %v2060_v41 = vmax.f32 %v2058_v12, %v2059_v48  ;;  %v269_v48 = vpop.f32.mrf.mxu3 }
 0x1bc   :  { %7403 = vst [vmem:[#allocation91_spill] sm:$0xff] %v5550_v34  ;;  %v2073_v50 = vrot.slane %v2072_v44, 2  ;;  %v5553_v35 = vmax.f32 %v2172_v57, %v2173_v63  ;;  %v2079_v17 = vmax.f32 %v2077_v51, %v2078_v54  ;;  %v326_v22 = vmax.f32 %v5532_v31, 0.0 }
 0x1bd   :  { %v2067_v32 = vmax.f32 %v2065_v21, %v2066_v7  ;;  %v5555_v6 = vmax.f32 %v2179_v45, %v2180_v59  ;;  %v2061_v40 = vrot.slane %v2060_v41, 1  ;;  %v5558_v30 = vmax.f32 %v2186_v19, %v2187_v58 }
 0x1be   :  { %7404 = vst [vmem:[#allocation92_spill] sm:$0xff] %v5553_v35  ;;  %v2074_v8 = vmax.f32 %v2072_v44, %v2073_v50  ;;  %v2080_v47 = vrot.slane %v2079_v17, 2  ;;  %v360_v39 = vmax.f32 %v5535_v36, 0.0  ;;  %v327_v57 = vmax.f32 %v5538_v24, 0.0 }
 0x1bf   :  { %7405 = vst [vmem:[#allocation93_spill] sm:$0xff] %v5555_v6  ;;  %v2068_v60 = vrot.slane %v2067_v32, 1  ;;  %v5561_v26 = vmax.f32 %v2060_v41, %v2061_v40  ;;  %v484_v51 = vrot.slane %v326_v22, 2  ;;  %v485_v45 = vrot.slane %v326_v22, 4 }
 0x1c0   :  { %7406 = vst [vmem:[#allocation94_spill] sm:$0xff] %v5558_v30  ;;  %v2075_v12 = vrot.slane %v2074_v8, 1  ;;  %v5567_v21 = vmax.f32 %v2079_v17, %v2080_v47  ;;  %v486_v44 = vrot.slane %v326_v22, 6  ;;  %v1244_v63 = vsel %vm823_vm0, %v326_v22, -inf }
 0x1c1   :  { %7407 = vst [vmem:[#allocation95_spill] sm:$0xff] %v5561_v26  ;;  %v5565_v37 = vmax.f32 %v2067_v32, %v2068_v60  ;;  %v270_v31 = vadd.f32 %v5400_v46, %v269_v48  ;;  %v1245_v24 = vrot.slane %v1244_v63, 4  ;;  %v1251_v54 = vsel %vm823_vm0, %v484_v51, -inf }
 0x1c2   :  { %7409 = vst [vmem:[#allocation97_spill] sm:$0xff] %v5567_v21  ;;  %v5569_v19 = vmax.f32 %v2074_v8, %v2075_v12  ;;  %v1252_v59 = vrot.slane %v1251_v54, 4  ;;  %v1258_v58 = vsel %vm823_vm0, %v485_v45, -inf  ;;  %v5579_v41 = vsel %vm823_vm0, %v486_v44, -inf }
 0x1c3   :  { %7408 = vst [vmem:[#allocation96_spill] sm:$0xff] %v5565_v37  ;;  %v586_v50 = vrot.slane %v360_v39, 2  ;;  %v1246_v17 = vmax.f32 %v1244_v63, %v1245_v24  ;;  %v1259_v40 = vrot.slane %v1258_v58, 4  ;;  %v587_v8 = vrot.slane %v360_v39, 4 }
 0x1c4   :  { %7410 = vst [vmem:[#allocation98_spill] sm:$0xff] %v5569_v19  ;;  %v5583_v60 = vmax.f32 %v1251_v54, %v1252_v59  ;;  %v588_v47 = vrot.slane %v360_v39, 6  ;;  %v2196_v22 = vsel %vm823_vm0, %v360_v39, -inf  ;;  %v487_v24 = vrot.slane %v327_v57, 2 }
 0x1c5   :  { %v2203_v12 = vsel %vm823_vm0, %v586_v50, -inf  ;;  %v1247_v51 = vrot.slane %v1246_v17, 2  ;;  %v2197_v48 = vrot.slane %v2196_v22, 4  ;;  %v5588_v52 = vmax.f32 %v1258_v58, %v1259_v40 }
 0x1c6   :  { %v2204_v44 = vrot.slane %v2203_v12, 4  ;;  %v2210_v36 = vsel %vm823_vm0, %v587_v8, -inf  ;;  %v5592_v63 = vsel %vm823_vm0, %v588_v47, -inf  ;;  %v488_v7 = vrot.slane %v327_v57, 4 }
 0x1c7   :  { %7411 = vst [vmem:[#allocation99_spill] sm:$0xff] %v5592_v63  ;;  %v5594_v54 = vmax.f32 %v1246_v17, %v1247_v51  ;;  %v2198_v59 = vmax.f32 %v2196_v22, %v2197_v48  ;;  %v2211_v39 = vrot.slane %v2210_v36, 4  ;;  %v489_v29 = vrot.slane %v327_v57, 6  ;;  %v272_v48 = vpop.f32.mrf.mxu3 }
 0x1c8   :  { %v5596_v32 = vmax.f32 %v2203_v12, %v2204_v44  ;;  %v1272_v45 = vsel %vm823_vm0, %v327_v57, -inf  ;;  %v1279_v22 = vsel %vm823_vm0, %v487_v24, -inf  ;;  %v1286_v12 = vsel %vm823_vm0, %v488_v7, -inf }
 0x1c9   :  { %v2199_v40 = vrot.slane %v2198_v59, 2  ;;  %v1273_v17 = vrot.slane %v1272_v45, 4  ;;  %v1293_v51 = vsel %vm823_vm0, %v489_v29, -inf  ;;  %v5606_v44 = vmax.f32 %v2210_v36, %v2211_v39 }
 0x1ca   :  { %7412 = vst [vmem:[#allocation100_spill] sm:$0xff] %v5596_v32  ;;  %v1280_v50 = vrot.slane %v1279_v22, 4  ;;  %v1287_v57 = vrot.slane %v1286_v12, 4  ;;  %v1294_v30 = vrot.slane %v1293_v51, 4  ;;  %v361_v8 = vmax.f32 %v270_v31, 0.0 }
 0x1cb   :  { %7413 = vst [vmem:[#allocation101_spill] sm:$0xff] %v5606_v44  ;;  %v5608_v58 = vmax.f32 %v2198_v59, %v2199_v40  ;;  %v1274_v34 = vmax.f32 %v1272_v45, %v1273_v17  ;;  %v171_v47 = vadd.f32 %v5400_v46, %v170_v18  ;;  %v273_v24 = vadd.f32 %v5400_v46, %v272_v48 }
 0x1cc   :  { %v1281_v63 = vmax.f32 %v1279_v22, %v1280_v50  ;;  %v1288_v32 = vmax.f32 %v1286_v12, %v1287_v57  ;;  %v1295_v11 = vmax.f32 %v1293_v51, %v1294_v30  ;;  %v589_v37 = vrot.slane %v361_v8, 2 }
 0x1cd   :  { %7414 = vst [vmem:[#allocation102_spill] sm:$0xff] %v5608_v58  ;;  %v1275_v7 = vrot.slane %v1274_v34, 2  ;;  %v590_v29 = vrot.slane %v361_v8, 4  ;;  %v591_v15 = vrot.slane %v361_v8, 6  ;;  %v2224_v26 = vsel %vm823_vm0, %v361_v8, -inf }
 0x1ce   :  { %v1282_v36 = vrot.slane %v1281_v63, 2  ;;  %v1289_v39 = vrot.slane %v1288_v32, 2  ;;  %v1296_v44 = vrot.slane %v1295_v11, 2  ;;  %v2225_v40 = vrot.slane %v2224_v26, 4 }
 0x1cf   :  { %v1276_v59 = vmax.f32 %v1274_v34, %v1275_v7  ;;  %v2231_v31 = vsel %vm823_vm0, %v589_v37, -inf  ;;  %v2238_v18 = vsel %vm823_vm0, %v590_v29, -inf  ;;  %v2245_v48 = vsel %vm823_vm0, %v591_v15, -inf }
 0x1d0   :  { %v1283_v45 = vmax.f32 %v1281_v63, %v1282_v36  ;;  %v1290_v50 = vmax.f32 %v1288_v32, %v1289_v39  ;;  %v5615_v30 = vmax.f32 %v1295_v11, %v1296_v44  ;;  %v2232_v17 = vrot.slane %v2231_v31, 4 }
 0x1d1   :  { %v1277_v22 = vrot.slane %v1276_v59, 1  ;;  %v2226_v12 = vmax.f32 %v2224_v26, %v2225_v40  ;;  %v2239_v51 = vrot.slane %v2238_v18, 4  ;;  %v2246_v29 = vrot.slane %v2245_v48, 4 }
 0x1d2   :  { %v1284_v19 = vrot.slane %v1283_v45, 1  ;;  %v1291_v8 = vrot.slane %v1290_v50, 1  ;;  %v2233_v34 = vmax.f32 %v2231_v31, %v2232_v17  ;;  %v328_v44 = vmax.f32 %v171_v47, 0.0 }
 0x1d3   :  { %v2227_v37 = vrot.slane %v2226_v12, 2  ;;  %v2240_v21 = vmax.f32 %v2238_v18, %v2239_v51  ;;  %v5620_v63 = vmax.f32 %v1276_v59, %v1277_v22  ;;  %v2247_v39 = vmax.f32 %v2245_v48, %v2246_v29 }
 0x1d4   :  { %v5622_v11 = vmax.f32 %v1283_v45, %v1284_v19  ;;  %v2234_v32 = vrot.slane %v2233_v34, 2  ;;  %v362_v15 = vmax.f32 %v273_v24, 0.0  ;;  %v490_v57 = vrot.slane %v328_v44, 2 }
 0x1d5   :  { %v2228_v26 = vmax.f32 %v2226_v12, %v2227_v37  ;;  %v2241_v36 = vrot.slane %v2240_v21, 2  ;;  %v491_v58 = vrot.slane %v328_v44, 4  ;;  %v492_v5 = vrot.slane %v328_v44, 6 }
 0x1d6   :  { %v2235_v40 = vmax.f32 %v2233_v34, %v2234_v32  ;;  %v2248_v7 = vrot.slane %v2247_v39, 2  ;;  %v1300_v18 = vsel %vm823_vm0, %v328_v44, -inf  ;;  %v1307_v19 = vsel %vm823_vm0, %v490_v57, -inf  ;;  %v173_v44 = vpop.f32.mrf.mxu0 }
 0x1d7   :  { %v2229_v31 = vrot.slane %v2228_v26, 1  ;;  %v2242_v17 = vmax.f32 %v2240_v21, %v2241_v36  ;;  %v1301_v59 = vrot.slane %v1300_v18, 4  ;;  %v1314_v45 = vsel %vm823_vm0, %v491_v58, -inf }
 0x1d8   :  { %v2236_v51 = vrot.slane %v2235_v40, 1  ;;  %v5629_v12 = vmax.f32 %v2247_v39, %v2248_v7  ;;  %v1308_v24 = vrot.slane %v1307_v19, 4  ;;  %v1315_v37 = vrot.slane %v1314_v45, 4 }
 0x1d9   :  { %v5627_v47 = vmax.f32 %v2228_v26, %v2229_v31  ;;  %v2243_v22 = vrot.slane %v2242_v17, 1  ;;  %v1302_v34 = vmax.f32 %v1300_v18, %v1301_v59  ;;  %v5634_v21 = vsel %vm823_vm0, %v492_v5, -inf }
 0x1da   :  { %7416 = vst [vmem:[#allocation104_spill] sm:$0xff] %v5629_v12  ;;  %v5631_v48 = vmax.f32 %v2235_v40, %v2236_v51  ;;  %v5636_v29 = vmax.f32 %v1290_v50, %v1291_v8  ;;  %v5641_v58 = vmax.f32 %v1307_v19, %v1308_v24  ;;  %v5647_v39 = vmax.f32 %v1314_v45, %v1315_v37 }
 0x1db   :  { %7415 = vst [vmem:[#allocation103_spill] sm:$0xff] %v5627_v47  ;;  %v5638_v32 = vmax.f32 %v2242_v17, %v2243_v22  ;;  %v1303_v36 = vrot.slane %v1302_v34, 2  ;;  %v592_v50 = vrot.slane %v362_v15, 2  ;;  %v593_v8 = vrot.slane %v362_v15, 4  ;;  %v275_v47 = vpop.f32.mrf.mxu3 }
 0x1dc   :  { %7417 = vst [vmem:[#allocation105_spill] sm:$0xff] %v5631_v48  ;;  %v594_v40 = vrot.slane %v362_v15, 6  ;;  %v2252_v18 = vsel %vm823_vm0, %v362_v15, -inf  ;;  %v174_v51 = vadd.f32 %v5400_v46, %v173_v44  ;;  %v7424_v24 = vrot.slane %v5403_v2, 1 }
 0x1dd   :  { %7418 = vst [vmem:[#allocation106_spill] sm:$0xff] %v5638_v32  ;;  %v5650_v31 = vmax.f32 %v1302_v34, %v1303_v36  ;;  %v2253_v59 = vrot.slane %v2252_v18, 4  ;;  %v2259_v19 = vsel %vm823_vm0, %v592_v50, -inf  ;;  %v2266_v22 = vsel %vm823_vm0, %v593_v8, -inf }
 0x1de   :  { %v5658_v45 = vsel %vm823_vm0, %v594_v40, -inf  ;;  %v2260_v37 = vrot.slane %v2259_v19, 4  ;;  %v2267_v26 = vrot.slane %v2266_v22, 4  ;;  %v7420_v34 = vrot.slane %v5315_v10, 1  ;;  %v176_v32 = vpop.f32.mrf.mxu0 }
 0x1df   :  { %7419 = vst [vmem:[#allocation107_spill] sm:$0xff] %v5658_v45  ;;  %v2254_v15 = vmax.f32 %v2252_v18, %v2253_v59  ;;  %v329_v7 = vmax.f32 %v174_v51, 0.0  ;;  %v7421_v50 = vrot.slane %v5386_v49, 2  ;;  %v5677_v5 = vmax.f32 %v5403_v2, %v7424_v24 }
 0x1e0   :  { %v5664_v36 = vmax.f32 %v5315_v10, %v7420_v34  ;;  %v5670_v57 = vmax.f32 %v2259_v19, %v2260_v37  ;;  %v5672_v40 = vmax.f32 %v2266_v22, %v2267_v26  ;;  %v1205_v10 = vrot.slane %v5394_v38, 2 }
 0x1e1   :  { %v1199_v8 = vmax.f32 %v5386_v49, %v7421_v50  ;;  %v2255_v34 = vrot.slane %v2254_v15, 2  ;;  %v493_v18 = vrot.slane %v329_v7, 2  ;;  %v494_v59 = vrot.slane %v329_v7, 4 }
 0x1e2   :  { %7422 = vst [vmem:[#allocation108_spill] sm:$0xff] %v5670_v57  ;;  %v495_v44 = vrot.slane %v329_v7, 6  ;;  %v1328_v51 = vsel %vm823_vm0, %v329_v7, -inf  ;;  %v1206_v49 = vmax.f32 %v5394_v38, %v1205_v10  ;;  %v7425_v19 = vrot.slane %v5378_v55, 4 }
 0x1e3   :  { %7423 = vst [vmem:[#allocation109_spill] sm:$0xff] %v5672_v40  ;;  %v1200_v17 = vrot.slane %v1199_v8, 1  ;;  %v5685_v22 = vmax.f32 %v2254_v15, %v2255_v34  ;;  %v1329_v37 = vrot.slane %v1328_v51, 4  ;;  %v1335_v2 = vsel %vm823_vm0, %v493_v18, -inf }
 0x1e4   :  { %v1211_v26 = vmax.f32 %v5378_v55, %v7425_v19  ;;  %v1342_v24 = vsel %vm823_vm0, %v494_v59, -inf  ;;  %v1336_v48 = vrot.slane %v1335_v2, 4  ;;  %v1349_v7 = vsel %vm823_vm0, %v495_v44, -inf }
 0x1e5   :  { %7426 = vst [vmem:[#allocation110_spill] sm:$0xff] %v5685_v22  ;;  %v1343_v6 = vrot.slane %v1342_v24, 4  ;;  %v1330_v38 = vmax.f32 %v1328_v51, %v1329_v37  ;;  %v1350_v10 = vrot.slane %v1349_v7, 4  ;;  %v5692_v35 = vmax.f32 %v1199_v8, %v1200_v17 }
 0x1e6   :  { %v1337_v55 = vmax.f32 %v1335_v2, %v1336_v48  ;;  %v1207_v34 = vrot.slane %v1206_v49, 1  ;;  %v1212_v19 = vrot.slane %v1211_v26, 2  ;;  %v7427_v59 = vrot.slane %v5468_v3, 1 }
 0x1e7   :  { %v1344_v15 = vmax.f32 %v1342_v24, %v1343_v6  ;;  %v1331_v18 = vrot.slane %v1330_v38, 2  ;;  %v1351_v45 = vmax.f32 %v1349_v7, %v1350_v10  ;;  %v7428_v40 = vrot.slane %v5594_v54, 1 }
 0x1e8   :  { %v1243_v50 = vmax.f32 %v5468_v3, %v7427_v59  ;;  %v1338_v51 = vrot.slane %v1337_v55, 2  ;;  %v1213_v17 = vmax.f32 %v1211_v26, %v1212_v19  ;;  %v7429_v48 = vrot.slane %v5583_v60, 2 }
 0x1e9   :  { %v1250_v44 = vmax.f32 %v5594_v54, %v7428_v40  ;;  %v1345_v37 = vrot.slane %v1344_v15, 2  ;;  %v1332_v8 = vmax.f32 %v1330_v38, %v1331_v18  ;;  %v1352_v2 = vrot.slane %v1351_v45, 2 }
 0x1ea   :  { %v1255_v6 = vmax.f32 %v5583_v60, %v7429_v48  ;;  %v1261_v24 = vrot.slane %v5588_v52, 2  ;;  %v7430_v7 = vrot.slane %v5579_v41, 4  ;;  %v1339_v10 = vmax.f32 %v1337_v55, %v1338_v51 }
 0x1eb   :  { %v1346_v59 = vmax.f32 %v1344_v15, %v1345_v37  ;;  %v1214_v57 = vrot.slane %v1213_v17, 1  ;;  %v1333_v40 = vrot.slane %v1332_v8, 1  ;;  %v5707_v22 = vmax.f32 %v1351_v45, %v1352_v2 }
 0x1ec   :  { %v1267_v3 = vmax.f32 %v5579_v41, %v7430_v7  ;;  %v1256_v54 = vrot.slane %v1255_v6, 1  ;;  %v1262_v26 = vmax.f32 %v5588_v52, %v1261_v24  ;;  %v1340_v12 = vrot.slane %v1339_v10, 1 }
 0x1ed   :  { %v1347_v60 = vrot.slane %v1346_v59, 1  ;;  %v1208_v38 = vmax.f32 %v1206_v49, %v1207_v34  ;;  %v5710_v48 = vmax.f32 %v1332_v8, %v1333_v40  ;;  %v1215_v13 = vmax.f32 %v1213_v17, %v1214_v57 }
 0x1ee   :  { %v1268_v19 = vrot.slane %v1267_v3, 2  ;;  %v1257_v18 = vmax.f32 %v1255_v6, %v1256_v54  ;;  %v1263_v28 = vrot.slane %v1262_v26, 1  ;;  %v5712_v41 = vmax.f32 %v1339_v10, %v1340_v12 }
 0x1ef   :  { %v5714_v55 = vmax.f32 %v1346_v59, %v1347_v60  ;;  %v2642_v45 = vmax.f32 %v5335_v42, %v5479_v20  ;;  %v2643_v37 = vmax.f32 %v5664_v36, %v1243_v50  ;;  %v2644_v49 = vmax.f32 %v5677_v5, %v1250_v44  ;;  %v179_v42 = vpop.f32.mrf.mxu0  ;;  %v278_v44 = vpop.f32.mrf.mxu3 }
 0x1f0   :  { %v1269_v56 = vmax.f32 %v1267_v3, %v1268_v19  ;;  %v1264_v52 = vmax.f32 %v1262_v26, %v1263_v28  ;;  %v2645_v34 = vmax.f32 %v5692_v35, %v1257_v18  ;;  %v7431_v12 = vmax.f32 %v5323_v9, %v5471_v43 }
 0x1f1   :  { %v7432_v17 = vmax.f32 %v5329_v1, %v5477_v53  ;;  %v276_v28 = vadd.f32 %v5400_v46, %v275_v47  ;;  %v177_v50 = vadd.f32 %v5400_v46, %v176_v32  ;;  %v279_v1 = vadd.f32 %v5400_v46, %v278_v44 }
 0x1f2   :  { %v1270_v51 = vrot.slane %v1269_v56, 1  ;;  %v2646_v36 = vmax.f32 %v1208_v38, %v1264_v52 }
 0x1f3   :  { %v2922_v6 = vsel %vm2894_vm1, %v7432_v17, %v7431_v12  ;;  %v363_v43 = vmax.f32 %v276_v28, 0.0  ;;  %v330_v47 = vmax.f32 %v177_v50, 0.0 }
 0x1f4   :  { %v1271_v20 = vmax.f32 %v1269_v56, %v1270_v51  ;;  %v2923_v5 = vsel %vm2896_vm2, %v2642_v45, %v2922_v6  ;;  %v180_v56 = vadd.f32 %v5400_v46, %v179_v42 }
 0x1f5   :  { %v2924_v9 = vsel %vm2898_vm3, %v2643_v37, %v2923_v5  ;;  %v595_v24 = vrot.slane %v363_v43, 2  ;;  %v596_v7 = vrot.slane %v363_v43, 4  ;;  %v597_v32 = vrot.slane %v363_v43, 6 }
 0x1f6   :  { %v2647_v53 = vmax.f32 %v1215_v13, %v1271_v20  ;;  %v2925_v8 = vsel %vm2900_vm4, %v2644_v49, %v2924_v9  ;;  %v2280_v10 = vsel %vm823_vm0, %v363_v43, -inf  ;;  %v496_v59 = vrot.slane %v330_v47, 2 }
 0x1f7   :  { %v2926_v2 = vsel %vm2902_vm5, %v2645_v34, %v2925_v8  ;;  %v497_v54 = vrot.slane %v330_v47, 4  ;;  %v2281_v26 = vrot.slane %v2280_v10, 4  ;;  %v2287_v13 = vsel %vm823_vm0, %v595_v24, -inf  ;;  %v281_v43 = vpop.f32.mrf.mxu3 }
 0x1f8   :  { %v2927_v3 = vsel %vm2904_vm6, %v2646_v36, %v2926_v2  ;;  %v2294_v19 = vsel %vm823_vm0, %v596_v7, -inf  ;;  %v2288_v60 = vrot.slane %v2287_v13, 4  ;;  %v2301_v18 = vsel %vm823_vm0, %v597_v32, -inf }
 0x1f9   :  { %v2928_v40 = vsel %vm2906_vm7, %v2647_v53, %v2927_v3  ;;  %v2295_v38 = vrot.slane %v2294_v19, 4  ;;  %v498_v45 = vrot.slane %v330_v47, 6  ;;  %v2282_v52 = vmax.f32 %v2280_v10, %v2281_v26 }
 0x1fa   :  { %3054 = vmatmul.f32.gmra.mxu1 %v2928_v40  ;;  %v2302_v51 = vrot.slane %v2301_v18, 4  ;;  %v1356_v37 = vsel %vm823_vm0, %v330_v47, -inf  ;;  %v1363_v49 = vsel %vm823_vm0, %v496_v59, -inf  ;;  %v2289_v34 = vmax.f32 %v2287_v13, %v2288_v60 }
 0x1fb   :  { %v2296_v12 = vmax.f32 %v2294_v19, %v2295_v38  ;;  %v1357_v17 = vrot.slane %v1356_v37, 4  ;;  %v1364_v6 = vrot.slane %v1363_v49, 4  ;;  %v2283_v28 = vrot.slane %v2282_v52, 2 }
 0x1fc   :  { %v2303_v42 = vmax.f32 %v2301_v18, %v2302_v51  ;;  %v1370_v20 = vsel %vm823_vm0, %v497_v54, -inf  ;;  %v5751_v36 = vsel %vm823_vm0, %v498_v45, -inf  ;;  %v2290_v5 = vrot.slane %v2289_v34, 2 }
 0x1fd   :  { %v2297_v50 = vrot.slane %v2296_v12, 2  ;;  %v1358_v44 = vmax.f32 %v1356_v37, %v1357_v17  ;;  %v5753_v9 = vmax.f32 %v1363_v49, %v1364_v6  ;;  %v2284_v53 = vmax.f32 %v2282_v52, %v2283_v28 }
 0x1fe   :  { %v2304_v8 = vrot.slane %v2303_v42, 2  ;;  %v1371_v47 = vrot.slane %v1370_v20, 4  ;;  %v282_v2 = vadd.f32 %v5400_v46, %v281_v43  ;;  %v2291_v24 = vmax.f32 %v2289_v34, %v2290_v5 }
 0x1ff   :  { %v2298_v7 = vmax.f32 %v2296_v12, %v2297_v50  ;;  %v1359_v32 = vrot.slane %v1358_v44, 2  ;;  %v2285_v10 = vrot.slane %v2284_v53, 1  ;;  %v364_v40 = vmax.f32 %v279_v1, 0.0 }
 0x200   :  { %v5757_v59 = vmax.f32 %v2303_v42, %v2304_v8  ;;  %v2292_v26 = vrot.slane %v2291_v24, 1  ;;  %v5760_v19 = vmax.f32 %v1370_v20, %v1371_v47  ;;  %v331_v60 = vmax.f32 %v180_v56, 0.0 }
 0x201   :  { %v2299_v13 = vrot.slane %v2298_v7, 1  ;;  %v5762_v38 = vmax.f32 %v2284_v53, %v2285_v10  ;;  %v5764_v18 = vmax.f32 %v1358_v44, %v1359_v32  ;;  %v598_v46 = vrot.slane %v364_v40, 2 }
 0x202   :  { %7433 = vst [vmem:[#allocation111_spill] sm:$0xff] %v5757_v59  ;;  %v599_v45 = vrot.slane %v364_v40, 4  ;;  %v5766_v52 = vmax.f32 %v2291_v24, %v2292_v26  ;;  %v600_v49 = vrot.slane %v364_v40, 6  ;;  %v2308_v1 = vsel %vm823_vm0, %v364_v40, -inf }
 0x203   :  { %7434 = vst [vmem:[#allocation112_spill] sm:$0xff] %v5762_v38  ;;  %v5768_v51 = vmax.f32 %v2298_v7, %v2299_v13  ;;  %v2315_v34 = vsel %vm823_vm0, %v598_v46, -inf  ;;  %v499_v56 = vrot.slane %v331_v60, 2  ;;  %v2309_v17 = vrot.slane %v2308_v1, 4 }
 0x204   :  { %7435 = vst [vmem:[#allocation113_spill] sm:$0xff] %v5766_v52  ;;  %v2322_v12 = vsel %vm823_vm0, %v599_v45, -inf  ;;  %v2316_v6 = vrot.slane %v2315_v34, 4  ;;  %v5775_v42 = vsel %vm823_vm0, %v600_v49, -inf  ;;  %v500_v5 = vrot.slane %v331_v60, 4 }
 0x205   :  { %7436 = vst [vmem:[#allocation114_spill] sm:$0xff] %v5768_v51  ;;  %v2323_v28 = vrot.slane %v2322_v12, 4  ;;  %v501_v50 = vrot.slane %v331_v60, 6  ;;  %v1384_v44 = vsel %vm823_vm0, %v331_v60, -inf  ;;  %v2310_v43 = vmax.f32 %v2308_v1, %v2309_v17 }
 0x206   :  { %7437 = vst [vmem:[#allocation115_spill] sm:$0xff] %v5775_v42  ;;  %v5779_v53 = vmax.f32 %v2315_v34, %v2316_v6  ;;  %v1385_v47 = vrot.slane %v1384_v44, 4  ;;  %v1391_v24 = vsel %vm823_vm0, %v499_v56, -inf  ;;  %v1398_v7 = vsel %vm823_vm0, %v500_v5, -inf }
 0x207   :  { %v1405_v32 = vsel %vm823_vm0, %v501_v50, -inf  ;;  %v365_v10 = vmax.f32 %v282_v2, 0.0  ;;  %v2311_v40 = vrot.slane %v2310_v43, 2  ;;  %v5785_v26 = vmax.f32 %v2322_v12, %v2323_v28  ;;  %v182_v50 = vpop.f32.mrf.mxu0 }
 0x208   :  { %7438 = vst [vmem:[#allocation116_spill] sm:$0xff] %v5779_v53  ;;  %v1386_v13 = vmax.f32 %v1384_v44, %v1385_v47  ;;  %v1392_v46 = vrot.slane %v1391_v24, 4  ;;  %v1399_v45 = vrot.slane %v1398_v7, 4  ;;  %v1406_v60 = vrot.slane %v1405_v32, 4 }
 0x209   :  { %7439 = vst [vmem:[#allocation117_spill] sm:$0xff] %v5785_v26  ;;  %v601_v49 = vrot.slane %v365_v10, 2  ;;  %v602_v1 = vrot.slane %v365_v10, 4  ;;  %v603_v8 = vrot.slane %v365_v10, 6  ;;  %v2336_v5 = vsel %vm823_vm0, %v365_v10, -inf }
 0x20a   :  { %v1387_v17 = vrot.slane %v1386_v13, 2  ;;  %v1393_v6 = vmax.f32 %v1391_v24, %v1392_v46  ;;  %v1400_v56 = vmax.f32 %v1398_v7, %v1399_v45  ;;  %v1407_v37 = vmax.f32 %v1405_v32, %v1406_v60 }
 0x20b   :  { %v2343_v2 = vsel %vm823_vm0, %v601_v49, -inf  ;;  %v5790_v12 = vmax.f32 %v2310_v43, %v2311_v40  ;;  %v2337_v47 = vrot.slane %v2336_v5, 4  ;;  %v2350_v34 = vsel %vm823_vm0, %v602_v1, -inf }
 0x20c   :  { %v1388_v28 = vmax.f32 %v1386_v13, %v1387_v17  ;;  %v1394_v44 = vrot.slane %v1393_v6, 2  ;;  %v1401_v35 = vrot.slane %v1400_v56, 2  ;;  %v1408_v57 = vrot.slane %v1407_v37, 2  ;;  %v284_v17 = vpop.f32.mrf.mxu3 }
 0x20d   :  { %7440 = vst [vmem:[#allocation118_spill] sm:$0xff] %v5790_v12  ;;  %v2344_v3 = vrot.slane %v2343_v2, 4  ;;  %v2338_v46 = vmax.f32 %v2336_v5, %v2337_v47  ;;  %v2351_v7 = vrot.slane %v2350_v34, 4  ;;  %v2357_v60 = vsel %vm823_vm0, %v603_v8, -inf  ;;  %v5808_v8 = vld [vmem:[%s7115_s2] ss:$0 sm:$0xff] }
 0x20e   :  { %v1389_v54 = vrot.slane %v1388_v28, 1  ;;  %v1395_v24 = vmax.f32 %v1393_v6, %v1394_v44  ;;  %v1402_v32 = vmax.f32 %v1400_v56, %v1401_v35  ;;  %v5793_v45 = vmax.f32 %v1407_v37, %v1408_v57  ;;  %v5802_v35 = vld [vmem:[%s7115_s2 + $0x1] ss:$0 sm:$0xff] }
 0x20f   :  { %v2345_v10 = vmax.f32 %v2343_v2, %v2344_v3  ;;  %v2339_v13 = vrot.slane %v2338_v46, 2  ;;  %v2352_v49 = vmax.f32 %v2350_v34, %v2351_v7  ;;  %v2358_v51 = vrot.slane %v2357_v60, 4  ;;  %v3046_v34 = vpop.f32.mrf.mxu1  ;;  %v185_v42 = vpop.f32.mrf.mxu0 }
 0x210   :  { %v1396_v40 = vrot.slane %v1395_v24, 1  ;;  %v5797_v20 = vmax.f32 %v1388_v28, %v1389_v54  ;;  %v1403_v15 = vrot.slane %v1402_v32, 1  ;;  %v183_v54 = vadd.f32 %v5808_v8, %v182_v50 }
 0x211   :  { %v2346_v1 = vrot.slane %v2345_v10, 2  ;;  %v2340_v3 = vmax.f32 %v2338_v46, %v2339_v13  ;;  %v2353_v37 = vrot.slane %v2352_v49, 2  ;;  %v2359_v5 = vmax.f32 %v2357_v60, %v2358_v51 }
 0x212   :  { %v5811_v6 = vmax.f32 %v1395_v24, %v1396_v40  ;;  %v285_v2 = vadd.f32 %v5808_v8, %v284_v17  ;;  %v5814_v28 = vmax.f32 %v1402_v32, %v1403_v15  ;;  %v332_v46 = vmax.f32 %v183_v54, 0.0 }
 0x213   :  { %v2347_v56 = vmax.f32 %v2345_v10, %v2346_v1  ;;  %v2341_v44 = vrot.slane %v2340_v3, 1  ;;  %v2354_v47 = vmax.f32 %v2352_v49, %v2353_v37  ;;  %v2360_v13 = vrot.slane %v2359_v5, 2 }
 0x214   :  { %v366_v43 = vmax.f32 %v285_v2, 0.0  ;;  %v3047_v57 = vadd.f32 %v5802_v35, %v3046_v34  ;;  %v502_v24 = vrot.slane %v332_v46, 2  ;;  %v503_v40 = vrot.slane %v332_v46, 4  ;;  %v287_v59 = vpop.f32.mrf.mxu3 }
 0x215   :  { %v2348_v7 = vrot.slane %v2347_v56, 1  ;;  %v5817_v26 = vmax.f32 %v2340_v3, %v2341_v44  ;;  %v2355_v50 = vrot.slane %v2354_v47, 1  ;;  %v5821_v51 = vmax.f32 %v2359_v5, %v2360_v13 }
 0x216   :  { %v504_v15 = vrot.slane %v332_v46, 6  ;;  %v1412_v32 = vsel %vm823_vm0, %v332_v46, -inf  ;;  %v1419_v17 = vsel %vm823_vm0, %v502_v24, -inf  ;;  %v186_v1 = vadd.f32 %v5808_v8, %v185_v42 }
 0x217   :  { %7441 = vst [vmem:[#allocation119_spill] sm:$0xff] %v5817_v26  ;;  %v5819_v10 = vmax.f32 %v2347_v56, %v2348_v7  ;;  %v5824_v60 = vmax.f32 %v2354_v47, %v2355_v50  ;;  %v1413_v49 = vrot.slane %v1412_v32, 4  ;;  %v1420_v54 = vrot.slane %v1419_v17, 4 }
 0x218   :  { %7443 = vst [vmem:[#allocation121_spill] sm:$0xff] %v5821_v51  ;;  %v1426_v34 = vsel %vm823_vm0, %v503_v40, -inf  ;;  %v5833_v2 = vsel %vm823_vm0, %v504_v15, -inf  ;;  %v604_v44 = vrot.slane %v366_v43, 2  ;;  %v605_v42 = vrot.slane %v366_v43, 4 }
 0x219   :  { %7442 = vst [vmem:[#allocation120_spill] sm:$0xff] %v5819_v10  ;;  %v1414_v56 = vmax.f32 %v1412_v32, %v1413_v49  ;;  %v1427_v5 = vrot.slane %v1426_v34, 4  ;;  %v5837_v46 = vmax.f32 %v1419_v17, %v1420_v54  ;;  %v606_v7 = vrot.slane %v366_v43, 6 }
 0x21a   :  { %7444 = vst [vmem:[#allocation122_spill] sm:$0xff] %v5824_v60  ;;  %v2364_v24 = vsel %vm823_vm0, %v366_v43, -inf  ;;  %v2371_v40 = vsel %vm823_vm0, %v604_v44, -inf  ;;  %v2378_v37 = vsel %vm823_vm0, %v605_v42, -inf  ;;  %v3094_v54 = vmax.f32 %v3047_v57, 0.0 }
 0x21b   :  { %v1415_v13 = vrot.slane %v1414_v56, 2  ;;  %v5842_v32 = vmax.f32 %v1426_v34, %v1427_v5  ;;  %v2365_v49 = vrot.slane %v2364_v24, 4  ;;  %v2372_v15 = vrot.slane %v2371_v40, 4 }
 0x21c   :  { %v2379_v47 = vrot.slane %v2378_v37, 4  ;;  %v5848_v17 = vsel %vm823_vm0, %v606_v7, -inf  ;;  %v333_v43 = vmax.f32 %v186_v1, 0.0  ;;  %v3126_v44 = vrot.slane %v3094_v54, 2 }
 0x21d   :  { %v5845_v3 = vmax.f32 %v1414_v56, %v1415_v13  ;;  %7445 = vst [vmem:[#allocation123_spill] sm:$0xff] %v5848_v17  ;;  %v2366_v50 = vmax.f32 %v2364_v24, %v2365_v49  ;;  %v5851_v52 = vmax.f32 %v2371_v40, %v2372_v15  ;;  %v3127_v26 = vrot.slane %v3094_v54, 4 }
 0x21e   :  { %v5855_v56 = vmax.f32 %v2378_v37, %v2379_v47  ;;  %v3128_v13 = vrot.slane %v3094_v54, 6  ;;  %v3222_v7 = vsel %vm823_vm0, %v3094_v54, -inf  ;;  %v3229_v57 = vsel %vm823_vm0, %v3126_v44, -inf }
 0x21f   :  { %7446 = vst [vmem:[#allocation124_spill] sm:$0xff] %v5851_v52  ;;  %v2367_v42 = vrot.slane %v2366_v50, 2  ;;  %v3223_v38 = vrot.slane %v3222_v7, 4  ;;  %v3236_v24 = vsel %vm823_vm0, %v3127_v26, -inf  ;;  %v505_v40 = vrot.slane %v333_v43, 2 }
 0x220   :  { %7447 = vst [vmem:[#allocation125_spill] sm:$0xff] %v5855_v56  ;;  %v3230_v49 = vrot.slane %v3229_v57, 4  ;;  %v3237_v15 = vrot.slane %v3236_v24, 4  ;;  %v3243_v5 = vsel %vm823_vm0, %v3128_v13, -inf  ;;  %v506_v47 = vrot.slane %v333_v43, 4 }
 0x221   :  { %v5862_v10 = vmax.f32 %v2366_v50, %v2367_v42  ;;  %v3224_v34 = vmax.f32 %v3222_v7, %v3223_v38  ;;  %v3244_v37 = vrot.slane %v3243_v5, 4  ;;  %v507_v54 = vrot.slane %v333_v43, 6 }
 0x222   :  { %v3231_v60 = vmax.f32 %v3229_v57, %v3230_v49  ;;  %v3238_v17 = vmax.f32 %v3236_v24, %v3237_v15  ;;  %v1440_v56 = vsel %vm823_vm0, %v333_v43, -inf  ;;  %v1447_v12 = vsel %vm823_vm0, %v505_v40, -inf }
 0x223   :  { %v3225_v44 = vrot.slane %v3224_v34, 2  ;;  %v3245_v51 = vmax.f32 %v3243_v5, %v3244_v37  ;;  %v1441_v26 = vrot.slane %v1440_v56, 4  ;;  %v1448_v53 = vrot.slane %v1447_v12, 4 }
 0x224   :  { %v3232_v1 = vrot.slane %v3231_v60, 2  ;;  %v3239_v52 = vrot.slane %v3238_v17, 2  ;;  %v1454_v13 = vsel %vm823_vm0, %v506_v47, -inf  ;;  %v1461_v43 = vsel %vm823_vm0, %v507_v54, -inf }
 0x225   :  { %v3226_v50 = vmax.f32 %v3224_v34, %v3225_v44  ;;  %v3246_v42 = vrot.slane %v3245_v51, 2  ;;  %v1442_v38 = vmax.f32 %v1440_v56, %v1441_v26  ;;  %v1455_v7 = vrot.slane %v1454_v13, 4 }
 0x226   :  { %v3233_v57 = vmax.f32 %v3231_v60, %v3232_v1  ;;  %v3240_v24 = vmax.f32 %v3238_v17, %v3239_v52  ;;  %v1449_v49 = vmax.f32 %v1447_v12, %v1448_v53  ;;  %v1462_v14 = vrot.slane %v1461_v43, 4 }
 0x227   :  { %v3227_v15 = vrot.slane %v3226_v50, 1  ;;  %v3247_v5 = vmax.f32 %v3245_v51, %v3246_v42  ;;  %v1443_v37 = vrot.slane %v1442_v38, 2  ;;  %v1456_v16 = vmax.f32 %v1454_v13, %v1455_v7 }
 0x228   :  { %v3234_v40 = vrot.slane %v3233_v57, 1  ;;  %v3241_v62 = vrot.slane %v3240_v24, 1  ;;  %v1450_v0 = vrot.slane %v1449_v49, 2  ;;  %v1463_v53 = vmax.f32 %v1461_v43, %v1462_v14 }
 0x229   :  { %v3248_v34 = vrot.slane %v3247_v5, 1  ;;  %v1444_v44 = vmax.f32 %v1442_v38, %v1443_v37  ;;  %v1457_v56 = vrot.slane %v1456_v16, 2  ;;  %v5869_v26 = vmax.f32 %v3226_v50, %v3227_v15 }
 0x22a   :  { %v5871_v60 = vmax.f32 %v3233_v57, %v3234_v40  ;;  %v1451_v52 = vmax.f32 %v1449_v49, %v1450_v0  ;;  %v5873_v12 = vmax.f32 %v3240_v24, %v3241_v62  ;;  %v1464_v13 = vrot.slane %v1463_v53, 2 }
 0x22b   :  { %7448 = vst [vmem:[#allocation126_spill] sm:$0xff] %v5869_v26  ;;  %v5875_v51 = vmax.f32 %v3247_v5, %v3248_v34  ;;  %v1445_v17 = vrot.slane %v1444_v44, 1  ;;  %v1458_v1 = vmax.f32 %v1456_v16, %v1457_v56  ;;  %v7452_v42 = vrot.slane %v5615_v30, 1  ;;  %v7581_v26 = vld [vmem:[#allocation49_spill] sm:$0xff] }
 0x22c   :  { %7449 = vst [vmem:[#allocation127_spill] sm:$0xff] %v5871_v60  ;;  %v1452_v54 = vrot.slane %v1451_v52, 1  ;;  %v7453_v38 = vrot.slane %v5641_v58, 2  ;;  %v1317_v62 = vrot.slane %v5647_v39, 2  ;;  %v7454_v14 = vrot.slane %v5634_v21, 4 }
 0x22d   :  { %7450 = vst [vmem:[#allocation128_spill] sm:$0xff] %v5873_v12  ;;  %v1299_v7 = vmax.f32 %v5615_v30, %v7452_v42  ;;  %v5883_v57 = vmax.f32 %v1444_v44, %v1445_v17  ;;  %v1459_v0 = vrot.slane %v1458_v1, 1  ;;  %v5889_v16 = vmax.f32 %v1463_v53, %v1464_v13  ;;  %v290_v44 = vpop.f32.mrf.mxu3 }
 0x22e   :  { %7451 = vst [vmem:[#allocation129_spill] sm:$0xff] %v5875_v51  ;;  %v1311_v50 = vmax.f32 %v5641_v58, %v7453_v38  ;;  %v1323_v24 = vmax.f32 %v5634_v21, %v7454_v14  ;;  %v7455_v49 = vrot.slane %v5650_v31, 1  ;;  %v7456_v15 = vrot.slane %v5707_v22, 1 }
 0x22f   :  { %v5897_v5 = vmax.f32 %v1451_v52, %v1452_v54  ;;  %v5899_v37 = vmax.f32 %v1458_v1, %v1459_v0  ;;  %v1318_v40 = vmax.f32 %v5647_v39, %v1317_v62  ;;  %v7458_v52 = vrot.slane %v5753_v9, 2  ;;  %v188_v54 = vpop.f32.mrf.mxu0 }
 0x230   :  { %v1306_v43 = vmax.f32 %v5650_v31, %v7455_v49  ;;  %v1312_v30 = vrot.slane %v1311_v50, 1  ;;  %v1355_v58 = vmax.f32 %v5707_v22, %v7456_v15  ;;  %v1324_v34 = vrot.slane %v1323_v24, 2 }
 0x231   :  { %v7457_v31 = vrot.slane %v5764_v18, 1  ;;  %v1319_v13 = vrot.slane %v1318_v40, 1  ;;  %v1367_v1 = vmax.f32 %v5753_v9, %v7458_v52  ;;  %v1373_v39 = vrot.slane %v5760_v19, 2 }
 0x232   :  { %v1313_v53 = vmax.f32 %v1311_v50, %v1312_v30  ;;  %v1325_v22 = vmax.f32 %v1323_v24, %v1324_v34  ;;  %v7459_v42 = vrot.slane %v5751_v36, 4  ;;  %v2650_v50 = vmax.f32 %v5636_v29, %v5714_v55 }
 0x233   :  { %v1362_v17 = vmax.f32 %v5764_v18, %v7457_v31  ;;  %v2651_v0 = vmax.f32 %v1299_v7, %v1355_v58  ;;  %v1320_v14 = vmax.f32 %v1318_v40, %v1319_v13  ;;  %v1368_v49 = vrot.slane %v1367_v1, 1 }
 0x234   :  { %v1379_v38 = vmax.f32 %v5751_v36, %v7459_v42  ;;  %v1326_v18 = vrot.slane %v1325_v22, 1  ;;  %v1374_v24 = vmax.f32 %v5760_v19, %v1373_v39  ;;  %v7460_v9 = vmax.f32 %v5620_v63, %v5710_v48 }
 0x235   :  { %v2652_v62 = vmax.f32 %v1306_v43, %v1362_v17  ;;  %v7461_v15 = vmax.f32 %v5622_v11, %v5712_v41  ;;  %v288_v36 = vadd.f32 %v5808_v8, %v287_v59  ;;  %v189_v29 = vadd.f32 %v5808_v8, %v188_v54 }
 0x236   :  { %v1380_v30 = vrot.slane %v1379_v38, 2  ;;  %v1327_v55 = vmax.f32 %v1325_v22, %v1326_v18  ;;  %v1369_v7 = vmax.f32 %v1367_v1, %v1368_v49  ;;  %v1375_v43 = vrot.slane %v1374_v24, 1 }
 0x237   :  { %v2929_v34 = vsel %vm2894_vm1, %v7461_v15, %v7460_v9  ;;  %v367_v31 = vmax.f32 %v288_v36, 0.0  ;;  %v334_v17 = vmax.f32 %v189_v29, 0.0  ;;  %v291_v41 = vadd.f32 %v5808_v8, %v290_v44 }
 0x238   :  { %v2930_v58 = vsel %vm2896_vm2, %v2650_v50, %v2929_v34  ;;  %v1381_v40 = vmax.f32 %v1379_v38, %v1380_v30  ;;  %v1376_v63 = vmax.f32 %v1374_v24, %v1375_v43  ;;  %v2653_v48 = vmax.f32 %v1313_v53, %v1369_v7  ;;  %v293_v38 = vpop.f32.mrf.mxu3 }
 0x239   :  { %v2931_v19 = vsel %vm2898_vm3, %v2651_v0, %v2930_v58  ;;  %v607_v59 = vrot.slane %v367_v31, 2  ;;  %v608_v52 = vrot.slane %v367_v31, 4  ;;  %v609_v39 = vrot.slane %v367_v31, 6 }
 0x23a   :  { %v2932_v11 = vsel %vm2900_vm4, %v2652_v62, %v2931_v19  ;;  %v1382_v13 = vrot.slane %v1381_v40, 1  ;;  %v2654_v22 = vmax.f32 %v1320_v14, %v1376_v63  ;;  %v2392_v54 = vsel %vm823_vm0, %v367_v31, -inf }
 0x23b   :  { %v2933_v1 = vsel %vm2902_vm5, %v2653_v48, %v2932_v11  ;;  %v508_v42 = vrot.slane %v334_v17, 2  ;;  %v2393_v0 = vrot.slane %v2392_v54, 4  ;;  %v2399_v18 = vsel %vm823_vm0, %v607_v59, -inf }
 0x23c   :  { %v1383_v50 = vmax.f32 %v1381_v40, %v1382_v13  ;;  %v2406_v53 = vsel %vm823_vm0, %v608_v52, -inf  ;;  %v2934_v62 = vsel %vm2904_vm6, %v2654_v22, %v2933_v1  ;;  %v2400_v44 = vrot.slane %v2399_v18, 4 }
 0x23d   :  { %v2407_v49 = vrot.slane %v2406_v53, 4  ;;  %v2413_v24 = vsel %vm823_vm0, %v609_v39, -inf  ;;  %v2394_v14 = vmax.f32 %v2392_v54, %v2393_v0  ;;  %v509_v15 = vrot.slane %v334_v17, 4 }
 0x23e   :  { %v2655_v30 = vmax.f32 %v1327_v55, %v1383_v50  ;;  %v2414_v9 = vrot.slane %v2413_v24, 4  ;;  %v2401_v34 = vmax.f32 %v2399_v18, %v2400_v44  ;;  %v510_v29 = vrot.slane %v334_v17, 6 }
 0x23f   :  { %v2408_v36 = vmax.f32 %v2406_v53, %v2407_v49  ;;  %v1468_v7 = vsel %vm823_vm0, %v334_v17, -inf  ;;  %v2395_v58 = vrot.slane %v2394_v14, 2  ;;  %v1475_v48 = vsel %vm823_vm0, %v508_v42, -inf }
 0x240   :  { %v2935_v43 = vsel %vm2906_vm7, %v2655_v30, %v2934_v62  ;;  %v2415_v40 = vmax.f32 %v2413_v24, %v2414_v9  ;;  %v1469_v19 = vrot.slane %v1468_v7, 4  ;;  %v2402_v31 = vrot.slane %v2401_v34, 2  ;;  %v296_v49 = vpop.f32.mrf.mxu3  ;;  %v3049_v24 = vpop.f32.mrf.mxu1 }
 0x241   :  { %3057 = vmatmul.f32.gmra.mxu1 %v2935_v43  ;;  %v2409_v63 = vrot.slane %v2408_v36, 2  ;;  %v1482_v55 = vsel %vm823_vm0, %v509_v15, -inf  ;;  %v2396_v11 = vmax.f32 %v2394_v14, %v2395_v58  ;;  %v1476_v52 = vrot.slane %v1475_v48, 4 }
 0x242   :  { %v2416_v13 = vrot.slane %v2415_v40, 2  ;;  %v1470_v59 = vmax.f32 %v1468_v7, %v1469_v19  ;;  %v2403_v39 = vmax.f32 %v2401_v34, %v2402_v31  ;;  %v1483_v1 = vrot.slane %v1482_v55, 4 }
 0x243   :  { %v2410_v22 = vmax.f32 %v2408_v36, %v2409_v63  ;;  %v5942_v17 = vsel %vm823_vm0, %v510_v29, -inf  ;;  %v2397_v54 = vrot.slane %v2396_v11, 1  ;;  %v5946_v18 = vmax.f32 %v1475_v48, %v1476_v52 }
 0x244   :  { %v5944_v50 = vmax.f32 %v2415_v40, %v2416_v13  ;;  %v1471_v0 = vrot.slane %v1470_v59, 2  ;;  %v2404_v53 = vrot.slane %v2403_v39, 1  ;;  %v5950_v44 = vmax.f32 %v1482_v55, %v1483_v1 }
 0x245   :  { %v2411_v62 = vrot.slane %v2410_v22, 1  ;;  %v5952_v30 = vmax.f32 %v2396_v11, %v2397_v54  ;;  %v368_v29 = vmax.f32 %v291_v41, 0.0  ;;  %v294_v7 = vadd.f32 %v5808_v8, %v293_v38 }
 0x246   :  { %v5955_v9 = vmax.f32 %v1470_v59, %v1471_v0  ;;  %v5958_v34 = vmax.f32 %v2403_v39, %v2404_v53  ;;  %v297_v40 = vadd.f32 %v5808_v8, %v296_v49  ;;  %v3050_v19 = vadd.f32 %v5802_v35, %v3049_v24 }
 0x247   :  { %7462 = vst [vmem:[#allocation130_spill] sm:$0xff] %v5952_v30  ;;  %v5962_v43 = vmax.f32 %v2410_v22, %v2411_v62  ;;  %v610_v31 = vrot.slane %v368_v29, 2  ;;  %v611_v63 = vrot.slane %v368_v29, 4  ;;  %v612_v48 = vrot.slane %v368_v29, 6 }
 0x248   :  { %v2420_v55 = vsel %vm823_vm0, %v368_v29, -inf  ;;  %v369_v13 = vmax.f32 %v294_v7, 0.0  ;;  %v370_v59 = vmax.f32 %v297_v40, 0.0  ;;  %v7463_v41 = vrot.slane %v5793_v45, 1 }
 0x249   :  { %v2421_v11 = vrot.slane %v2420_v55, 4  ;;  %v2427_v52 = vsel %vm823_vm0, %v610_v31, -inf  ;;  %v2434_v39 = vsel %vm823_vm0, %v611_v63, -inf  ;;  %v5976_v22 = vsel %vm823_vm0, %v612_v48, -inf }
 0x24a   :  { %v5971_v38 = vmax.f32 %v5793_v45, %v7463_v41  ;;  %v5978_v35 = vmax.f32 %v3050_v19, 0.0  ;;  %v2428_v54 = vrot.slane %v2427_v52, 4  ;;  %v2435_v0 = vrot.slane %v2434_v39, 4 }
 0x24b   :  { %v2422_v1 = vmax.f32 %v2420_v55, %v2421_v11  ;;  %v7464_v53 = vrot.slane %v5845_v3, 1  ;;  %v613_v49 = vrot.slane %v369_v13, 2  ;;  %v614_v45 = vrot.slane %v369_v13, 4 }
 0x24c   :  { %v615_v24 = vrot.slane %v369_v13, 6  ;;  %v2448_v29 = vsel %vm823_vm0, %v369_v13, -inf  ;;  %v5986_v40 = vmax.f32 %v2427_v52, %v2428_v54  ;;  %v616_v11 = vrot.slane %v370_v59, 2 }
 0x24d   :  { %v5983_v62 = vmax.f32 %v5845_v3, %v7464_v53  ;;  %v2423_v7 = vrot.slane %v2422_v1, 2  ;;  %v2449_v19 = vrot.slane %v2448_v29, 4  ;;  %v2455_v63 = vsel %vm823_vm0, %v613_v49, -inf }
 0x24e   :  { %v2462_v48 = vsel %vm823_vm0, %v614_v45, -inf  ;;  %v2469_v55 = vsel %vm823_vm0, %v615_v24, -inf  ;;  %v5994_v41 = vmax.f32 %v2434_v39, %v2435_v0  ;;  %v2456_v14 = vrot.slane %v2455_v63, 4 }
 0x24f   :  { %v5992_v3 = vmax.f32 %v2422_v1, %v2423_v7  ;;  %v2450_v53 = vmax.f32 %v2448_v29, %v2449_v19  ;;  %v2463_v52 = vrot.slane %v2462_v48, 4  ;;  %v2470_v54 = vrot.slane %v2469_v55, 4 }
 0x250   :  { %v617_v47 = vrot.slane %v370_v59, 4  ;;  %v2457_v42 = vmax.f32 %v2455_v63, %v2456_v14  ;;  %v618_v56 = vrot.slane %v370_v59, 6  ;;  %v2476_v49 = vsel %vm823_vm0, %v370_v59, -inf }
 0x251   :  { %v2451_v31 = vrot.slane %v2450_v53, 2  ;;  %v2464_v45 = vmax.f32 %v2462_v48, %v2463_v52  ;;  %v2471_v15 = vmax.f32 %v2469_v55, %v2470_v54  ;;  %v2477_v24 = vrot.slane %v2476_v49, 4 }
 0x252   :  { %v2483_v1 = vsel %vm823_vm0, %v616_v11, -inf  ;;  %v2458_v39 = vrot.slane %v2457_v42, 2  ;;  %v2490_v29 = vsel %vm823_vm0, %v617_v47, -inf  ;;  %v6003_v59 = vsel %vm823_vm0, %v618_v56, -inf }
 0x253   :  { %v2452_v7 = vmax.f32 %v2450_v53, %v2451_v31  ;;  %v2484_v0 = vrot.slane %v2483_v1, 4  ;;  %v2465_v19 = vrot.slane %v2464_v45, 2  ;;  %v2472_v13 = vrot.slane %v2471_v15, 2 }
 0x254   :  { %v2478_v36 = vmax.f32 %v2476_v49, %v2477_v24  ;;  %v2491_v58 = vrot.slane %v2490_v29, 4  ;;  %v2459_v51 = vmax.f32 %v2457_v42, %v2458_v39  ;;  %v3129_v56 = vrot.slane %v5978_v35, 2 }
 0x255   :  { %v2453_v21 = vrot.slane %v2452_v7, 1  ;;  %v6000_v14 = vmax.f32 %v2483_v1, %v2484_v0  ;;  %v2466_v48 = vmax.f32 %v2464_v45, %v2465_v19  ;;  %v6006_v55 = vmax.f32 %v2471_v15, %v2472_v13 }
 0x256   :  { %v2479_v31 = vrot.slane %v2478_v36, 2  ;;  %v2460_v47 = vrot.slane %v2459_v51, 1  ;;  %v6011_v52 = vmax.f32 %v2490_v29, %v2491_v58  ;;  %v3130_v13 = vrot.slane %v5978_v35, 4 }
 0x257   :  { %v6008_v11 = vmax.f32 %v2452_v7, %v2453_v21  ;;  %v2467_v54 = vrot.slane %v2466_v48, 1  ;;  %v3131_v21 = vrot.slane %v5978_v35, 6  ;;  %v3257_v1 = vsel %vm823_vm0, %v3129_v56, -inf }
 0x258   :  { %v6013_v42 = vmax.f32 %v2478_v36, %v2479_v31  ;;  %v6017_v24 = vmax.f32 %v2459_v51, %v2460_v47  ;;  %v3250_v36 = vsel %vm823_vm0, %v5978_v35, -inf  ;;  %v3258_v39 = vrot.slane %v3257_v1, 4 }
 0x259   :  { %7465 = vst [vmem:[#allocation131_spill] sm:$0xff] %v6008_v11  ;;  %v6022_v45 = vmax.f32 %v2466_v48, %v2467_v54  ;;  %v3251_v51 = vrot.slane %v3250_v36, 4  ;;  %v3264_v0 = vsel %vm823_vm0, %v3130_v13, -inf  ;;  %v3271_v19 = vsel %vm823_vm0, %v3131_v21, -inf }
 0x25a   :  { %7466 = vst [vmem:[#allocation132_spill] sm:$0xff] %v6017_v24  ;;  %v3265_v29 = vrot.slane %v3264_v0, 4  ;;  %v7467_v48 = vrot.slane %v5837_v46, 2  ;;  %v1429_v47 = vrot.slane %v5842_v32, 2  ;;  %v3259_v58 = vmax.f32 %v3257_v1, %v3258_v39 }
 0x25b   :  { %v3252_v54 = vmax.f32 %v3250_v36, %v3251_v51  ;;  %v3272_v35 = vrot.slane %v3271_v19, 4  ;;  %v7468_v56 = vrot.slane %v5833_v2, 4  ;;  %v7469_v1 = vrot.slane %v5889_v16, 1 }
 0x25c   :  { %v1423_v31 = vmax.f32 %v5837_v46, %v7467_v48  ;;  %v3266_v13 = vmax.f32 %v3264_v0, %v3265_v29  ;;  %v1430_v21 = vmax.f32 %v5842_v32, %v1429_v47  ;;  %v3260_v63 = vrot.slane %v3259_v58, 2 }
 0x25d   :  { %v1435_v49 = vmax.f32 %v5833_v2, %v7468_v56  ;;  %v3253_v15 = vrot.slane %v3252_v54, 2  ;;  %v3273_v12 = vmax.f32 %v3271_v19, %v3272_v35  ;;  %v1467_v51 = vmax.f32 %v5889_v16, %v7469_v1 }
 0x25e   :  { %v1424_v7 = vrot.slane %v1423_v31, 1  ;;  %v3267_v48 = vrot.slane %v3266_v13, 2  ;;  %v1431_v36 = vrot.slane %v1430_v21, 1  ;;  %v3261_v2 = vmax.f32 %v3259_v58, %v3260_v63 }
 0x25f   :  { %v1436_v46 = vrot.slane %v1435_v49, 2  ;;  %v3254_v39 = vmax.f32 %v3252_v54, %v3253_v15  ;;  %v3274_v56 = vrot.slane %v3273_v12, 2  ;;  %v7470_v0 = vrot.slane %v5955_v9, 1 }
 0x260   :  { %v1425_v11 = vmax.f32 %v1423_v31, %v1424_v7  ;;  %v3268_v53 = vmax.f32 %v3266_v13, %v3267_v48  ;;  %v7471_v29 = vrot.slane %v5946_v18, 2  ;;  %v1485_v7 = vrot.slane %v5950_v44, 2 }
 0x261   :  { %v1437_v30 = vmax.f32 %v1435_v49, %v1436_v46  ;;  %v1474_v32 = vmax.f32 %v5955_v9, %v7470_v0  ;;  %v3255_v31 = vrot.slane %v3254_v39, 1  ;;  %v3262_v47 = vrot.slane %v3261_v2, 1 }
 0x262   :  { %v1479_v19 = vmax.f32 %v5946_v18, %v7471_v29  ;;  %v3275_v35 = vmax.f32 %v3273_v12, %v3274_v56  ;;  %v3269_v16 = vrot.slane %v3268_v53, 1  ;;  %v1486_v63 = vmax.f32 %v5950_v44, %v1485_v7 }
 0x263   :  { %v1438_v24 = vrot.slane %v1437_v30, 1  ;;  %v7472_v49 = vrot.slane %v5942_v17, 4  ;;  %v6056_v54 = vmax.f32 %v3254_v39, %v3255_v31  ;;  %v6058_v9 = vmax.f32 %v3261_v2, %v3262_v47 }
 0x264   :  { %v1480_v15 = vrot.slane %v1479_v19, 1  ;;  %v3276_v13 = vrot.slane %v3275_v35, 1  ;;  %v1432_v18 = vmax.f32 %v1430_v21, %v1431_v36  ;;  %v1487_v1 = vrot.slane %v1486_v63, 1 }
 0x265   :  { %v1491_v58 = vmax.f32 %v5942_v17, %v7472_v49  ;;  %7473 = vst [vmem:[#allocation133_spill] sm:$0xff] %v6056_v54  ;;  %v1439_v46 = vmax.f32 %v1437_v30, %v1438_v24  ;;  %v6060_v12 = vmax.f32 %v3268_v53, %v3269_v16  ;;  %v2658_v17 = vmax.f32 %v5814_v28, %v5899_v37  ;;  %v299_v24 = vpop.f32.mrf.mxu3 }
 0x266   :  { %7474 = vst [vmem:[#allocation134_spill] sm:$0xff] %v6058_v9  ;;  %v1481_v48 = vmax.f32 %v1479_v19, %v1480_v15  ;;  %v6062_v56 = vmax.f32 %v3275_v35, %v3276_v13  ;;  %v1488_v2 = vmax.f32 %v1486_v63, %v1487_v1  ;;  %v2660_v30 = vmax.f32 %v5983_v62, %v1474_v32  ;;  %v7482_v15 = vld [vmem:[#allocation48_spill] sm:$0xff] }
 0x267   :  { %v1492_v0 = vrot.slane %v1491_v58, 2  ;;  %7475 = vst [vmem:[#allocation135_spill] sm:$0xff] %v6060_v12  ;;  %v2659_v21 = vmax.f32 %v5971_v38, %v1467_v51  ;;  %v7477_v36 = vmax.f32 %v5797_v20, %v5883_v57  ;;  %v7478_v19 = vmax.f32 %v5811_v6, %v5897_v5 }
 0x268   :  { %7476 = vst [vmem:[#allocation136_spill] sm:$0xff] %v6062_v56  ;;  %v2661_v53 = vmax.f32 %v1425_v11, %v1481_v48  ;;  %v300_v28 = vadd.f32 %v5808_v8, %v299_v24  ;;  %v2662_v31 = vmax.f32 %v1432_v18, %v1488_v2  ;;  %v7479_v62 = vrot.slane %v5103_v4, 1 }
 0x269   :  { %v1493_v29 = vmax.f32 %v1491_v58, %v1492_v0  ;;  %v2936_v7 = vsel %vm2894_vm1, %v7478_v19, %v7477_v36  ;;  %v7480_v20 = vrot.slane %v5155_v33, 1  ;;  %v7481_v57 = vrot.slane %v5142_v61, 2 }
 0x26a   :  { %v2937_v47 = vsel %vm2896_vm2, %v2658_v17, %v2936_v7  ;;  %v6084_v32 = vmax.f32 %v5103_v4, %v7479_v62  ;;  %v371_v11 = vmax.f32 %v300_v28, 0.0  ;;  %v1541_v16 = vrot.slane %v5148_v27, 2  ;;  %v7484_v7 = vld [vmem:[#allocation55_spill] sm:$0xff] }
 0x26b   :  { %v1494_v37 = vrot.slane %v1493_v29, 1  ;;  %v2938_v38 = vsel %vm2898_vm3, %v2659_v21, %v2937_v47  ;;  %v6090_v6 = vmax.f32 %v5155_v33, %v7480_v20  ;;  %v1535_v5 = vmax.f32 %v5142_v61, %v7481_v57 }
 0x26c   :  { %v2939_v35 = vsel %vm2900_vm4, %v2660_v30, %v2938_v38  ;;  %v7483_v4 = vrot.slane %v7482_v15, 4  ;;  %v619_v58 = vrot.slane %v371_v11, 2  ;;  %v620_v13 = vrot.slane %v371_v11, 4 }
 0x26d   :  { %v1495_v51 = vmax.f32 %v1493_v29, %v1494_v37  ;;  %v2940_v49 = vsel %vm2902_vm5, %v2661_v53, %v2939_v35  ;;  %v621_v18 = vrot.slane %v371_v11, 6  ;;  %v2504_v1 = vsel %vm823_vm0, %v371_v11, -inf }
 0x26e   :  { %v1547_v63 = vmax.f32 %v7482_v15, %v7483_v4  ;;  %v2941_v48 = vsel %vm2904_vm6, %v2662_v31, %v2940_v49  ;;  %v1536_v61 = vrot.slane %v1535_v5, 1  ;;  %v2505_v0 = vrot.slane %v2504_v1, 4 }
 0x26f   :  { %v2663_v33 = vmax.f32 %v1439_v46, %v1495_v51  ;;  %v2511_v17 = vsel %vm823_vm0, %v619_v58, -inf  ;;  %v2518_v2 = vsel %vm823_vm0, %v620_v13, -inf  ;;  %v2525_v29 = vsel %vm823_vm0, %v621_v18, -inf  ;;  %v7486_v51 = vld [vmem:[#allocation65_spill] sm:$0xff] }
 0x270   :  { %v2512_v24 = vrot.slane %v2511_v17, 4  ;;  %v2519_v21 = vrot.slane %v2518_v2, 4  ;;  %v2526_v53 = vrot.slane %v2525_v29, 4  ;;  %v2506_v36 = vmax.f32 %v2504_v1, %v2505_v0 }
 0x271   :  { %v2942_v30 = vsel %vm2906_vm7, %v2663_v33, %v2941_v48  ;;  %v1542_v46 = vmax.f32 %v5148_v27, %v1541_v16  ;;  %v1548_v19 = vrot.slane %v1547_v63, 2  ;;  %v7485_v28 = vrot.slane %v7484_v7, 1  ;;  %v7488_v27 = vld [vmem:[#allocation67_spill] sm:$0xff]  ;;  %v7489_v33 = vld [vmem:[#allocation68_spill] sm:$0xff] }
 0x272   :  { %3060 = vmatmul.f32.gmra.mxu1 %v2942_v30  ;;  %v2513_v31 = vmax.f32 %v2511_v17, %v2512_v24  ;;  %v2520_v47 = vmax.f32 %v2518_v2, %v2519_v21  ;;  %v2527_v62 = vmax.f32 %v2525_v29, %v2526_v53  ;;  %v1537_v38 = vmax.f32 %v1535_v5, %v1536_v61  ;;  %v7491_v24 = vld [vmem:[#allocation66_spill] sm:$0xff] }
 0x273   :  { %v1579_v37 = vmax.f32 %v7484_v7, %v7485_v28  ;;  %v2507_v11 = vrot.slane %v2506_v36, 2  ;;  %v1543_v20 = vrot.slane %v1542_v46, 1  ;;  %v1549_v57 = vmax.f32 %v1547_v63, %v1548_v19 }
 0x274   :  { %v7487_v35 = vrot.slane %v7486_v51, 2  ;;  %v2514_v4 = vrot.slane %v2513_v31, 2  ;;  %v2521_v49 = vrot.slane %v2520_v47, 2  ;;  %v2528_v58 = vrot.slane %v2527_v62, 2 }
 0x275   :  { %v1597_v16 = vrot.slane %v7488_v27, 2  ;;  %v2508_v13 = vmax.f32 %v2506_v36, %v2507_v11  ;;  %v1550_v18 = vrot.slane %v1549_v57, 1  ;;  %v7490_v48 = vrot.slane %v7489_v33, 1 }
 0x276   :  { %v1591_v15 = vmax.f32 %v7486_v51, %v7487_v35  ;;  %v2515_v5 = vmax.f32 %v2513_v31, %v2514_v4  ;;  %v2522_v61 = vmax.f32 %v2520_v47, %v2521_v49  ;;  %v6118_v17 = vmax.f32 %v2527_v62, %v2528_v58  ;;  %v7493_v31 = vld [vmem:[#allocation60_spill] sm:$0xff]  ;;  %v7494_v47 = vld [vmem:[#allocation47_spill] sm:$0xff]  ;;  %v302_v49 = vpop.f32.mrf.mxu3 }
 0x277   :  { %v1586_v1 = vmax.f32 %v7489_v33, %v7490_v48  ;;  %v1598_v63 = vmax.f32 %v7488_v27, %v1597_v16  ;;  %v2509_v2 = vrot.slane %v2508_v13, 1  ;;  %v1544_v29 = vmax.f32 %v1542_v46, %v1543_v20  ;;  %v7496_v16 = vld [vmem:[#allocation58_spill] sm:$0xff]  ;;  %v7498_v33 = vld [vmem:[#allocation45_spill] sm:$0xff]  ;;  %v7499_v48 = vld [vmem:[#allocation59_spill] sm:$0xff] }
 0x278   :  { %v1592_v0 = vrot.slane %v1591_v15, 1  ;;  %v7492_v21 = vrot.slane %v7491_v24, 4  ;;  %v2516_v36 = vrot.slane %v2515_v5, 1  ;;  %v2523_v19 = vrot.slane %v2522_v61, 1 }
 0x279   :  { %v1551_v7 = vmax.f32 %v1549_v57, %v1550_v18  ;;  %v1599_v28 = vrot.slane %v1598_v63, 1  ;;  %v2666_v62 = vmax.f32 %v7494_v47, %v7493_v31  ;;  %v2667_v35 = vmax.f32 %v6084_v32, %v1579_v37  ;;  %v7495_v57 = vld [vmem:[#allocation44_spill] sm:$0xff] }
 0x27a   :  { %v1593_v30 = vmax.f32 %v1591_v15, %v1592_v0  ;;  %v1603_v53 = vmax.f32 %v7491_v24, %v7492_v21  ;;  %v6128_v4 = vmax.f32 %v2508_v13, %v2509_v2  ;;  %v6130_v46 = vmax.f32 %v2515_v5, %v2516_v36 }
 0x27b   :  { %v1600_v20 = vmax.f32 %v1598_v63, %v1599_v28  ;;  %v2668_v15 = vmax.f32 %v6090_v6, %v1586_v1  ;;  %v7497_v18 = vmax.f32 %v7495_v57, %v7496_v16  ;;  %v7500_v0 = vmax.f32 %v7498_v33, %v7499_v48 }
 0x27c   :  { %v1604_v51 = vrot.slane %v1603_v53, 2  ;;  %v2669_v27 = vmax.f32 %v1537_v38, %v1593_v30  ;;  %v303_v32 = vadd.f32 %v5808_v8, %v302_v49  ;;  %v6141_v37 = vmax.f32 %v2522_v61, %v2523_v19  ;;  %v7503_v61 = vld [vmem:[#allocation90_spill] sm:$0xff]  ;;  %v7505_v19 = vld [vmem:[#allocation89_spill] sm:$0xff] }
 0x27d   :  { %v2943_v24 = vsel %vm2894_vm1, %v7500_v0, %v7497_v18  ;;  %v2670_v13 = vmax.f32 %v1544_v29, %v1600_v20  ;;  %v7501_v6 = vrot.slane %v5421_v25, 1  ;;  %v7502_v30 = vrot.slane %v5473_v23, 2 }
 0x27e   :  { %v1605_v58 = vmax.f32 %v1603_v53, %v1604_v51  ;;  %v2944_v5 = vsel %vm2896_vm2, %v2666_v62, %v2943_v24  ;;  %v372_v2 = vmax.f32 %v303_v32, 0.0  ;;  %v7504_v36 = vrot.slane %v7503_v61, 1  ;;  %v7506_v51 = vld [vmem:[#allocation88_spill] sm:$0xff] }
 0x27f   :  { %v6147_v1 = vmax.f32 %v5421_v25, %v7501_v6  ;;  %v2945_v63 = vsel %vm2898_vm3, %v2667_v35, %v2944_v5  ;;  %v1647_v21 = vmax.f32 %v5473_v23, %v7502_v30  ;;  %v1653_v28 = vrot.slane %v7505_v19, 2 }
 0x280   :  { %v1606_v38 = vrot.slane %v1605_v58, 1  ;;  %v2946_v53 = vsel %vm2900_vm4, %v2668_v15, %v2945_v63  ;;  %v1642_v29 = vmax.f32 %v7503_v61, %v7504_v36  ;;  %v7507_v31 = vrot.slane %v7506_v51, 4 }
 0x281   :  { %v2947_v62 = vsel %vm2902_vm5, %v2669_v27, %v2946_v53  ;;  %v622_v35 = vrot.slane %v372_v2, 2  ;;  %v623_v20 = vrot.slane %v372_v2, 4  ;;  %v624_v23 = vrot.slane %v372_v2, 6  ;;  %v7508_v27 = vld [vmem:[#allocation5_spill] sm:$0xff]  ;;  %v7510_v53 = vld [vmem:[#allocation12_spill] sm:$0xff] }
 0x282   :  { %v1659_v25 = vmax.f32 %v7506_v51, %v7507_v31  ;;  %v1607_v47 = vmax.f32 %v1605_v58, %v1606_v38  ;;  %v2948_v49 = vsel %vm2904_vm6, %v2670_v13, %v2947_v62  ;;  %v2532_v15 = vsel %vm823_vm0, %v372_v2, -inf }
 0x283   :  { %v1648_v57 = vrot.slane %v1647_v21, 1  ;;  %v2533_v18 = vrot.slane %v2532_v15, 4  ;;  %v2539_v33 = vsel %vm823_vm0, %v622_v35, -inf  ;;  %v2546_v48 = vsel %vm823_vm0, %v623_v20, -inf  ;;  %v7514_v20 = vld [vmem:[#allocation11_spill] sm:$0xff] }
 0x284   :  { %v2671_v16 = vmax.f32 %v1551_v7, %v1607_v47  ;;  %v2540_v0 = vrot.slane %v2539_v33, 4  ;;  %v2547_v24 = vrot.slane %v2546_v48, 4  ;;  %v6167_v58 = vsel %vm823_vm0, %v624_v23, -inf  ;;  %v7512_v47 = vld [vmem:[#allocation10_spill] sm:$0xff] }
 0x285   :  { %v7509_v32 = vrot.slane %v7508_v27, 1  ;;  %v2534_v6 = vmax.f32 %v2532_v15, %v2533_v18  ;;  %v1649_v38 = vmax.f32 %v1647_v21, %v1648_v57  ;;  %v1654_v7 = vmax.f32 %v7505_v19, %v1653_v28  ;;  %v7515_v28 = vld [vmem:[#allocation9_spill] sm:$0xff]  ;;  %v7517_v57 = vld [vmem:[#allocation8_spill] sm:$0xff] }
 0x286   :  { %v2949_v13 = vsel %vm2906_vm7, %v2671_v16, %v2948_v49  ;;  %v6174_v63 = vmax.f32 %v2539_v33, %v2540_v0  ;;  %v1660_v30 = vrot.slane %v1659_v25, 2  ;;  %v7511_v61 = vrot.slane %v7510_v53, 1  ;;  %v7518_v16 = vld [vmem:[#allocation83_spill] sm:$0xff] }
 0x287   :  { %v1691_v5 = vmax.f32 %v7508_v27, %v7509_v32  ;;  %3063 = vmatmul.f32.gmra.mxu1 %v2949_v13  ;;  %v2535_v51 = vrot.slane %v2534_v6, 2  ;;  %v1655_v31 = vrot.slane %v1654_v7, 1  ;;  %v7513_v62 = vrot.slane %v7512_v47, 2 }
 0x288   :  { %v1698_v36 = vmax.f32 %v7510_v53, %v7511_v61  ;;  %v1709_v21 = vrot.slane %v7514_v20, 2  ;;  %v6184_v49 = vmax.f32 %v2546_v48, %v2547_v24  ;;  %v1661_v19 = vmax.f32 %v1659_v25, %v1660_v30 }
 0x289   :  { %v1703_v35 = vmax.f32 %v7512_v47, %v7513_v62  ;;  %v7516_v23 = vrot.slane %v7515_v28, 4  ;;  %v2674_v18 = vmax.f32 %v7518_v16, %v7517_v57  ;;  %v6191_v33 = vmax.f32 %v2534_v6, %v2535_v51  ;;  %v7519_v47 = vld [vmem:[#allocation81_spill] sm:$0xff]  ;;  %v7520_v62 = vld [vmem:[#allocation6_spill] sm:$0xff]  ;;  %v7523_v57 = vld [vmem:[#allocation7_spill] sm:$0xff]  ;;  %v305_v16 = vpop.f32.mrf.mxu3 }
 0x28a   :  { %v1710_v32 = vmax.f32 %v7514_v20, %v1709_v21  ;;  %v1662_v13 = vrot.slane %v1661_v19, 1  ;;  %v2675_v48 = vmax.f32 %v6147_v1, %v1691_v5  ;;  %v2676_v24 = vmax.f32 %v1642_v29, %v1698_v36 }
 0x28b   :  { %v1715_v15 = vmax.f32 %v7515_v28, %v7516_v23  ;;  %v1704_v27 = vrot.slane %v1703_v35, 1  ;;  %v1656_v25 = vmax.f32 %v1654_v7, %v1655_v31  ;;  %v7521_v28 = vmax.f32 %v7519_v47, %v7520_v62  ;;  %v7522_v23 = vld [vmem:[#allocation82_spill] sm:$0xff]  ;;  %v7525_v47 = vld [vmem:[#allocation13_spill] sm:$0xff] }
 0x28c   :  { %v1711_v61 = vrot.slane %v1710_v32, 1  ;;  %v7524_v6 = vmax.f32 %v7522_v23, %v7523_v57  ;;  %v306_v1 = vadd.f32 %v5808_v8, %v305_v16  ;;  %v1663_v29 = vmax.f32 %v1661_v19, %v1662_v13  ;;  %v7529_v19 = vld [vmem:[#allocation19_spill] sm:$0xff] }
 0x28d   :  { %v1716_v53 = vrot.slane %v1715_v15, 2  ;;  %v1705_v30 = vmax.f32 %v1703_v35, %v1704_v27  ;;  %v7526_v62 = vrot.slane %v7525_v47, 1  ;;  %v7582_v56 = vrot.slane %v7581_v26, 1 }
 0x28e   :  { %v2950_v51 = vsel %vm2894_vm1, %v7524_v6, %v7521_v28  ;;  %v1712_v5 = vmax.f32 %v1710_v32, %v1711_v61  ;;  %v373_v27 = vmax.f32 %v306_v1, 0.0 }
 0x28f   :  { %v1717_v20 = vmax.f32 %v1715_v15, %v1716_v53  ;;  %v2951_v21 = vsel %vm2896_vm2, %v2674_v18, %v2950_v51  ;;  %v2677_v7 = vmax.f32 %v1649_v38, %v1705_v30  ;;  %v6211_v28 = vmax.f32 %v7525_v47, %v7526_v62  ;;  %v7527_v18 = vld [vmem:[#allocation18_spill] sm:$0xff] }
 0x290   :  { %v2952_v36 = vsel %vm2898_vm3, %v2675_v48, %v2951_v21  ;;  %v2678_v23 = vmax.f32 %v1656_v25, %v1712_v5  ;;  %v7528_v53 = vrot.slane %v7527_v18, 2  ;;  %v1765_v38 = vrot.slane %v7529_v19, 2 }
 0x291   :  { %v1718_v31 = vrot.slane %v1717_v20, 1  ;;  %v2953_v35 = vsel %vm2900_vm4, %v2676_v24, %v2952_v36  ;;  %v625_v13 = vrot.slane %v373_v27, 2  ;;  %v626_v48 = vrot.slane %v373_v27, 4 }
 0x292   :  { %v2954_v15 = vsel %vm2902_vm5, %v2677_v7, %v2953_v35  ;;  %v1759_v8 = vmax.f32 %v7527_v18, %v7528_v53  ;;  %v627_v30 = vrot.slane %v373_v27, 6  ;;  %v2560_v61 = vsel %vm823_vm0, %v373_v27, -inf  ;;  %v7530_v7 = vld [vmem:[#allocation20_spill] sm:$0xff]  ;;  %v7532_v18 = vld [vmem:[#allocation17_spill] sm:$0xff] }
 0x293   :  { %v1719_v32 = vmax.f32 %v1717_v20, %v1718_v31  ;;  %v2955_v24 = vsel %vm2904_vm6, %v2678_v23, %v2954_v15  ;;  %v1766_v6 = vmax.f32 %v7529_v19, %v1765_v38  ;;  %v2561_v51 = vrot.slane %v2560_v61, 4 }
 0x294   :  { %v1760_v57 = vrot.slane %v1759_v8, 1  ;;  %v2567_v16 = vsel %vm823_vm0, %v625_v13, -inf  ;;  %v2574_v21 = vsel %vm823_vm0, %v626_v48, -inf  ;;  %v2581_v20 = vsel %vm823_vm0, %v627_v30, -inf  ;;  %v7534_v13 = vld [vmem:[#allocation21_spill] sm:$0xff] }
 0x295   :  { %v2679_v25 = vmax.f32 %v1663_v29, %v1719_v32  ;;  %v2568_v1 = vrot.slane %v2567_v16, 4  ;;  %v2575_v5 = vrot.slane %v2574_v21, 4  ;;  %v7531_v36 = vrot.slane %v7530_v7, 1 }
 0x296   :  { %v2562_v27 = vmax.f32 %v2560_v61, %v2561_v51  ;;  %v2582_v47 = vrot.slane %v2581_v20, 4  ;;  %v6230_v62 = vmax.f32 %v1759_v8, %v1760_v57  ;;  %v1767_v15 = vrot.slane %v1766_v6, 1  ;;  %v7538_v51 = vld [vmem:[#allocation26_spill] sm:$0xff] }
 0x297   :  { %v6227_v31 = vmax.f32 %v7530_v7, %v7531_v36  ;;  %v2956_v35 = vsel %vm2906_vm7, %v2679_v25, %v2955_v24  ;;  %v2569_v29 = vmax.f32 %v2567_v16, %v2568_v1  ;;  %v2576_v23 = vmax.f32 %v2574_v21, %v2575_v5  ;;  %v7536_v7 = vld [vmem:[#allocation28_spill] sm:$0xff]  ;;  %v7540_v36 = vld [vmem:[#allocation27_spill] sm:$0xff] }
 0x298   :  { %3066 = vmatmul.f32.gmra.mxu1 %v2956_v35  ;;  %v7533_v53 = vrot.slane %v7532_v18, 4  ;;  %v2563_v38 = vrot.slane %v2562_v27, 2  ;;  %v2583_v32 = vmax.f32 %v2581_v20, %v2582_v47  ;;  %v7535_v48 = vrot.slane %v7534_v13, 1  ;;  %v7541_v20 = vld [vmem:[#allocation25_spill] sm:$0xff] }
 0x299   :  { %v7537_v24 = vrot.slane %v7536_v7, 1  ;;  %v2570_v8 = vrot.slane %v2569_v29, 2  ;;  %v2577_v57 = vrot.slane %v2576_v23, 2  ;;  %v7539_v16 = vrot.slane %v7538_v51, 2 }
 0x29a   :  { %v1771_v19 = vmax.f32 %v7532_v18, %v7533_v53  ;;  %v1803_v30 = vmax.f32 %v7534_v13, %v7535_v48  ;;  %v2564_v1 = vmax.f32 %v2562_v27, %v2563_v38  ;;  %v2584_v5 = vrot.slane %v2583_v32, 2 }
 0x29b   :  { %v1810_v61 = vmax.f32 %v7536_v7, %v7537_v24  ;;  %v1815_v21 = vmax.f32 %v7538_v51, %v7539_v16  ;;  %v1821_v35 = vrot.slane %v7540_v36, 2  ;;  %v7542_v47 = vrot.slane %v7541_v20, 4 }
 0x29c   :  { %v1772_v25 = vrot.slane %v1771_v19, 2  ;;  %v2571_v53 = vmax.f32 %v2569_v29, %v2570_v8  ;;  %v2578_v13 = vmax.f32 %v2576_v23, %v2577_v57  ;;  %v2565_v7 = vrot.slane %v2564_v1, 1  ;;  %v308_v57 = vpop.f32.mrf.mxu3 }
 0x29d   :  { %v1827_v18 = vmax.f32 %v7541_v20, %v7542_v47  ;;  %v1816_v44 = vrot.slane %v1815_v21, 1  ;;  %v6248_v24 = vmax.f32 %v2583_v32, %v2584_v5  ;;  %v1822_v2 = vmax.f32 %v7540_v36, %v1821_v35  ;;  %v7545_v32 = vld [vmem:[#allocation16_spill] sm:$0xff]  ;;  %v7549_v47 = vld [vmem:[#allocation15_spill] sm:$0xff] }
 0x29e   :  { %v1773_v48 = vmax.f32 %v1771_v19, %v1772_v25  ;;  %v2572_v39 = vrot.slane %v2571_v53, 1  ;;  %v2579_v51 = vrot.slane %v2578_v13, 1  ;;  %v6251_v16 = vmax.f32 %v2564_v1, %v2565_v7  ;;  %v7544_v19 = vld [vmem:[#allocation24_spill] sm:$0xff]  ;;  %v7547_v1 = vld [vmem:[#allocation22_spill] sm:$0xff] }
 0x29f   :  { %v1828_v0 = vrot.slane %v1827_v18, 2  ;;  %v1817_v38 = vmax.f32 %v1815_v21, %v1816_v44  ;;  %v1768_v11 = vmax.f32 %v1766_v6, %v1767_v15  ;;  %v1823_v9 = vrot.slane %v1822_v2, 1  ;;  %v3052_v21 = vpop.f32.mrf.mxu1  ;;  %v7546_v15 = vld [vmem:[#allocation14_spill] sm:$0xff] }
 0x2a0   :  { %v1774_v27 = vrot.slane %v1773_v48, 1  ;;  %v6253_v20 = vmax.f32 %v2571_v53, %v2572_v39  ;;  %v6255_v29 = vmax.f32 %v2578_v13, %v2579_v51  ;;  %v2682_v8 = vmax.f32 %v7545_v32, %v7544_v19  ;;  %v7554_v32 = vld [vmem:[#allocation36_spill] sm:$0xff] }
 0x2a1   :  { %v1829_v60 = vmax.f32 %v1827_v18, %v1828_v0  ;;  %v1824_v5 = vmax.f32 %v1822_v2, %v1823_v9  ;;  %v2683_v44 = vmax.f32 %v6211_v28, %v1803_v30  ;;  %v2684_v39 = vmax.f32 %v6227_v31, %v1810_v61  ;;  %v7550_v18 = vld [vmem:[#allocation23_spill] sm:$0xff]  ;;  %v4401_v30 = vld [vmem:[%s7115_s2] ss:$0 sm:$0xff]  ;;  %v6282_v61 = vld [vmem:[%s7115_s2 + $0x1] ss:$0 sm:$0xff] }
 0x2a2   :  { %7543 = vst [vmem:[#allocation48_spill] sm:$0xff] %v6253_v20  ;;  %v1775_v25 = vmax.f32 %v1773_v48, %v1774_v27  ;;  %v2685_v0 = vmax.f32 %v6230_v62, %v1817_v38  ;;  %v7548_v35 = vmax.f32 %v7546_v15, %v7547_v1  ;;  %v7551_v53 = vmax.f32 %v7549_v47, %v7550_v18  ;;  %v7558_v1 = vld [vmem:[#allocation35_spill] sm:$0xff]  ;;  %v7630_v20 = vld [vmem:[#allocation96_spill] sm:$0xff] }
 0x2a3   :  { %v1830_v36 = vrot.slane %v1829_v60, 1  ;;  %v2686_v2 = vmax.f32 %v1768_v11, %v1824_v5  ;;  %v309_v48 = vadd.f32 %v4401_v30, %v308_v57  ;;  %v7552_v11 = vld [vmem:[#allocation29_spill] sm:$0xff]  ;;  %v1971_v12 = vmax.f32 %v7581_v26, %v7582_v56 }
 0x2a4   :  { %v2957_v13 = vsel %vm2894_vm1, %v7551_v53, %v7548_v35  ;;  %v7553_v7 = vrot.slane %v7552_v11, 1  ;;  %v1877_v35 = vrot.slane %v7558_v1, 2 }
 0x2a5   :  { %v1831_v9 = vmax.f32 %v1829_v60, %v1830_v36  ;;  %v2958_v28 = vsel %vm2896_vm2, %v2682_v8, %v2957_v13  ;;  %v3053_v60 = vadd.f32 %v6282_v61, %v3052_v21  ;;  %v374_v19 = vmax.f32 %v309_v48, 0.0 }
 0x2a6   :  { %v2959_v62 = vsel %vm2898_vm3, %v2683_v44, %v2958_v28  ;;  %v6288_v51 = vmax.f32 %v7552_v11, %v7553_v7  ;;  %v7555_v8 = vrot.slane %v7554_v32, 1  ;;  %v7556_v44 = vld [vmem:[#allocation34_spill] sm:$0xff]  ;;  %v7559_v7 = vld [vmem:[#allocation31_spill] sm:$0xff] }
 0x2a7   :  { %v2687_v27 = vmax.f32 %v1775_v25, %v1831_v9  ;;  %v2960_v38 = vsel %vm2900_vm4, %v2684_v39, %v2959_v62  ;;  %v3096_v36 = vmax.f32 %v3053_v60, 0.0  ;;  %v7557_v15 = vrot.slane %v7556_v44, 2 }
 0x2a8   :  { %v6294_v57 = vmax.f32 %v7554_v32, %v7555_v8  ;;  %v2961_v5 = vsel %vm2902_vm5, %v2685_v0, %v2960_v38  ;;  %v628_v25 = vrot.slane %v374_v19, 2  ;;  %v629_v18 = vrot.slane %v374_v19, 4 }
 0x2a9   :  { %v1871_v21 = vmax.f32 %v7556_v44, %v7557_v15  ;;  %v2962_v47 = vsel %vm2904_vm6, %v2686_v2, %v2961_v5  ;;  %v630_v39 = vrot.slane %v374_v19, 6  ;;  %v2588_v13 = vsel %vm823_vm0, %v374_v19, -inf }
 0x2aa   :  { %v2963_v53 = vsel %vm2906_vm7, %v2687_v27, %v2962_v47  ;;  %v3132_v9 = vrot.slane %v3096_v36, 2  ;;  %v3133_v28 = vrot.slane %v3096_v36, 4  ;;  %v2589_v0 = vrot.slane %v2588_v13, 4 }
 0x2ab   :  { %3069 = vmatmul.f32.gmra.mxu1 %v2963_v53  ;;  %v2595_v30 = vsel %vm823_vm0, %v628_v25, -inf  ;;  %v2602_v48 = vsel %vm823_vm0, %v629_v18, -inf  ;;  %v6307_v62 = vsel %vm823_vm0, %v630_v39, -inf  ;;  %v3134_v11 = vrot.slane %v3096_v36, 6 }
 0x2ac   :  { %v2596_v60 = vrot.slane %v2595_v30, 4  ;;  %v2603_v2 = vrot.slane %v2602_v48, 4  ;;  %v7560_v38 = vrot.slane %v7559_v7, 4  ;;  %v2590_v32 = vmax.f32 %v2588_v13, %v2589_v0 }
 0x2ad   :  { %v3278_v19 = vsel %vm823_vm0, %v3096_v36, -inf  ;;  %v3285_v8 = vsel %vm823_vm0, %v3132_v9, -inf  ;;  %v3292_v5 = vsel %vm823_vm0, %v3133_v28, -inf  ;;  %v3299_v53 = vsel %vm823_vm0, %v3134_v11, -inf  ;;  %v7571_v9 = vld [vmem:[#allocation41_spill] sm:$0xff] }
 0x2ae   :  { %v1883_v27 = vmax.f32 %v7559_v7, %v7560_v38  ;;  %v6315_v44 = vmax.f32 %v2595_v30, %v2596_v60  ;;  %v3279_v47 = vrot.slane %v3278_v19, 4  ;;  %v3286_v25 = vrot.slane %v3285_v8, 4 }
 0x2af   :  { %v2591_v18 = vrot.slane %v2590_v32, 2  ;;  %v3293_v39 = vrot.slane %v3292_v5, 4  ;;  %v1872_v31 = vrot.slane %v1871_v21, 1  ;;  %v6319_v6 = vmax.f32 %v2602_v48, %v2603_v2  ;;  %v7563_v2 = vld [vmem:[#allocation37_spill] sm:$0xff] }
 0x2b0   :  { %v3280_v13 = vmax.f32 %v3278_v19, %v3279_v47  ;;  %v3287_v0 = vmax.f32 %v3285_v8, %v3286_v25  ;;  %v3300_v36 = vrot.slane %v3299_v53, 4  ;;  %v1878_v30 = vmax.f32 %v7558_v1, %v1877_v35  ;;  %v7565_v25 = vld [vmem:[#allocation46_spill] sm:$0xff] }
 0x2b1   :  { %v6321_v7 = vmax.f32 %v2590_v32, %v2591_v18  ;;  %v6324_v28 = vmax.f32 %v3292_v5, %v3293_v39  ;;  %v1873_v15 = vmax.f32 %v1871_v21, %v1872_v31  ;;  %v1884_v23 = vrot.slane %v1883_v27, 2  ;;  %v7568_v21 = vld [vmem:[#allocation42_spill] sm:$0xff] }
 0x2b2   :  { %v3281_v60 = vrot.slane %v3280_v13, 2  ;;  %v3288_v38 = vrot.slane %v3287_v0, 2  ;;  %v6328_v54 = vmax.f32 %v3299_v53, %v3300_v36  ;;  %v1879_v48 = vrot.slane %v1878_v30, 1  ;;  %v7570_v53 = vld [vmem:[#allocation43_spill] sm:$0xff] }
 0x2b3   :  { %7561 = vst [vmem:[#allocation55_spill] sm:$0xff] %v6324_v28  ;;  %v7564_v19 = vrot.slane %v7563_v2, 1  ;;  %v1885_v47 = vmax.f32 %v1883_v27, %v1884_v23  ;;  %v7566_v1 = vrot.slane %v7565_v25, 1  ;;  %v7569_v18 = vrot.slane %v7568_v21, 2  ;;  %v7574_v23 = vld [vmem:[#allocation33_spill] sm:$0xff]  ;;  %v7596_v28 = vld [vmem:[#allocation86_spill] sm:$0xff] }
 0x2b4   :  { %7562 = vst [vmem:[#allocation65_spill] sm:$0xff] %v6328_v54  ;;  %v6333_v8 = vmax.f32 %v3280_v13, %v3281_v60  ;;  %v6339_v31 = vmax.f32 %v3287_v0, %v3288_v38  ;;  %v1933_v36 = vrot.slane %v7570_v53, 2  ;;  %v7572_v11 = vrot.slane %v7571_v9, 4  ;;  %v4267_v0 = vld [vmem:[%s7114_s1 + $0x178] sm:$0xff] }
 0x2b5   :  { %v1915_v32 = vmax.f32 %v7563_v2, %v7564_v19  ;;  %v1922_v35 = vmax.f32 %v7565_v25, %v7566_v1  ;;  %v1927_v39 = vmax.f32 %v7568_v21, %v7569_v18  ;;  %v1880_v60 = vmax.f32 %v1878_v30, %v1879_v48  ;;  %v7573_v19 = vld [vmem:[#allocation40_spill] sm:$0xff]  ;;  %3788 = vmatpush.msrb.mxu2 %v4267_v0  ;;  %v7576_v48 = vld [vmem:[#allocation38_spill] sm:$0xff] }
 0x2b6   :  { %7567 = vst [vmem:[#allocation67_spill] sm:$0xff] %v6339_v31  ;;  %v1939_v13 = vmax.f32 %v7571_v9, %v7572_v11  ;;  %v1886_v2 = vrot.slane %v1885_v47, 1  ;;  %v2690_v27 = vmax.f32 %v7574_v23, %v7573_v19  ;;  %v1934_v25 = vmax.f32 %v7570_v53, %v1933_v36  ;;  %v7575_v11 = vld [vmem:[#allocation30_spill] sm:$0xff]  ;;  %v7578_v19 = vld [vmem:[#allocation32_spill] sm:$0xff]  ;;  %v7579_v23 = vld [vmem:[#allocation39_spill] sm:$0xff] }
 0x2b7   :  { %v2691_v5 = vmax.f32 %v6288_v51, %v1915_v32  ;;  %v1928_v38 = vrot.slane %v1927_v39, 1  ;;  %v2692_v21 = vmax.f32 %v6294_v57, %v1922_v35  ;;  %v7577_v18 = vmax.f32 %v7575_v11, %v7576_v48  ;;  %v7585_v11 = vld [vmem:[#allocation62_spill] sm:$0xff] }
 0x2b8   :  { %v1940_v1 = vrot.slane %v1939_v13, 2  ;;  %v1887_v30 = vmax.f32 %v1885_v47, %v1886_v2  ;;  %v7580_v51 = vmax.f32 %v7578_v19, %v7579_v23  ;;  %v1935_v36 = vrot.slane %v1934_v25, 1  ;;  %v7583_v47 = vld [vmem:[#allocation64_spill] sm:$0xff]  ;;  %v7626_v31 = vld [vmem:[#allocation98_spill] sm:$0xff] }
 0x2b9   :  { %v1929_v53 = vmax.f32 %v1927_v39, %v1928_v38  ;;  %v7584_v2 = vrot.slane %v7583_v47, 1  ;;  %v7586_v48 = vrot.slane %v7585_v11, 2 }
 0x2ba   :  { %v2964_v32 = vsel %vm2894_vm1, %v7580_v51, %v7577_v18  ;;  %v1941_v54 = vmax.f32 %v1939_v13, %v1940_v1  ;;  %v7587_v18 = vld [vmem:[#allocation63_spill] sm:$0xff]  ;;  %v1936_v51 = vmax.f32 %v1934_v25, %v1935_v36  ;;  %v7590_v1 = vld [vmem:[#allocation72_spill] sm:$0xff] }
 0x2bb   :  { %v2965_v57 = vsel %vm2896_vm2, %v2690_v27, %v2964_v32  ;;  %v1978_v0 = vmax.f32 %v7583_v47, %v7584_v2  ;;  %v1983_v19 = vmax.f32 %v7585_v11, %v7586_v48  ;;  %v1989_v23 = vrot.slane %v7587_v18, 2  ;;  %v7588_v27 = vld [vmem:[#allocation61_spill] sm:$0xff]  ;;  %v7592_v25 = vld [vmem:[#allocation87_spill] sm:$0xff] }
 0x2bc   :  { %v2966_v35 = vsel %vm2898_vm3, %v2691_v5, %v2965_v57  ;;  %v1942_v9 = vrot.slane %v1941_v54, 1  ;;  %v2693_v26 = vmax.f32 %v1873_v15, %v1929_v53  ;;  %v7589_v5 = vrot.slane %v7588_v27, 4  ;;  %v7594_v48 = vld [vmem:[#allocation85_spill] sm:$0xff] }
 0x2bd   :  { %v2967_v56 = vsel %vm2900_vm4, %v2692_v21, %v2966_v35  ;;  %v1984_v39 = vrot.slane %v1983_v19, 1  ;;  %v1990_v13 = vmax.f32 %v7587_v18, %v1989_v23  ;;  %v7591_v32 = vrot.slane %v7590_v1, 1 }
 0x2be   :  { %v1995_v38 = vmax.f32 %v7588_v27, %v7589_v5  ;;  %v1943_v47 = vmax.f32 %v1941_v54, %v1942_v9  ;;  %v2694_v2 = vmax.f32 %v1880_v60, %v1936_v51  ;;  %v2968_v11 = vsel %vm2902_vm5, %v2693_v26, %v2967_v56  ;;  %v7597_v54 = vld [vmem:[#allocation84_spill] sm:$0xff] }
 0x2bf   :  { %v2027_v57 = vmax.f32 %v7590_v1, %v7591_v32  ;;  %v7593_v36 = vrot.slane %v7592_v25, 1  ;;  %v1985_v21 = vmax.f32 %v1983_v19, %v1984_v39  ;;  %v1991_v53 = vrot.slane %v1990_v13, 1  ;;  %v7599_v32 = vld [vmem:[#allocation76_spill] sm:$0xff] }
 0x2c0   :  { %v1996_v35 = vrot.slane %v1995_v38, 2  ;;  %v7595_v18 = vrot.slane %v7594_v48, 2  ;;  %v2695_v27 = vmax.f32 %v1887_v30, %v1943_v47  ;;  %v2969_v5 = vsel %vm2904_vm6, %v2694_v2, %v2968_v11  ;;  %v7600_v19 = vld [vmem:[#allocation52_spill] sm:$0xff]  ;;  %v4266_v47 = vld [vmem:[%s7114_s1 + $0x170] sm:$0xff]  ;;  %v4265_v2 = vld [vmem:[%s7114_s1 + $0x168] sm:$0xff] }
 0x2c1   :  { %v2034_v15 = vmax.f32 %v7592_v25, %v7593_v36  ;;  %v2045_v1 = vrot.slane %v7596_v28, 2  ;;  %v7598_v60 = vrot.slane %v7597_v54, 4  ;;  %v1992_v51 = vmax.f32 %v1990_v13, %v1991_v53  ;;  %v7601_v53 = vld [vmem:[#allocation50_spill] sm:$0xff]  ;;  %3789 = vmatpush.msrb.mxu2 %v4266_v47 }
 0x2c2   :  { %v2039_v23 = vmax.f32 %v7594_v48, %v7595_v18  ;;  %v1997_v26 = vmax.f32 %v1995_v38, %v1996_v35  ;;  %v2698_v39 = vmax.f32 %v7600_v19, %v7599_v32  ;;  %v2970_v25 = vsel %vm2906_vm7, %v2695_v27, %v2969_v5  ;;  %v7602_v35 = vld [vmem:[#allocation73_spill] sm:$0xff]  ;;  %v7604_v27 = vld [vmem:[#allocation51_spill] sm:$0xff] }
 0x2c3   :  { %v2051_v9 = vmax.f32 %v7597_v54, %v7598_v60  ;;  %v2046_v36 = vmax.f32 %v7596_v28, %v2045_v1  ;;  %v2699_v30 = vmax.f32 %v1971_v12, %v2027_v57  ;;  %3072 = vmatmul.f32.gmra.mxu1 %v2970_v25  ;;  %v2700_v11 = vmax.f32 %v1978_v0, %v2034_v15  ;;  %v7605_v5 = vld [vmem:[#allocation75_spill] sm:$0xff]  ;;  %v7607_v60 = vld [vmem:[#allocation97_spill] sm:$0xff]  ;;  %v7609_v15 = vld [vmem:[#allocation56_spill] sm:$0xff] }
 0x2c4   :  { %v2040_v56 = vrot.slane %v2039_v23, 1  ;;  %v1998_v13 = vrot.slane %v1997_v26, 1  ;;  %v7603_v18 = vmax.f32 %v7601_v53, %v7602_v35  ;;  %v7606_v28 = vmax.f32 %v7604_v27, %v7605_v5  ;;  %3790 = vmatpush.msrb.mxu2 %v4265_v2  ;;  %v7613_v5 = vld [vmem:[#allocation57_spill] sm:$0xff] }
 0x2c5   :  { %v2052_v48 = vrot.slane %v2051_v9, 2  ;;  %v2047_v57 = vrot.slane %v2046_v36, 1  ;;  %v7608_v32 = vrot.slane %v7607_v60, 1 }
 0x2c6   :  { %v2041_v38 = vmax.f32 %v2039_v23, %v2040_v56  ;;  %v2971_v12 = vsel %vm2894_vm1, %v7606_v28, %v7603_v18  ;;  %v1999_v25 = vmax.f32 %v1997_v26, %v1998_v13  ;;  %v7610_v56 = vrot.slane %v7609_v15, 1 }
 0x2c7   :  { %v2053_v1 = vmax.f32 %v2051_v9, %v2052_v48  ;;  %v2972_v54 = vsel %vm2896_vm2, %v2698_v39, %v2971_v12  ;;  %v2083_v19 = vmax.f32 %v7607_v60, %v7608_v32  ;;  %v2048_v35 = vmax.f32 %v2046_v36, %v2047_v57  ;;  %v7611_v9 = vld [vmem:[#allocation54_spill] sm:$0xff]  ;;  %v4264_v32 = vld [vmem:[%s7114_s1 + $0x160] sm:$0xff] }
 0x2c8   :  { %v2701_v23 = vmax.f32 %v1985_v21, %v2041_v38  ;;  %v2973_v0 = vsel %vm2898_vm3, %v2699_v30, %v2972_v54  ;;  %v2090_v53 = vmax.f32 %v7609_v15, %v7610_v56  ;;  %v7612_v48 = vrot.slane %v7611_v9, 2  ;;  %v7614_v21 = vld [vmem:[#allocation53_spill] sm:$0xff]  ;;  %3791 = vmatpush.msrb.mxu2 %v4264_v32 }
 0x2c9   :  { %v2054_v18 = vrot.slane %v2053_v1, 1  ;;  %v2974_v47 = vsel %vm2900_vm4, %v2700_v11, %v2973_v0  ;;  %v2101_v26 = vrot.slane %v7613_v5, 2  ;;  %v7615_v13 = vrot.slane %v7614_v21, 4  ;;  %v7616_v38 = vld [vmem:[#allocation69_spill] sm:$0xff]  ;;  %v7618_v11 = vld [vmem:[#allocation80_spill] sm:$0xff] }
 0x2ca   :  { %v2095_v39 = vmax.f32 %v7611_v9, %v7612_v48  ;;  %v2975_v27 = vsel %vm2902_vm5, %v2701_v23, %v2974_v47  ;;  %v7617_v28 = vrot.slane %v7616_v38, 1  ;;  %v2702_v12 = vmax.f32 %v1992_v51, %v2048_v35  ;;  %v4263_v23 = vld [vmem:[%s7114_s1 + $0x158] sm:$0xff]  ;;  %v7620_v56 = vld [vmem:[#allocation77_spill] sm:$0xff] }
 0x2cb   :  { %v2107_v30 = vmax.f32 %v7614_v21, %v7615_v13  ;;  %v2055_v36 = vmax.f32 %v2053_v1, %v2054_v18  ;;  %v7619_v54 = vrot.slane %v7618_v11, 1  ;;  %v2102_v0 = vmax.f32 %v7613_v5, %v2101_v26  ;;  %v7622_v1 = vld [vmem:[#allocation79_spill] sm:$0xff]  ;;  %v7623_v21 = vld [vmem:[#allocation78_spill] sm:$0xff]  ;;  %3792 = vmatpush.msrb.mxu2 %v4263_v23 }
 0x2cc   :  { %v2139_v2 = vmax.f32 %v7616_v38, %v7617_v28  ;;  %v2096_v57 = vrot.slane %v2095_v39, 1  ;;  %v7621_v47 = vrot.slane %v7620_v56, 2  ;;  %v2157_v35 = vrot.slane %v7622_v1, 2 }
 0x2cd   :  { %v2146_v60 = vmax.f32 %v7618_v11, %v7619_v54  ;;  %v2108_v15 = vrot.slane %v2107_v30, 2  ;;  %v2703_v18 = vmax.f32 %v1999_v25, %v2055_v36  ;;  %v2976_v9 = vsel %vm2904_vm6, %v2702_v12, %v2975_v27 }
 0x2ce   :  { %v2151_v51 = vmax.f32 %v7620_v56, %v7621_v47  ;;  %v2097_v48 = vmax.f32 %v2095_v39, %v2096_v57  ;;  %v7624_v13 = vrot.slane %v7623_v21, 4  ;;  %v2103_v28 = vrot.slane %v2102_v0, 1  ;;  %v7625_v47 = vld [vmem:[#allocation74_spill] sm:$0xff] }
 0x2cf   :  { %v2109_v11 = vmax.f32 %v2107_v30, %v2108_v15  ;;  %v2158_v5 = vmax.f32 %v7622_v1, %v2157_v35  ;;  %v2977_v26 = vsel %vm2906_vm7, %v2703_v18, %v2976_v9  ;;  %v2706_v32 = vmax.f32 %v7626_v31, %v7625_v47  ;;  %v7628_v30 = vld [vmem:[#allocation70_spill] sm:$0xff]  ;;  %v7631_v1 = vld [vmem:[#allocation71_spill] sm:$0xff] }
 0x2d0   :  { %v2163_v38 = vmax.f32 %v7623_v21, %v7624_v13  ;;  %v2152_v54 = vrot.slane %v2151_v51, 1  ;;  %v2707_v25 = vmax.f32 %v2083_v19, %v2139_v2  ;;  %3075 = vmatmul.f32.gmra.mxu1 %v2977_v26  ;;  %v2104_v27 = vmax.f32 %v2102_v0, %v2103_v28  ;;  %v7627_v13 = vld [vmem:[#allocation95_spill] sm:$0xff]  ;;  %v7637_v26 = vld [vmem:[#allocation100_spill] sm:$0xff] }
 0x2d1   :  { %v2110_v39 = vrot.slane %v2109_v11, 1  ;;  %v2159_v12 = vrot.slane %v2158_v5, 1  ;;  %v2708_v21 = vmax.f32 %v2090_v53, %v2146_v60  ;;  %v7629_v15 = vmax.f32 %v7627_v13, %v7628_v30  ;;  %v7633_v18 = vld [vmem:[#allocation91_spill] sm:$0xff]  ;;  %v7635_v60 = vld [vmem:[#allocation102_spill] sm:$0xff]  ;;  %v7639_v30 = vld [vmem:[#allocation101_spill] sm:$0xff] }
 0x2d2   :  { %v2164_v56 = vrot.slane %v2163_v38, 2  ;;  %v2153_v36 = vmax.f32 %v2151_v51, %v2152_v54  ;;  %v7632_v23 = vmax.f32 %v7630_v20, %v7631_v1  ;;  %v7634_v9 = vrot.slane %v7633_v18, 1 }
 0x2d3   :  { %v2111_v19 = vmax.f32 %v2109_v11, %v2110_v39  ;;  %v2160_v2 = vmax.f32 %v2158_v5, %v2159_v12  ;;  %v7638_v20 = vrot.slane %v7637_v26, 2  ;;  %v2213_v11 = vrot.slane %v7639_v30, 2  ;;  %v7640_v5 = vld [vmem:[#allocation99_spill] sm:$0xff]  ;;  %v7642_v12 = vld [vmem:[#allocation104_spill] sm:$0xff] }
 0x2d4   :  { %v2165_v57 = vmax.f32 %v2163_v38, %v2164_v56  ;;  %v2978_v35 = vsel %vm2894_vm1, %v7632_v23, %v7629_v15  ;;  %v2195_v31 = vmax.f32 %v7633_v18, %v7634_v9  ;;  %v2709_v0 = vmax.f32 %v2097_v48, %v2153_v36  ;;  %v7644_v18 = vld [vmem:[#allocation110_spill] sm:$0xff] }
 0x2d5   :  { %v2979_v51 = vsel %vm2896_vm2, %v2706_v32, %v2978_v35  ;;  %v7636_v38 = vrot.slane %v7635_v60, 1  ;;  %v2207_v56 = vmax.f32 %v7637_v26, %v7638_v20  ;;  %v2710_v47 = vmax.f32 %v2104_v27, %v2160_v2  ;;  %v4262_v27 = vld [vmem:[%s7114_s1 + $0x150] sm:$0xff]  ;;  %v4260_v20 = vld [vmem:[%s7114_s1 + $0x140] sm:$0xff] }
 0x2d6   :  { %v2166_v28 = vrot.slane %v2165_v57, 1  ;;  %v2980_v53 = vsel %vm2898_vm3, %v2707_v25, %v2979_v51  ;;  %v7641_v48 = vrot.slane %v7640_v5, 4  ;;  %v7643_v15 = vrot.slane %v7642_v12, 1  ;;  %3793 = vmatpush.msrb.mxu2 %v4262_v27  ;;  %v4259_v27 = vld [vmem:[%s7114_s1 + $0x138] sm:$0xff] }
 0x2d7   :  { %v2202_v54 = vmax.f32 %v7635_v60, %v7636_v38  ;;  %v2981_v13 = vsel %vm2900_vm4, %v2708_v21, %v2980_v53  ;;  %v2208_v36 = vrot.slane %v2207_v56, 1  ;;  %v4261_v21 = vld [vmem:[%s7114_s1 + $0x148] sm:$0xff]  ;;  %v2214_v35 = vmax.f32 %v7639_v30, %v2213_v11  ;;  %v7649_v30 = vld [vmem:[#allocation107_spill] sm:$0xff] }
 0x2d8   :  { %v2219_v32 = vmax.f32 %v7640_v5, %v7641_v48  ;;  %v2167_v39 = vmax.f32 %v2165_v57, %v2166_v28  ;;  %v2982_v25 = vsel %vm2902_vm5, %v2709_v0, %v2981_v13  ;;  %v2251_v1 = vmax.f32 %v7642_v12, %v7643_v15  ;;  %v7646_v28 = vld [vmem:[#allocation108_spill] sm:$0xff]  ;;  %v7648_v38 = vld [vmem:[#allocation109_spill] sm:$0xff]  ;;  %v7651_v48 = vld [vmem:[#allocation106_spill] sm:$0xff]  ;;  %3794 = vmatpush.msrb.mxu2 %v4261_v21 }
 0x2d9   :  { %v2983_v23 = vsel %vm2904_vm6, %v2710_v47, %v2982_v25  ;;  %v7645_v9 = vrot.slane %v7644_v18, 1  ;;  %v2209_v51 = vmax.f32 %v2207_v56, %v2208_v36  ;;  %v7647_v53 = vrot.slane %v7646_v28, 2  ;;  %v7652_v25 = vld [vmem:[#allocation94_spill] sm:$0xff]  ;;  %v3055_v56 = vpop.f32.mrf.mxu1  ;;  %v7654_v21 = vld [vmem:[#allocation103_spill] sm:$0xff] }
 0x2da   :  { %v2220_v57 = vrot.slane %v2219_v32, 2  ;;  %v2711_v0 = vmax.f32 %v2111_v19, %v2167_v39  ;;  %v2269_v26 = vrot.slane %v7648_v38, 2  ;;  %v2215_v47 = vrot.slane %v2214_v35, 1  ;;  %3795 = vmatpush.msrb.mxu2 %v4260_v20 }
 0x2db   :  { %v2258_v2 = vmax.f32 %v7644_v18, %v7645_v9  ;;  %v2263_v60 = vmax.f32 %v7646_v28, %v7647_v53  ;;  %v7650_v11 = vrot.slane %v7649_v30, 4  ;;  %v2714_v19 = vmax.f32 %v7652_v25, %v7651_v48 }
 0x2dc   :  { %v2221_v13 = vmax.f32 %v2219_v32, %v2220_v57  ;;  %v2984_v39 = vsel %vm2906_vm7, %v2711_v0, %v2983_v23  ;;  %v2270_v12 = vmax.f32 %v7648_v38, %v2269_v26  ;;  %v2715_v15 = vmax.f32 %v2195_v31, %v2251_v1  ;;  %v7656_v23 = vld [vmem:[#allocation93_spill] sm:$0xff]  ;;  %3796 = vmatpush.msrb.mxu2 %v4259_v27 }
 0x2dd   :  { %v2275_v5 = vmax.f32 %v7649_v30, %v7650_v11  ;;  %v2264_v36 = vrot.slane %v2263_v60, 1  ;;  %3078 = vmatmul.f32.gmra.mxu1 %v2984_v39  ;;  %v2216_v32 = vmax.f32 %v2214_v35, %v2215_v47  ;;  %v2716_v9 = vmax.f32 %v2202_v54, %v2258_v2  ;;  %v7653_v30 = vld [vmem:[#allocation92_spill] sm:$0xff]  ;;  %v7657_v0 = vld [vmem:[#allocation105_spill] sm:$0xff] }
 0x2de   :  { %v2222_v57 = vrot.slane %v2221_v13, 1  ;;  %v2271_v53 = vrot.slane %v2270_v12, 1  ;;  %v7655_v11 = vmax.f32 %v7653_v30, %v7654_v21  ;;  %v7658_v48 = vmax.f32 %v7656_v23, %v7657_v0  ;;  %v7660_v30 = vld [vmem:[#allocation111_spill] sm:$0xff]  ;;  %v4257_v27 = vld [vmem:[%s7114_s1 + $0x128] sm:$0xff] }
 0x2df   :  { %v2276_v18 = vrot.slane %v2275_v5, 2  ;;  %v2265_v28 = vmax.f32 %v2263_v60, %v2264_v36  ;;  %v3056_v1 = vadd.f32 %v6282_v61, %v3055_v56  ;;  %v7659_v38 = vrot.slane %v6333_v8, 1 }
 0x2e0   :  { %v2985_v31 = vsel %vm2894_vm1, %v7658_v48, %v7655_v11  ;;  %v2223_v26 = vmax.f32 %v2221_v13, %v2222_v57  ;;  %v2272_v60 = vmax.f32 %v2270_v12, %v2271_v53  ;;  %v7661_v56 = vrot.slane %v7660_v30, 1  ;;  %v4256_v48 = vld [vmem:[%s7114_s1 + $0x120] sm:$0xff] }
 0x2e1   :  { %v6521_v35 = vmax.f32 %v6333_v8, %v7659_v38  ;;  %v2277_v54 = vmax.f32 %v2275_v5, %v2276_v18  ;;  %v2986_v2 = vsel %vm2896_vm2, %v2714_v19, %v2985_v31  ;;  %v2717_v20 = vmax.f32 %v2209_v51, %v2265_v28  ;;  %v7662_v8 = vld [vmem:[#allocation116_spill] sm:$0xff] }
 0x2e2   :  { %v2987_v47 = vsel %vm2898_vm3, %v2715_v15, %v2986_v2  ;;  %v3097_v25 = vmax.f32 %v3056_v1, 0.0  ;;  %v6529_v21 = vmax.f32 %v7660_v30, %v7661_v56  ;;  %v7663_v11 = vrot.slane %v7662_v8, 2  ;;  %v4258_v15 = vld [vmem:[%s7114_s1 + $0x130] sm:$0xff]  ;;  %v4255_v30 = vld [vmem:[%s7114_s1 + $0x118] sm:$0xff] }
 0x2e3   :  { %v2278_v39 = vrot.slane %v2277_v54, 1  ;;  %v2988_v36 = vsel %vm2900_vm4, %v2716_v9, %v2987_v47  ;;  %v2718_v5 = vmax.f32 %v2216_v32, %v2272_v60  ;;  %3797 = vmatpush.msrb.mxu2 %v4258_v15 }
 0x2e4   :  { %v2319_v13 = vmax.f32 %v7662_v8, %v7663_v11  ;;  %v2989_v19 = vsel %vm2902_vm5, %v2717_v20, %v2988_v36  ;;  %v3135_v12 = vrot.slane %v3097_v25, 2  ;;  %v3136_v51 = vrot.slane %v3097_v25, 4  ;;  %v7664_v20 = vld [vmem:[#allocation118_spill] sm:$0xff]  ;;  %v7667_v11 = vld [vmem:[#allocation115_spill] sm:$0xff] }
 0x2e5   :  { %v2279_v57 = vmax.f32 %v2277_v54, %v2278_v39  ;;  %v3137_v18 = vrot.slane %v3097_v25, 6  ;;  %v3306_v9 = vsel %vm823_vm0, %v3097_v25, -inf  ;;  %v2990_v32 = vsel %vm2904_vm6, %v2718_v5, %v2989_v19  ;;  %3798 = vmatpush.msrb.mxu2 %v4257_v27  ;;  %v7666_v39 = vld [vmem:[#allocation117_spill] sm:$0xff] }
 0x2e6   :  { %v2320_v28 = vrot.slane %v2319_v13, 1  ;;  %v3307_v53 = vrot.slane %v3306_v9, 4  ;;  %v3313_v23 = vsel %vm823_vm0, %v3135_v12, -inf  ;;  %v3320_v0 = vsel %vm823_vm0, %v3136_v51, -inf }
 0x2e7   :  { %v2719_v31 = vmax.f32 %v2223_v26, %v2279_v57  ;;  %v3314_v1 = vrot.slane %v3313_v23, 4  ;;  %v3321_v38 = vrot.slane %v3320_v0, 4  ;;  %v3327_v54 = vsel %vm823_vm0, %v3137_v18, -inf  ;;  %3799 = vmatpush.msrb.mxu2 %v4256_v48 }
 0x2e8   :  { %v3308_v2 = vmax.f32 %v3306_v9, %v3307_v53  ;;  %v3328_v60 = vrot.slane %v3327_v54, 4  ;;  %v7665_v47 = vrot.slane %v7664_v20, 1  ;;  %v2325_v36 = vrot.slane %v7666_v39, 2  ;;  %v7669_v9 = vld [vmem:[#allocation121_spill] sm:$0xff] }
 0x2e9   :  { %v2991_v56 = vsel %vm2906_vm7, %v2719_v31, %v2990_v32  ;;  %v3315_v26 = vmax.f32 %v3313_v23, %v3314_v1  ;;  %v6557_v8 = vmax.f32 %v3320_v0, %v3321_v38  ;;  %v7668_v5 = vrot.slane %v7667_v11, 4  ;;  %3800 = vmatpush.msrb.mxu2 %v4255_v30  ;;  %v7672_v1 = vld [vmem:[#allocation124_spill] sm:$0xff] }
 0x2ea   :  { %v2314_v25 = vmax.f32 %v7664_v20, %v7665_v47  ;;  %3081 = vmatmul.f32.gmra.mxu1 %v2991_v56  ;;  %v3309_v12 = vrot.slane %v3308_v2, 2  ;;  %v6562_v51 = vmax.f32 %v3327_v54, %v3328_v60  ;;  %v2321_v15 = vmax.f32 %v2319_v13, %v2320_v28  ;;  %v7674_v28 = vld [vmem:[#allocation125_spill] sm:$0xff]  ;;  %v7675_v47 = vld [vmem:[#allocation123_spill] sm:$0xff]  ;;  %v7677_v56 = vld [vmem:[#allocation122_spill] sm:$0xff] }
 0x2eb   :  { %v2331_v19 = vmax.f32 %v7667_v11, %v7668_v5  ;;  %v2326_v27 = vmax.f32 %v7666_v39, %v2325_v36  ;;  %v3316_v57 = vrot.slane %v3315_v26, 2  ;;  %v7670_v53 = vrot.slane %v7669_v9, 1  ;;  %v7678_v11 = vld [vmem:[#allocation114_spill] sm:$0xff] }
 0x2ec   :  { %v7671_v23 = vrot.slane %v5862_v10, 1  ;;  %v6571_v31 = vmax.f32 %v3308_v2, %v3309_v12  ;;  %v7673_v38 = vrot.slane %v7672_v1, 2  ;;  %v2381_v54 = vrot.slane %v7674_v28, 2 }
 0x2ed   :  { %v2332_v18 = vrot.slane %v2331_v19, 2  ;;  %v2363_v32 = vmax.f32 %v7669_v9, %v7670_v53  ;;  %v2327_v48 = vrot.slane %v2326_v27, 1  ;;  %v7676_v39 = vrot.slane %v7675_v47, 4 }
 0x2ee   :  { %v2370_v0 = vmax.f32 %v5862_v10, %v7671_v23  ;;  %v2375_v13 = vmax.f32 %v7672_v1, %v7673_v38  ;;  %v2722_v10 = vmax.f32 %v7678_v11, %v7677_v56  ;;  %v6584_v30 = vmax.f32 %v3315_v26, %v3316_v57  ;;  %v7679_v57 = vld [vmem:[#allocation112_spill] sm:$0xff] }
 0x2ef   :  { %v2333_v20 = vmax.f32 %v2331_v19, %v2332_v18  ;;  %v2387_v36 = vmax.f32 %v7675_v47, %v7676_v39  ;;  %v2382_v12 = vmax.f32 %v7674_v28, %v2381_v54  ;;  %v2723_v23 = vmax.f32 %v6529_v21, %v2363_v32  ;;  %v4254_v19 = vld [vmem:[%s7114_s1 + $0x110] sm:$0xff]  ;;  %v4253_v18 = vld [vmem:[%s7114_s1 + $0x108] sm:$0xff]  ;;  %v7683_v54 = vld [vmem:[#allocation120_spill] sm:$0xff] }
 0x2f0   :  { %v2376_v5 = vrot.slane %v2375_v13, 1  ;;  %v2724_v1 = vmax.f32 %v2314_v25, %v2370_v0  ;;  %v2328_v38 = vmax.f32 %v2326_v27, %v2327_v48  ;;  %v7680_v39 = vld [vmem:[#allocation119_spill] sm:$0xff]  ;;  %v7682_v28 = vld [vmem:[#allocation113_spill] sm:$0xff]  ;;  %3801 = vmatpush.msrb.mxu2 %v4254_v19  ;;  %v7685_v60 = vrot.slane %v5944_v50, 1 }
 0x2f1   :  { %v2334_v9 = vrot.slane %v2333_v20, 1  ;;  %v2388_v53 = vrot.slane %v2387_v36, 2  ;;  %v2383_v26 = vrot.slane %v2382_v12, 1  ;;  %v7681_v56 = vmax.f32 %v7679_v57, %v7680_v39  ;;  %v4252_v27 = vld [vmem:[%s7114_s1 + $0x100] sm:$0xff] }
 0x2f2   :  { %v2377_v47 = vmax.f32 %v2375_v13, %v2376_v5  ;;  %v7684_v11 = vmax.f32 %v7682_v28, %v7683_v54  ;;  %v2419_v2 = vmax.f32 %v5944_v50, %v7685_v60  ;;  %v7686_v57 = vrot.slane %v5992_v3, 1  ;;  %3802 = vmatpush.msrb.mxu2 %v4253_v18 }
 0x2f3   :  { %v2335_v25 = vmax.f32 %v2333_v20, %v2334_v9  ;;  %v2389_v32 = vmax.f32 %v2387_v36, %v2388_v53  ;;  %v2384_v48 = vmax.f32 %v2382_v12, %v2383_v26  ;;  %v2437_v60 = vrot.slane %v5994_v41, 2 }
 0x2f4   :  { %v2992_v21 = vsel %vm2894_vm1, %v7684_v11, %v7681_v56  ;;  %v2725_v13 = vmax.f32 %v2321_v15, %v2377_v47  ;;  %v2426_v19 = vmax.f32 %v5992_v3, %v7686_v57  ;;  %v7688_v15 = vrot.slane %v5976_v22, 4  ;;  %3803 = vmatpush.msrb.mxu2 %v4252_v27 }
 0x2f5   :  { %v2993_v0 = vsel %vm2896_vm2, %v2722_v10, %v2992_v21  ;;  %v2390_v20 = vrot.slane %v2389_v32, 1  ;;  %v7687_v10 = vrot.slane %v5986_v40, 2  ;;  %v2726_v9 = vmax.f32 %v2328_v38, %v2384_v48 }
 0x2f6   :  { %v2994_v5 = vsel %vm2898_vm3, %v2723_v23, %v2993_v0  ;;  %v2443_v53 = vmax.f32 %v5976_v22, %v7688_v15  ;;  %v7689_v23 = vrot.slane %v6006_v55, 1  ;;  %v2438_v47 = vmax.f32 %v5994_v41, %v2437_v60 }
 0x2f7   :  { %v2995_v36 = vsel %vm2900_vm4, %v2724_v1, %v2994_v5  ;;  %v2431_v50 = vmax.f32 %v5986_v40, %v7687_v10  ;;  %v2391_v18 = vmax.f32 %v2389_v32, %v2390_v20  ;;  %v7690_v40 = vrot.slane %v6013_v42, 1 }
 0x2f8   :  { %v2996_v12 = vsel %vm2902_vm5, %v2725_v13, %v2995_v36  ;;  %v2475_v3 = vmax.f32 %v6006_v55, %v7689_v23  ;;  %v2444_v39 = vrot.slane %v2443_v53, 2  ;;  %v7691_v56 = vrot.slane %v6000_v14, 2 }
 0x2f9   :  { %v2432_v1 = vrot.slane %v2431_v50, 1  ;;  %v2482_v26 = vmax.f32 %v6013_v42, %v7690_v40  ;;  %v2997_v38 = vsel %vm2904_vm6, %v2726_v9, %v2996_v12  ;;  %v2493_v28 = vrot.slane %v6011_v52, 2  ;;  %v7696_v9 = vld [vmem:[#allocation132_spill] sm:$0xff] }
 0x2fa   :  { %v2487_v22 = vmax.f32 %v6000_v14, %v7691_v56  ;;  %v2727_v54 = vmax.f32 %v2335_v25, %v2391_v18  ;;  %v2439_v11 = vrot.slane %v2438_v47, 1  ;;  %v7692_v21 = vrot.slane %v6003_v59, 4 }
 0x2fb   :  { %v2433_v55 = vmax.f32 %v2431_v50, %v2432_v1  ;;  %v2445_v32 = vmax.f32 %v2443_v53, %v2444_v39  ;;  %v2494_v42 = vmax.f32 %v6011_v52, %v2493_v28  ;;  %v2730_v27 = vmax.f32 %v5962_v43, %v6022_v45  ;;  %v7693_v50 = vld [vmem:[#allocation130_spill] sm:$0xff] }
 0x2fc   :  { %v2499_v41 = vmax.f32 %v6003_v59, %v7692_v21  ;;  %v2488_v0 = vrot.slane %v2487_v22, 1  ;;  %v2998_v48 = vsel %vm2906_vm7, %v2727_v54, %v2997_v38  ;;  %v2440_v13 = vmax.f32 %v2438_v47, %v2439_v11  ;;  %v7694_v59 = vld [vmem:[#allocation131_spill] sm:$0xff] }
 0x2fd   :  { %v2731_v5 = vmax.f32 %v2419_v2, %v2475_v3  ;;  %3084 = vmatmul.f32.gmra.mxu1 %v2998_v48  ;;  %v2446_v25 = vrot.slane %v2445_v32, 1  ;;  %v2495_v20 = vrot.slane %v2494_v42, 1  ;;  %v2732_v36 = vmax.f32 %v2426_v19, %v2482_v26 }
 0x2fe   :  { %v2500_v14 = vrot.slane %v2499_v41, 2  ;;  %v2489_v57 = vmax.f32 %v2487_v22, %v2488_v0  ;;  %v7695_v60 = vmax.f32 %v7693_v50, %v7694_v59  ;;  %v7697_v52 = vmax.f32 %v5958_v34, %v7696_v9 }
 0x2ff   :  { %v7698_v43 = vrot.slane %v6118_v17, 1  ;;  %v7699_v2 = vrot.slane %v6191_v33, 1  ;;  %v2447_v53 = vmax.f32 %v2445_v32, %v2446_v25  ;;  %v2496_v23 = vmax.f32 %v2494_v42, %v2495_v20 }
 0x300   :  { %v2501_v10 = vmax.f32 %v2499_v41, %v2500_v14  ;;  %v2999_v12 = vsel %vm2894_vm1, %v7697_v52, %v7695_v60  ;;  %v2733_v19 = vmax.f32 %v2433_v55, %v2489_v57  ;;  %v7700_v34 = vrot.slane %v6174_v63, 2 }
 0x301   :  { %v2531_v45 = vmax.f32 %v6118_v17, %v7698_v43  ;;  %v2538_v15 = vmax.f32 %v6191_v33, %v7699_v2  ;;  %v3000_v3 = vsel %vm2896_vm2, %v2730_v27, %v2999_v12  ;;  %v2549_v40 = vrot.slane %v6184_v49, 2  ;;  %v7710_v12 = vld [vmem:[#allocation55_spill] sm:$0xff] }
 0x302   :  { %v2502_v18 = vrot.slane %v2501_v10, 1  ;;  %v3001_v1 = vsel %vm2898_vm3, %v2731_v5, %v3000_v3  ;;  %v2543_v47 = vmax.f32 %v6174_v63, %v7700_v34  ;;  %v2734_v26 = vmax.f32 %v2440_v13, %v2496_v23  ;;  %v7713_v34 = vld [vmem:[#allocation65_spill] sm:$0xff] }
 0x303   :  { %v3002_v17 = vsel %vm2900_vm4, %v2732_v36, %v3001_v1  ;;  %v7701_v38 = vrot.slane %v6167_v58, 4  ;;  %v7702_v39 = vrot.slane %v6248_v24, 1  ;;  %v2550_v55 = vmax.f32 %v6184_v49, %v2549_v40 }
 0x304   :  { %v2503_v22 = vmax.f32 %v2501_v10, %v2502_v18  ;;  %v3003_v28 = vsel %vm2902_vm5, %v2733_v19, %v3002_v17  ;;  %v2544_v54 = vrot.slane %v2543_v47, 1  ;;  %v7703_v21 = vrot.slane %v6321_v7, 1 }
 0x305   :  { %v2555_v33 = vmax.f32 %v6167_v58, %v7701_v38  ;;  %v2587_v56 = vmax.f32 %v6248_v24, %v7702_v39  ;;  %v3004_v63 = vsel %vm2904_vm6, %v2734_v26, %v3003_v28  ;;  %v7704_v32 = vrot.slane %v6315_v44, 2 }
 0x306   :  { %v2594_v41 = vmax.f32 %v6321_v7, %v7703_v21  ;;  %v2735_v0 = vmax.f32 %v2447_v53, %v2503_v22  ;;  %v2545_v42 = vmax.f32 %v2543_v47, %v2544_v54  ;;  %v2551_v24 = vrot.slane %v2550_v55, 1  ;;  %v7716_v21 = vld [vmem:[#allocation128_spill] sm:$0xff] }
 0x307   :  { %v2556_v11 = vrot.slane %v2555_v33, 2  ;;  %v2599_v58 = vmax.f32 %v6315_v44, %v7704_v32  ;;  %v2605_v27 = vrot.slane %v6319_v6, 2  ;;  %v7705_v49 = vrot.slane %v6307_v62, 4 }
 0x308   :  { %v2738_v5 = vmax.f32 %v6141_v37, %v6255_v29  ;;  %v3005_v7 = vsel %vm2906_vm7, %v2735_v0, %v3004_v63  ;;  %v2552_v25 = vmax.f32 %v2550_v55, %v2551_v24  ;;  %v2739_v44 = vmax.f32 %v2531_v45, %v2587_v56  ;;  %v7709_v29 = vld [vmem:[#allocation67_spill] sm:$0xff]  ;;  %v7717_v24 = vld [vmem:[#allocation136_spill] sm:$0xff] }
 0x309   :  { %v2557_v48 = vmax.f32 %v2555_v33, %v2556_v11  ;;  %v2600_v13 = vrot.slane %v2599_v58, 1  ;;  %v2611_v14 = vmax.f32 %v6307_v62, %v7705_v49  ;;  %v2606_v57 = vmax.f32 %v6319_v6, %v2605_v27  ;;  %3087 = vmatmul.f32.gmra.mxu1 %v3005_v7  ;;  %v7707_v62 = vld [vmem:[#allocation48_spill] sm:$0xff]  ;;  %v7715_v11 = vld [vmem:[#allocation135_spill] sm:$0xff]  ;;  %v7718_v27 = vld [vmem:[#allocation129_spill] sm:$0xff] }
 0x30a   :  { %v2740_v50 = vmax.f32 %v2538_v15, %v2594_v41  ;;  %v7706_v60 = vmax.f32 %v6128_v4, %v6251_v16  ;;  %v7708_v9 = vmax.f32 %v6130_v46, %v7707_v62  ;;  %v3290_v52 = vrot.slane %v7709_v29, 1  ;;  %v3058_v4 = vpop.f32.mrf.mxu1  ;;  %v7720_v49 = vld [vmem:[#allocation133_spill] sm:$0xff]  ;;  %v7723_v7 = vld [vmem:[#allocation134_spill] sm:$0xff] }
 0x30b   :  { %v2558_v20 = vrot.slane %v2557_v48, 1  ;;  %v2601_v36 = vmax.f32 %v2599_v58, %v2600_v13  ;;  %v2612_v10 = vrot.slane %v2611_v14, 2  ;;  %v2607_v59 = vrot.slane %v2606_v57, 1  ;;  %v7719_v13 = vld [vmem:[#allocation126_spill] sm:$0xff] }
 0x30c   :  { %v3006_v37 = vsel %vm2894_vm1, %v7708_v9, %v7706_v60  ;;  %v7711_v43 = vrot.slane %v7710_v12, 2  ;;  %v7712_v45 = vrot.slane %v6571_v31, 1  ;;  %v3302_v47 = vrot.slane %v7713_v34, 2 }
 0x30d   :  { %v2613_v15 = vmax.f32 %v2611_v14, %v2612_v10  ;;  %v2741_v53 = vmax.f32 %v2545_v42, %v2601_v36  ;;  %v3007_v23 = vsel %vm2896_vm2, %v2738_v5, %v3006_v37  ;;  %v2559_v16 = vmax.f32 %v2557_v48, %v2558_v20  ;;  %v7722_v5 = vld [vmem:[#allocation127_spill] sm:$0xff] }
 0x30e   :  { %v3296_v6 = vmax.f32 %v7710_v12, %v7711_v43  ;;  %v3312_v2 = vmax.f32 %v6571_v31, %v7712_v45  ;;  %v2608_v19 = vmax.f32 %v2606_v57, %v2607_v59  ;;  %v3008_v46 = vsel %vm2898_vm3, %v2739_v44, %v3007_v23 }
 0x30f   :  { %v2614_v18 = vrot.slane %v2613_v15, 1  ;;  %v3009_v1 = vsel %vm2900_vm4, %v2740_v50, %v3008_v46  ;;  %v3318_v40 = vrot.slane %v6584_v30, 1  ;;  %v3291_v17 = vmax.f32 %v7709_v29, %v3290_v52 }
 0x310   :  { %v3297_v3 = vrot.slane %v3296_v6, 1  ;;  %v2742_v26 = vmax.f32 %v2552_v25, %v2608_v19  ;;  %v3010_v31 = vsel %vm2902_vm5, %v2741_v53, %v3009_v1  ;;  %v7714_v38 = vrot.slane %v6557_v8, 2 }
 0x311   :  { %v2615_v39 = vmax.f32 %v2613_v15, %v2614_v18  ;;  %v3303_v56 = vmax.f32 %v7713_v34, %v3302_v47  ;;  %v3319_v22 = vmax.f32 %v6584_v30, %v3318_v40  ;;  %v3330_v28 = vrot.slane %v6562_v51, 2 }
 0x312   :  { %v3324_v33 = vmax.f32 %v6557_v8, %v7714_v38  ;;  %v3011_v54 = vsel %vm2904_vm6, %v2742_v26, %v3010_v31  ;;  %v3298_v55 = vmax.f32 %v3296_v6, %v3297_v3  ;;  %v3672_v41 = vmax.f32 %v7716_v21, %v7715_v11  ;;  %v3061_v36 = vpop.f32.mrf.mxu1 }
 0x313   :  { %v2743_v32 = vmax.f32 %v2559_v16, %v2615_v39  ;;  %v3304_v58 = vrot.slane %v3303_v56, 1  ;;  %v3331_v0 = vmax.f32 %v6562_v51, %v3330_v28  ;;  %v3674_v8 = vmax.f32 %v6521_v35, %v3312_v2 }
 0x314   :  { %v3325_v63 = vrot.slane %v3324_v33, 1  ;;  %v3673_v48 = vmax.f32 %v7718_v27, %v7717_v24  ;;  %v3675_v30 = vmax.f32 %v3291_v17, %v3319_v22  ;;  %v7721_v14 = vmax.f32 %v7719_v13, %v7720_v49 }
 0x315   :  { %v7724_v25 = vmax.f32 %v7722_v5, %v7723_v7  ;;  %v3012_v44 = vsel %vm2906_vm7, %v2743_v32, %v3011_v54  ;;  %v3332_v20 = vrot.slane %v3331_v0, 1  ;;  %v3305_v50 = vmax.f32 %v3303_v56, %v3304_v58 }
 0x316   :  { %v3326_v42 = vmax.f32 %v3324_v33, %v3325_v63  ;;  %3090 = vmatmul.f32.gmra.mxu1 %v3012_v44  ;;  %v3062_v12 = vadd.f32 %v6282_v61, %v3061_v36  ;;  %v3059_v43 = vadd.f32 %v6282_v61, %v3058_v4 }
 0x317   :  { %v3756_v57 = vsel %vm2894_vm1, %v7724_v25, %v7721_v14  ;;  %v3333_v59 = vmax.f32 %v3331_v0, %v3332_v20 }
 0x318   :  { %v3757_v51 = vsel %vm2896_vm2, %v3672_v41, %v3756_v57  ;;  %v3676_v35 = vmax.f32 %v3298_v55, %v3326_v42  ;;  %v3099_v6 = vmax.f32 %v3062_v12, 0.0  ;;  %v3098_v45 = vmax.f32 %v3059_v43, 0.0 }
 0x319   :  { %v3758_v10 = vsel %vm2898_vm3, %v3673_v48, %v3757_v51  ;;  %v3677_v9 = vmax.f32 %v3305_v50, %v3333_v59 }
 0x31a   :  { %v3759_v60 = vsel %vm2900_vm4, %v3674_v8, %v3758_v10  ;;  %v3064_v52 = vpop.f32.mrf.mxu1  ;;  %v3141_v15 = vrot.slane %v3099_v6, 2  ;;  %v3138_v53 = vrot.slane %v3098_v45, 2  ;;  %v3139_v23 = vrot.slane %v3098_v45, 4 }
 0x31b   :  { %v3760_v62 = vsel %vm2902_vm5, %v3675_v30, %v3759_v60  ;;  %v3362_v16 = vsel %vm823_vm0, %v3099_v6, -inf  ;;  %v3142_v46 = vrot.slane %v3099_v6, 4  ;;  %v3140_v3 = vrot.slane %v3098_v45, 6 }
 0x31c   :  { %v3761_v37 = vsel %vm2904_vm6, %v3676_v35, %v3760_v62  ;;  %v3334_v18 = vsel %vm823_vm0, %v3098_v45, -inf  ;;  %v3369_v1 = vsel %vm823_vm0, %v3141_v15, -inf  ;;  %v3065_v34 = vadd.f32 %v6282_v61, %v3064_v52 }
 0x31d   :  { %v3762_v29 = vsel %vm2906_vm7, %v3677_v9, %v3761_v37  ;;  %v3341_v4 = vsel %vm823_vm0, %v3138_v53, -inf  ;;  %v3348_v47 = vsel %vm823_vm0, %v3139_v23, -inf  ;;  %v3363_v40 = vrot.slane %v3362_v16, 4 }
 0x31e   :  { %3804 = vmatmul.f32.vlgmr.msrb.gmra.mxu2 %v3762_v29  ;;  %v3335_v31 = vrot.slane %v3334_v18, 4  ;;  %v3143_v17 = vrot.slane %v3099_v6, 6  ;;  %v3370_v38 = vrot.slane %v3369_v1, 4  ;;  %v3376_v33 = vsel %vm823_vm0, %v3142_v46, -inf }
 0x31f   :  { %v3342_v39 = vrot.slane %v3341_v4, 4  ;;  %v3349_v56 = vrot.slane %v3348_v47, 4  ;;  %v3355_v22 = vsel %vm823_vm0, %v3140_v3, -inf  ;;  %v3100_v28 = vmax.f32 %v3065_v34, 0.0 }
 0x320   :  { %v3364_v54 = vmax.f32 %v3362_v16, %v3363_v40  ;;  %v3377_v55 = vrot.slane %v3376_v33, 4  ;;  %v3336_v63 = vmax.f32 %v3334_v18, %v3335_v31  ;;  %v3356_v11 = vrot.slane %v3355_v22, 4 }
 0x321   :  { %v3371_v21 = vmax.f32 %v3369_v1, %v3370_v38  ;;  %v3383_v41 = vsel %vm823_vm0, %v3143_v17, -inf  ;;  %v3343_v32 = vmax.f32 %v3341_v4, %v3342_v39  ;;  %v3350_v58 = vmax.f32 %v3348_v47, %v3349_v56 }
 0x322   :  { %v3067_v2 = vpop.f32.mrf.mxu1  ;;  %v3144_v0 = vrot.slane %v3100_v28, 2  ;;  %v3390_v8 = vsel %vm823_vm0, %v3100_v28, -inf  ;;  %v3365_v42 = vrot.slane %v3364_v54, 2  ;;  %v3378_v27 = vmax.f32 %v3376_v33, %v3377_v55 }
 0x323   :  { %v3068_v19 = vadd.f32 %v6282_v61, %v3067_v2  ;;  %v3384_v48 = vrot.slane %v3383_v41, 4  ;;  %v3357_v13 = vmax.f32 %v3355_v22, %v3356_v11  ;;  %v3372_v49 = vrot.slane %v3371_v21, 2 }
 0x324   :  { %v3391_v14 = vrot.slane %v3390_v8, 4  ;;  %v3337_v5 = vrot.slane %v3336_v63, 2  ;;  %v3344_v7 = vrot.slane %v3343_v32, 2  ;;  %v3351_v25 = vrot.slane %v3350_v58, 2 }
 0x325   :  { %v6740_v26 = vmax.f32 %v3068_v19, 0.0  ;;  %v3397_v57 = vsel %vm823_vm0, %v3144_v0, -inf  ;;  %v3366_v44 = vmax.f32 %v3364_v54, %v3365_v42  ;;  %v3145_v20 = vrot.slane %v3100_v28, 4 }
 0x326   :  { %v3379_v36 = vrot.slane %v3378_v27, 2  ;;  %v3385_v35 = vmax.f32 %v3383_v41, %v3384_v48  ;;  %v3373_v59 = vmax.f32 %v3371_v21, %v3372_v49  ;;  %v3392_v60 = vmax.f32 %v3390_v8, %v3391_v14  ;;  %v6760_v14 = vld [vmem:[%s7115_s2 + $0x1] ss:$0 sm:$0xff] }
 0x327   :  { %v3418_v61 = vsel %vm823_vm0, %v6740_v26, -inf  ;;  %v3147_v30 = vrot.slane %v6740_v26, 2  ;;  %v3148_v10 = vrot.slane %v6740_v26, 4  ;;  %v3398_v62 = vrot.slane %v3397_v57, 4 }
 0x328   :  { %v3419_v24 = vrot.slane %v3418_v61, 4  ;;  %v3338_v9 = vmax.f32 %v3336_v63, %v3337_v5  ;;  %v3345_v37 = vmax.f32 %v3343_v32, %v3344_v7  ;;  %v3352_v29 = vmax.f32 %v3350_v58, %v3351_v25 }
 0x329   :  { %v3425_v50 = vsel %vm823_vm0, %v3147_v30, -inf  ;;  %v3358_v52 = vrot.slane %v3357_v13, 2  ;;  %v3146_v12 = vrot.slane %v3100_v28, 6  ;;  %v3404_v43 = vsel %vm823_vm0, %v3145_v20, -inf }
 0x32a   :  { %v3420_v51 = vmax.f32 %v3418_v61, %v3419_v24  ;;  %v3426_v45 = vrot.slane %v3425_v50, 4  ;;  %v3367_v2 = vrot.slane %v3366_v44, 1  ;;  %v3380_v15 = vmax.f32 %v3378_v27, %v3379_v36  ;;  %v3070_v61 = vpop.f32.mrf.mxu1 }
 0x32b   :  { %v3386_v53 = vrot.slane %v3385_v35, 2  ;;  %v3432_v23 = vsel %vm823_vm0, %v3148_v10, -inf  ;;  %v3374_v16 = vrot.slane %v3373_v59, 1  ;;  %v3393_v19 = vrot.slane %v3392_v60, 2 }
 0x32c   :  { %v3421_v6 = vrot.slane %v3420_v51, 2  ;;  %v3399_v46 = vmax.f32 %v3397_v57, %v3398_v62  ;;  %v3149_v3 = vrot.slane %v6740_v26, 6  ;;  %v3339_v18 = vrot.slane %v3338_v9, 1 }
 0x32d   :  { %v3346_v1 = vrot.slane %v3345_v37, 1  ;;  %v3359_v34 = vmax.f32 %v3357_v13, %v3358_v52  ;;  %v3405_v4 = vrot.slane %v3404_v43, 4  ;;  %v3411_v47 = vsel %vm823_vm0, %v3146_v12, -inf }
 0x32e   :  { %v3422_v40 = vmax.f32 %v3420_v51, %v3421_v6  ;;  %v3427_v31 = vmax.f32 %v3425_v50, %v3426_v45  ;;  %v3433_v17 = vrot.slane %v3432_v23, 4  ;;  %v3353_v38 = vrot.slane %v3352_v29, 1 }
 0x32f   :  { %v3368_v33 = vmax.f32 %v3366_v44, %v3367_v2  ;;  %v3381_v39 = vrot.slane %v3380_v15, 1  ;;  %v3387_v56 = vmax.f32 %v3385_v35, %v3386_v53  ;;  %v3375_v22 = vmax.f32 %v3373_v59, %v3374_v16 }
 0x330   :  { %v3394_v28 = vmax.f32 %v3392_v60, %v3393_v19  ;;  %v3400_v54 = vrot.slane %v3399_v46, 2  ;;  %v3439_v55 = vsel %vm823_vm0, %v3149_v3, -inf  ;;  %v3340_v26 = vmax.f32 %v3338_v9, %v3339_v18 }
 0x331   :  { %v3360_v63 = vrot.slane %v3359_v34, 1  ;;  %v3406_v11 = vmax.f32 %v3404_v43, %v3405_v4  ;;  %v3412_v21 = vrot.slane %v3411_v47, 4  ;;  %v3347_v41 = vmax.f32 %v3345_v37, %v3346_v1 }
 0x332   :  { %v3423_v32 = vrot.slane %v3422_v40, 1  ;;  %v3428_v58 = vrot.slane %v3427_v31, 2  ;;  %v3434_v0 = vmax.f32 %v3432_v23, %v3433_v17  ;;  %v3354_v8 = vmax.f32 %v3352_v29, %v3353_v38 }
 0x333   :  { %v3382_v42 = vmax.f32 %v3380_v15, %v3381_v39  ;;  %v3388_v24 = vrot.slane %v3387_v56, 1  ;;  %v3440_v27 = vrot.slane %v3439_v55, 4  ;;  %v3678_v48 = vmax.f32 %v3340_v26, %v3368_v33 }
 0x334   :  { %v3679_v30 = vmax.f32 %v3347_v41, %v3375_v22  ;;  %v3395_v13 = vrot.slane %v3394_v28, 1  ;;  %v3401_v49 = vmax.f32 %v3399_v46, %v3400_v54  ;;  %v3071_v5 = vadd.f32 %v6760_v14, %v3070_v61 }
 0x335   :  { %v3361_v7 = vmax.f32 %v3359_v34, %v3360_v63  ;;  %v3407_v25 = vrot.slane %v3406_v11, 2  ;;  %v3413_v57 = vmax.f32 %v3411_v47, %v3412_v21  ;;  %v3424_v20 = vmax.f32 %v3422_v40, %v3423_v32 }
 0x336   :  { %v3402_v44 = vrot.slane %v3401_v49, 1  ;;  %v3429_v51 = vmax.f32 %v3427_v31, %v3428_v58  ;;  %v3435_v36 = vrot.slane %v3434_v0, 2  ;;  %v3389_v35 = vmax.f32 %v3387_v56, %v3388_v24 }
 0x337   :  { %v3408_v10 = vmax.f32 %v3406_v11, %v3407_v25  ;;  %v3414_v50 = vrot.slane %v3413_v57, 2  ;;  %v3441_v59 = vmax.f32 %v3439_v55, %v3440_v27  ;;  %v3396_v60 = vmax.f32 %v3394_v28, %v3395_v13 }
 0x338   :  { %v3430_v62 = vrot.slane %v3429_v51, 1  ;;  %v3436_v9 = vmax.f32 %v3434_v0, %v3435_v36  ;;  %v3680_v37 = vmax.f32 %v3354_v8, %v3382_v42  ;;  %v3403_v29 = vmax.f32 %v3401_v49, %v3402_v44 }
 0x339   :  { %v3409_v52 = vrot.slane %v3408_v10, 1  ;;  %v3415_v12 = vmax.f32 %v3413_v57, %v3414_v50  ;;  %v3442_v43 = vrot.slane %v3441_v59, 2  ;;  %v3682_v15 = vmax.f32 %v3396_v60, %v3424_v20 }
 0x33a   :  { %v3431_v45 = vmax.f32 %v3429_v51, %v3430_v62  ;;  %v3437_v2 = vrot.slane %v3436_v9, 1  ;;  %v3763_v53 = vsel %vm2894_vm1, %v3679_v30, %v3678_v48  ;;  %v3102_v23 = vmax.f32 %v3071_v5, 0.0 }
 0x33b   :  { %v3443_v16 = vmax.f32 %v3441_v59, %v3442_v43  ;;  %v3681_v19 = vmax.f32 %v3361_v7, %v3389_v35  ;;  %v3410_v46 = vmax.f32 %v3408_v10, %v3409_v52  ;;  %v3764_v1 = vsel %vm2896_vm2, %v3680_v37, %v3763_v53 }
 0x33c   :  { %v3438_v3 = vmax.f32 %v3436_v9, %v3437_v2  ;;  %v3683_v18 = vmax.f32 %v3403_v29, %v3431_v45  ;;  %v3416_v34 = vrot.slane %v3415_v12, 1  ;;  %v3150_v38 = vrot.slane %v3102_v23, 2 }
 0x33d   :  { %v3444_v4 = vrot.slane %v3443_v16, 1  ;;  %v3765_v47 = vsel %vm2898_vm3, %v3681_v19, %v3764_v1  ;;  %v3151_v33 = vrot.slane %v3102_v23, 4  ;;  %v3446_v39 = vsel %vm823_vm0, %v3102_v23, -inf }
 0x33e   :  { %v3684_v31 = vmax.f32 %v3410_v46, %v3438_v3  ;;  %v3766_v17 = vsel %vm2900_vm4, %v3682_v15, %v3765_v47  ;;  %v3417_v28 = vmax.f32 %v3415_v12, %v3416_v34  ;;  %v3152_v54 = vrot.slane %v3102_v23, 6 }
 0x33f   :  { %v3445_v56 = vmax.f32 %v3443_v16, %v3444_v4  ;;  %v3767_v22 = vsel %vm2902_vm5, %v3683_v18, %v3766_v17  ;;  %v3447_v26 = vrot.slane %v3446_v39, 4  ;;  %v3453_v63 = vsel %vm823_vm0, %v3150_v38, -inf }
 0x340   :  { %v3073_v6 = vpop.f32.mrf.mxu1  ;;  %v3768_v61 = vsel %vm2904_vm6, %v3684_v31, %v3767_v22  ;;  %v3460_v21 = vsel %vm823_vm0, %v3151_v33, -inf  ;;  %v3454_v58 = vrot.slane %v3453_v63, 4  ;;  %v3467_v0 = vsel %vm823_vm0, %v3152_v54, -inf }
 0x341   :  { %v3074_v40 = vadd.f32 %v6760_v14, %v3073_v6  ;;  %v3685_v11 = vmax.f32 %v3417_v28, %v3445_v56  ;;  %v3448_v42 = vmax.f32 %v3446_v39, %v3447_v26  ;;  %v3461_v24 = vrot.slane %v3460_v21, 4 }
 0x342   :  { %v3468_v27 = vrot.slane %v3467_v0, 4  ;;  %v3455_v13 = vmax.f32 %v3453_v63, %v3454_v58 }
 0x343   :  { %v3103_v55 = vmax.f32 %v3074_v40, 0.0  ;;  %v3769_v32 = vsel %vm2906_vm7, %v3685_v11, %v3768_v61  ;;  %v3449_v5 = vrot.slane %v3448_v42, 2  ;;  %v3462_v7 = vmax.f32 %v3460_v21, %v3461_v24 }
 0x344   :  { %3807 = vmatmul.f32.gmra.mxu2 %v3769_v32  ;;  %v3469_v20 = vmax.f32 %v3467_v0, %v3468_v27  ;;  %v3456_v35 = vrot.slane %v3455_v13, 2 }
 0x345   :  { %v3153_v8 = vrot.slane %v3103_v55, 2  ;;  %v3154_v48 = vrot.slane %v3103_v55, 4  ;;  %v3474_v30 = vsel %vm823_vm0, %v3103_v55, -inf  ;;  %v3155_v57 = vrot.slane %v3103_v55, 6 }
 0x346   :  { %v3475_v44 = vrot.slane %v3474_v30, 4  ;;  %v3450_v50 = vmax.f32 %v3448_v42, %v3449_v5  ;;  %v3463_v59 = vrot.slane %v3462_v7, 2  ;;  %v3470_v52 = vrot.slane %v3469_v20, 2 }
 0x347   :  { %v3481_v49 = vsel %vm823_vm0, %v3153_v8, -inf  ;;  %v3488_v36 = vsel %vm823_vm0, %v3154_v48, -inf  ;;  %v3495_v29 = vsel %vm823_vm0, %v3155_v57, -inf  ;;  %v3457_v6 = vmax.f32 %v3455_v13, %v3456_v35 }
 0x348   :  { %v3482_v51 = vrot.slane %v3481_v49, 4  ;;  %v3476_v9 = vmax.f32 %v3474_v30, %v3475_v44  ;;  %v3489_v37 = vrot.slane %v3488_v36, 4  ;;  %v3451_v45 = vrot.slane %v3450_v50, 1 }
 0x349   :  { %v3464_v2 = vmax.f32 %v3462_v7, %v3463_v59  ;;  %v3496_v15 = vrot.slane %v3495_v29, 4  ;;  %v6786_v3 = vmax.f32 %v3469_v20, %v3470_v52  ;;  %v3458_v1 = vrot.slane %v3457_v6, 1 }
 0x34a   :  { %v3483_v12 = vmax.f32 %v3481_v49, %v3482_v51  ;;  %v3477_v23 = vrot.slane %v3476_v9, 2  ;;  %v3490_v16 = vmax.f32 %v3488_v36, %v3489_v37  ;;  %v6789_v47 = vmax.f32 %v3450_v50, %v3451_v45 }
 0x34b   :  { %v3465_v40 = vrot.slane %v3464_v2, 1  ;;  %v3497_v39 = vmax.f32 %v3495_v29, %v3496_v15  ;;  %v3472_v22 = vrot.slane %v6786_v3, 1  ;;  %v6794_v26 = vmax.f32 %v3457_v6, %v3458_v1 }
 0x34c   :  { %v3484_v18 = vrot.slane %v3483_v12, 2  ;;  %v3478_v38 = vmax.f32 %v3476_v9, %v3477_v23  ;;  %v3491_v33 = vrot.slane %v3490_v16, 2 }
 0x34d   :  { %v3076_v41 = vpop.f32.mrf.mxu1  ;;  %v3498_v24 = vrot.slane %v3497_v39, 2 }
 0x34e   :  { %v3077_v25 = vadd.f32 %v6760_v14, %v3076_v41  ;;  %v3485_v28 = vmax.f32 %v3483_v12, %v3484_v18  ;;  %v6798_v41 = vmax.f32 %v3464_v2, %v3465_v40  ;;  %v3479_v8 = vrot.slane %v3478_v38, 1 }
 0x34f   :  { %v3492_v42 = vmax.f32 %v3490_v16, %v3491_v33  ;;  %v3499_v35 = vmax.f32 %v3497_v39, %v3498_v24 }
 0x350   :  { %v3104_v60 = vmax.f32 %v3077_v25, 0.0  ;;  %v3486_v48 = vrot.slane %v3485_v28, 1  ;;  %v3480_v29 = vmax.f32 %v3478_v38, %v3479_v8 }
 0x351   :  { %v3500_v18 = vrot.slane %v3499_v35, 1 }
 0x352   :  { %v3502_v53 = vsel %vm823_vm0, %v3104_v60, -inf  ;;  %v3156_v19 = vrot.slane %v3104_v60, 2  ;;  %v3157_v31 = vrot.slane %v3104_v60, 4  ;;  %v3158_v54 = vrot.slane %v3104_v60, 6 }
 0x353   :  { %v3503_v34 = vrot.slane %v3502_v53, 4  ;;  %v3493_v60 = vrot.slane %v3492_v42, 1  ;;  %v3487_v52 = vmax.f32 %v3485_v28, %v3486_v48 }
 0x354   :  { %v3509_v56 = vsel %vm823_vm0, %v3156_v19, -inf  ;;  %v3516_v58 = vsel %vm823_vm0, %v3157_v31, -inf  ;;  %v3523_v30 = vsel %vm823_vm0, %v3158_v54, -inf }
 0x355   :  { %v3504_v63 = vmax.f32 %v3502_v53, %v3503_v34  ;;  %v3510_v32 = vrot.slane %v3509_v56, 4  ;;  %v3517_v7 = vrot.slane %v3516_v58, 4  ;;  %v3687_v38 = vmax.f32 %v6794_v26, %v3487_v52 }
 0x357   :  { %v3505_v5 = vrot.slane %v3504_v63, 2  ;;  %v3511_v44 = vmax.f32 %v3509_v56, %v3510_v32  ;;  %v3518_v6 = vmax.f32 %v3516_v58, %v3517_v7 }
 0x359   :  { %v3506_v12 = vmax.f32 %v3504_v63, %v3505_v5  ;;  %v3512_v45 = vrot.slane %v3511_v44, 2 }
 0x35a   :  { %v3079_v10 = vpop.f32.mrf.mxu1 }
 0x35b   :  { %v3080_v62 = vadd.f32 %v6760_v14, %v3079_v10  ;;  %v3507_v40 = vrot.slane %v3506_v12, 1  ;;  %v3513_v56 = vmax.f32 %v3511_v44, %v3512_v45 }
 0x35d   :  { %v6781_v43 = vmax.f32 %v3080_v62, 0.0  ;;  %v3524_v62 = vrot.slane %v3523_v30, 4  ;;  %v3508_v8 = vmax.f32 %v3506_v12, %v3507_v40 }
 0x35f   :  { %v3530_v46 = vsel %vm823_vm0, %v6781_v43, -inf  ;;  %v3159_v4 = vrot.slane %v6781_v43, 2  ;;  %v3160_v55 = vrot.slane %v6781_v43, 4  ;;  %v3161_v10 = vrot.slane %v6781_v43, 6 }
 0x360   :  { %v3531_v17 = vrot.slane %v3530_v46, 4  ;;  %v3525_v34 = vmax.f32 %v3523_v30, %v3524_v62 }
 0x361   :  { %v3537_v11 = vsel %vm823_vm0, %v3159_v4, -inf  ;;  %v3544_v49 = vsel %vm823_vm0, %v3160_v55, -inf  ;;  %v3551_v43 = vsel %vm823_vm0, %v3161_v10, -inf  ;;  %v3686_v4 = vmax.f32 %v6789_v47, %v3480_v29 }
 0x362   :  { %v3532_v0 = vmax.f32 %v3530_v46, %v3531_v17  ;;  %v3538_v13 = vrot.slane %v3537_v11, 4  ;;  %v3545_v50 = vrot.slane %v3544_v49, 4  ;;  %v3494_v46 = vmax.f32 %v3492_v42, %v3493_v60 }
 0x363   :  { %v3552_v39 = vrot.slane %v3551_v43, 4  ;;  %v3519_v55 = vrot.slane %v3518_v6, 2  ;;  %v3526_v32 = vrot.slane %v3525_v34, 2  ;;  %v3514_v42 = vrot.slane %v3513_v56, 1 }
 0x364   :  { %v3533_v20 = vrot.slane %v3532_v0, 2  ;;  %v3539_v9 = vmax.f32 %v3537_v11, %v3538_v13  ;;  %v3546_v23 = vmax.f32 %v3544_v49, %v3545_v50  ;;  %v3473_v11 = vmax.f32 %v6786_v3, %v3472_v22 }
 0x365   :  { %v3553_v48 = vmax.f32 %v3551_v43, %v3552_v39  ;;  %v3520_v5 = vmax.f32 %v3518_v6, %v3519_v55  ;;  %v3527_v7 = vmax.f32 %v3525_v34, %v3526_v32  ;;  %v3770_v50 = vsel %vm2894_vm1, %v3687_v38, %v3686_v4 }
 0x366   :  { %v3534_v2 = vmax.f32 %v3532_v0, %v3533_v20  ;;  %v3540_v1 = vrot.slane %v3539_v9, 2  ;;  %v3515_v52 = vmax.f32 %v3513_v56, %v3514_v42 }
 0x367   :  { %v3082_v61 = vpop.f32.mrf.mxu1  ;;  %v3554_v22 = vrot.slane %v3553_v48, 2  ;;  %v3528_v6 = vrot.slane %v3527_v7, 1 }
 0x368   :  { %v3083_v21 = vadd.f32 %v6760_v14, %v3082_v61  ;;  %v3535_v33 = vrot.slane %v3534_v2, 1  ;;  %v3547_v61 = vrot.slane %v3546_v23, 2  ;;  %v3541_v47 = vmax.f32 %v3539_v9, %v3540_v1 }
 0x369   :  { %v3555_v10 = vmax.f32 %v3553_v48, %v3554_v22  ;;  %v3521_v9 = vrot.slane %v3520_v5, 1 }
 0x36a   :  { %v3106_v27 = vmax.f32 %v3083_v21, 0.0  ;;  %v3501_v21 = vmax.f32 %v3499_v35, %v3500_v18  ;;  %v3536_v24 = vmax.f32 %v3534_v2, %v3535_v33  ;;  %v3542_v3 = vrot.slane %v3541_v47, 1 }
 0x36b   :  { %v3556_v43 = vrot.slane %v3555_v10, 1  ;;  %v3522_v1 = vmax.f32 %v3520_v5, %v3521_v9 }
 0x36c   :  { %v3162_v25 = vrot.slane %v3106_v27, 2  ;;  %v3558_v57 = vsel %vm823_vm0, %v3106_v27, -inf  ;;  %v3163_v51 = vrot.slane %v3106_v27, 4  ;;  %v3164_v36 = vrot.slane %v3106_v27, 6 }
 0x36d   :  { %v3559_v59 = vrot.slane %v3558_v57, 4  ;;  %v3548_v27 = vmax.f32 %v3546_v23, %v3547_v61  ;;  %v3690_v45 = vmax.f32 %v3508_v8, %v3536_v24  ;;  %v3557_v55 = vmax.f32 %v3555_v10, %v3556_v43 }
 0x36e   :  { %v3565_v37 = vsel %vm823_vm0, %v3162_v25, -inf  ;;  %v3572_v15 = vsel %vm823_vm0, %v3163_v51, -inf  ;;  %v3579_v53 = vsel %vm823_vm0, %v3164_v36, -inf  ;;  %v3688_v25 = vmax.f32 %v6798_v41, %v3494_v46 }
 0x36f   :  { %v3560_v16 = vmax.f32 %v3558_v57, %v3559_v59  ;;  %v3566_v19 = vrot.slane %v3565_v37, 4  ;;  %v3573_v31 = vrot.slane %v3572_v15, 4  ;;  %v3580_v17 = vrot.slane %v3579_v53, 4 }
 0x370   :  { %v3549_v35 = vrot.slane %v3548_v27, 1  ;;  %v3543_v41 = vmax.f32 %v3541_v47, %v3542_v3  ;;  %v3771_v2 = vsel %vm2896_vm2, %v3688_v25, %v3770_v50 }
 0x371   :  { %v3561_v28 = vrot.slane %v3560_v16, 2  ;;  %v3567_v54 = vmax.f32 %v3565_v37, %v3566_v19  ;;  %v3574_v58 = vmax.f32 %v3572_v15, %v3573_v31  ;;  %v6814_v0 = vmax.f32 %v3579_v53, %v3580_v17 }
 0x372   :  { %v3550_v23 = vmax.f32 %v3548_v27, %v3549_v35  ;;  %v3691_v40 = vmax.f32 %v3515_v52, %v3543_v41  ;;  %v4282_v41 = vld [vmem:[%s7114_s1 + $0x1e8] sm:$0xff] }
 0x373   :  { %v6817_v30 = vmax.f32 %v3560_v16, %v3561_v28  ;;  %v3568_v13 = vrot.slane %v3567_v54, 2  ;;  %v3575_v36 = vrot.slane %v3574_v58, 2  ;;  %v3689_v16 = vmax.f32 %v3473_v11, %v3501_v21 }
 0x374   :  { %v3582_v19 = vrot.slane %v6814_v0, 2  ;;  %v3529_v28 = vmax.f32 %v3527_v7, %v3528_v6  ;;  %v3692_v61 = vmax.f32 %v3522_v1, %v3550_v23  ;;  %v4281_v23 = vld [vmem:[%s7114_s1 + $0x1e0] sm:$0xff] }
 0x375   :  { %v3772_v31 = vsel %vm2898_vm3, %v3689_v16, %v3771_v2  ;;  %v3569_v17 = vmax.f32 %v3567_v54, %v3568_v13  ;;  %v3576_v56 = vmax.f32 %v3574_v58, %v3575_v36  ;;  %v3563_v58 = vrot.slane %v6817_v30, 1 }
 0x376   :  { %v3773_v39 = vsel %vm2900_vm4, %v3690_v45, %v3772_v31  ;;  %v6836_v13 = vmax.f32 %v6814_v0, %v3582_v19  ;;  %v4284_v0 = vld [vmem:[%s7114_s1 + $0x1f8] sm:$0xff] }
 0x377   :  { %v3774_v42 = vsel %vm2902_vm5, %v3691_v40, %v3773_v39  ;;  %v3570_v5 = vrot.slane %v3569_v17, 1  ;;  %v3577_v25 = vrot.slane %v3576_v56, 1  ;;  %4007 = vmatpush.msrb.mxu3 %v4284_v0  ;;  %v4280_v40 = vld [vmem:[%s7114_s1 + $0x1d8] sm:$0xff] }
 0x378   :  { %v3775_v22 = vsel %vm2904_vm6, %v3692_v61, %v3774_v42  ;;  %v3584_v9 = vrot.slane %v6836_v13, 1  ;;  %v4279_v61 = vld [vmem:[%s7114_s1 + $0x1d0] sm:$0xff] }
 0x379   :  { %v6853_v6 = vmax.f32 %v3576_v56, %v3577_v25 }
 0x37a   :  { %v3085_v63 = vpop.f32.mrf.mxu1 }
 0x37b   :  { %v3086_v26 = vadd.f32 %v6760_v14, %v3085_v63 }
 0x37d   :  { %v3107_v49 = vmax.f32 %v3086_v26, 0.0 }
 0x37f   :  { %v3165_v57 = vrot.slane %v3107_v49, 2  ;;  %v3166_v44 = vrot.slane %v3107_v49, 4  ;;  %v3167_v20 = vrot.slane %v3107_v49, 6  ;;  %v3586_v51 = vsel %vm823_vm0, %v3107_v49, -inf }
 0x380   :  { %v3587_v59 = vrot.slane %v3586_v51, 4  ;;  %v3693_v49 = vmax.f32 %v3529_v28, %v3557_v55 }
 0x381   :  { %v3593_v60 = vsel %vm823_vm0, %v3165_v57, -inf  ;;  %v3600_v62 = vsel %vm823_vm0, %v3166_v44, -inf  ;;  %v3607_v12 = vsel %vm823_vm0, %v3167_v20, -inf }
 0x382   :  { %v3594_v37 = vrot.slane %v3593_v60, 4  ;;  %v3601_v29 = vrot.slane %v3600_v62, 4  ;;  %v3588_v46 = vmax.f32 %v3586_v51, %v3587_v59  ;;  %v3608_v4 = vrot.slane %v3607_v12, 4  ;;  %v4283_v59 = vld [vmem:[%s7114_s1 + $0x1f0] sm:$0xff] }
 0x383   :  { %v3776_v20 = vsel %vm2906_vm7, %v3693_v49, %v3775_v22  ;;  %4008 = vmatpush.msrb.mxu3 %v4283_v59  ;;  %v3585_v59 = vmax.f32 %v6836_v13, %v3584_v9 }
 0x384   :  { %v3595_v15 = vmax.f32 %v3593_v60, %v3594_v37  ;;  %v3602_v34 = vmax.f32 %v3600_v62, %v3601_v29  ;;  %v3589_v63 = vrot.slane %v3588_v46, 2  ;;  %v3609_v26 = vmax.f32 %v3607_v12, %v3608_v4  ;;  %3810 = vmatmul.f32.gmra.mxu2 %v3776_v20 }
 0x385   :  { %v3564_v60 = vmax.f32 %v6817_v30, %v3563_v58  ;;  %v3571_v12 = vmax.f32 %v3569_v17, %v3570_v5  ;;  %4009 = vmatpush.msrb.mxu3 %v4282_v41 }
 0x386   :  { %v3088_v53 = vpop.f32.mrf.mxu1  ;;  %v3596_v38 = vrot.slane %v3595_v15, 2  ;;  %v3603_v47 = vrot.slane %v3602_v34, 2  ;;  %v3590_v7 = vmax.f32 %v3588_v46, %v3589_v63  ;;  %v3610_v35 = vrot.slane %v3609_v26, 2 }
 0x387   :  { %v3089_v18 = vadd.f32 %v6760_v14, %v3088_v53  ;;  %4010 = vmatpush.msrb.mxu3 %v4281_v23 }
 0x388   :  { %v3597_v24 = vmax.f32 %v3595_v15, %v3596_v38  ;;  %v3604_v36 = vmax.f32 %v3602_v34, %v3603_v47  ;;  %v3591_v37 = vrot.slane %v3590_v7, 1  ;;  %v3611_v53 = vmax.f32 %v3609_v26, %v3610_v35 }
 0x389   :  { %v3108_v33 = vmax.f32 %v3089_v18, 0.0  ;;  %4011 = vmatpush.msrb.mxu3 %v4280_v40  ;;  %v4275_v40 = vld [vmem:[%s7114_s1 + $0x1b0] sm:$0xff] }
 0x38a   :  { %v3598_v51 = vrot.slane %v3597_v24, 1  ;;  %v3605_v30 = vrot.slane %v3604_v36, 1  ;;  %v3592_v18 = vmax.f32 %v3590_v7, %v3591_v37 }
 0x38b   :  { %v3168_v11 = vrot.slane %v3108_v33, 2  ;;  %v3169_v21 = vrot.slane %v3108_v33, 4  ;;  %v3614_v32 = vsel %vm823_vm0, %v3108_v33, -inf  ;;  %v3170_v8 = vrot.slane %v3108_v33, 6  ;;  %4012 = vmatpush.msrb.mxu3 %v4279_v61 }
 0x38c   :  { %v3615_v54 = vrot.slane %v3614_v32, 4  ;;  %v3599_v15 = vmax.f32 %v3597_v24, %v3598_v51  ;;  %v3606_v63 = vmax.f32 %v3604_v36, %v3605_v30  ;;  %v4278_v24 = vld [vmem:[%s7114_s1 + $0x1c8] sm:$0xff] }
 0x38d   :  { %v3621_v27 = vsel %vm823_vm0, %v3168_v11, -inf  ;;  %v3628_v48 = vsel %vm823_vm0, %v3169_v21, -inf  ;;  %v3635_v44 = vsel %vm823_vm0, %v3170_v8, -inf  ;;  %v3612_v11 = vrot.slane %v3611_v53, 1  ;;  %4013 = vmatpush.msrb.mxu3 %v4278_v24 }
 0x38e   :  { %v3622_v3 = vrot.slane %v3621_v27, 4  ;;  %v3629_v57 = vrot.slane %v3628_v48, 4  ;;  %v3616_v10 = vmax.f32 %v3614_v32, %v3615_v54  ;;  %v3636_v52 = vrot.slane %v3635_v44, 4 }
 0x38f   :  { %v3695_v21 = vmax.f32 %v3571_v12, %v3599_v15  ;;  %v3694_v54 = vmax.f32 %v3564_v60, %v3592_v18  ;;  %v3613_v25 = vmax.f32 %v3611_v53, %v3612_v11 }
 0x390   :  { %v3623_v29 = vmax.f32 %v3621_v27, %v3622_v3  ;;  %v3630_v45 = vmax.f32 %v3628_v48, %v3629_v57  ;;  %v3637_v4 = vmax.f32 %v3635_v44, %v3636_v52  ;;  %v3696_v57 = vmax.f32 %v6853_v6, %v3606_v63 }
 0x391   :  { %v3777_v44 = vsel %vm2894_vm1, %v3695_v21, %v3694_v54 }
 0x392   :  { %v3624_v1 = vrot.slane %v3623_v29, 2  ;;  %v3631_v33 = vrot.slane %v3630_v45, 2  ;;  %v3638_v58 = vrot.slane %v3637_v4, 2  ;;  %v3778_v41 = vsel %vm2896_vm2, %v3696_v57, %v3777_v44  ;;  %v4269_v57 = vld [vmem:[%s7114_s1 + $0x180] sm:$0xff] }
 0x393   :  { %v3091_v50 = vpop.f32.mrf.mxu1 }
 0x394   :  { %v3092_v62 = vadd.f32 %v6760_v14, %v3091_v50  ;;  %v3617_v14 = vrot.slane %v3616_v10, 2  ;;  %v3625_v27 = vmax.f32 %v3623_v29, %v3624_v1  ;;  %v3632_v48 = vmax.f32 %v3630_v45, %v3631_v33  ;;  %v4272_v33 = vld [vmem:[%s7114_s1 + $0x198] sm:$0xff] }
 0x395   :  { %v3639_v0 = vmax.f32 %v3637_v4, %v3638_v58  ;;  %v3697_v45 = vmax.f32 %v3585_v59, %v3613_v25  ;;  %v4276_v4 = vld [vmem:[%s7114_s1 + $0x1b8] sm:$0xff]  ;;  %v4270_v25 = vld [vmem:[%s7114_s1 + $0x188] sm:$0xff] }
 0x396   :  { %v3109_v2 = vmax.f32 %v3092_v62, 0.0  ;;  %v3618_v32 = vmax.f32 %v3616_v10, %v3617_v14  ;;  %v3626_v10 = vrot.slane %v3625_v27, 1  ;;  %v3633_v50 = vrot.slane %v3632_v48, 1 }
 0x397   :  { %v3640_v30 = vrot.slane %v3639_v0, 1  ;;  %v3779_v14 = vsel %vm2898_vm3, %v3697_v45, %v3778_v41 }
 0x398   :  { %v3171_v43 = vrot.slane %v3109_v2, 2  ;;  %v3172_v16 = vrot.slane %v3109_v2, 4  ;;  %v3173_v19 = vrot.slane %v3109_v2, 6  ;;  %v3642_v46 = vsel %vm823_vm0, %v3109_v2, -inf }
 0x399   :  { %v3643_v34 = vrot.slane %v3642_v46, 4  ;;  %v3619_v22 = vrot.slane %v3618_v32, 1  ;;  %v3627_v2 = vmax.f32 %v3625_v27, %v3626_v10  ;;  %v3634_v15 = vmax.f32 %v3632_v48, %v3633_v50 }
 0x39a   :  { %v3649_v31 = vsel %vm823_vm0, %v3171_v43, -inf  ;;  %v3656_v17 = vsel %vm823_vm0, %v3172_v16, -inf  ;;  %v3663_v38 = vsel %vm823_vm0, %v3173_v19, -inf  ;;  %v3641_v9 = vmax.f32 %v3639_v0, %v3640_v30 }
 0x39b   :  { %v3644_v39 = vmax.f32 %v3642_v46, %v3643_v34  ;;  %v3650_v56 = vrot.slane %v3649_v31, 4  ;;  %v3657_v28 = vrot.slane %v3656_v17, 4  ;;  %v3664_v55 = vrot.slane %v3663_v38, 4  ;;  %v4277_v34 = vld [vmem:[%s7114_s1 + $0x1c0] sm:$0xff] }
 0x39c   :  { %v3620_v29 = vmax.f32 %v3618_v32, %v3619_v22  ;;  %4014 = vmatpush.msrb.mxu3 %v4277_v34 }
 0x39d   :  { %v3645_v47 = vrot.slane %v3644_v39, 2  ;;  %v3651_v26 = vmax.f32 %v3649_v31, %v3650_v56  ;;  %v3658_v8 = vmax.f32 %v3656_v17, %v3657_v28  ;;  %v3665_v42 = vmax.f32 %v3663_v38, %v3664_v55  ;;  %v4274_v31 = vld [vmem:[%s7114_s1 + $0x1a8] sm:$0xff]  ;;  %v4273_v38 = vld [vmem:[%s7114_s1 + $0x1a0] sm:$0xff] }
 0x39e   :  { %4015 = vmatpush.msrb.mxu3 %v4276_v4  ;;  %v6906_v56 = vld [vmem:[%s7115_s2 + $0x2] ss:$0 sm:$0xff] }
 0x39f   :  { %v3646_v49 = vmax.f32 %v3644_v39, %v3645_v47  ;;  %v3652_v5 = vrot.slane %v3651_v26, 2  ;;  %v3659_v7 = vrot.slane %v3658_v8, 2  ;;  %v3666_v3 = vrot.slane %v3665_v42, 2  ;;  %v4271_v39 = vld [vmem:[%s7114_s1 + $0x190] sm:$0xff] }
 0x3a0   :  { %4016 = vmatpush.msrb.mxu3 %v4275_v40 }
 0x3a1   :  { %v3647_v20 = vrot.slane %v3646_v49, 1  ;;  %v3653_v51 = vmax.f32 %v3651_v26, %v3652_v5  ;;  %v3660_v36 = vmax.f32 %v3658_v8, %v3659_v7  ;;  %v3667_v35 = vmax.f32 %v3665_v42, %v3666_v3  ;;  %v3805_v17 = vpop.f32.mrf.mxu2 }
 0x3a2   :  { %4017 = vmatpush.msrb.mxu3 %v4274_v31  ;;  %v3806_v28 = vadd.f32 %v6906_v56, %v3805_v17 }
 0x3a3   :  { %v3648_v60 = vmax.f32 %v3646_v49, %v3647_v20  ;;  %v3654_v62 = vrot.slane %v3653_v51, 1  ;;  %v3661_v37 = vrot.slane %v3660_v36, 1  ;;  %v3668_v52 = vrot.slane %v3667_v35, 1 }
 0x3a4   :  { %4018 = vmatpush.msrb.mxu3 %v4273_v38  ;;  %v3817_v61 = vmax.f32 %v3806_v28, 0.0  ;;  %v4301_v38 = vld [vmem:[%s7114_s1 + $0x278] sm:$0xff] }
 0x3a5   :  { %v3655_v12 = vmax.f32 %v3653_v51, %v3654_v62  ;;  %v3662_v6 = vmax.f32 %v3660_v36, %v3661_v37  ;;  %v3698_v53 = vmax.f32 %v3620_v29, %v3648_v60  ;;  %v3669_v23 = vmax.f32 %v3667_v35, %v3668_v52  ;;  %4091 = vmatpush.msra.mxu2 %v4301_v38 }
 0x3a6   :  { %4019 = vmatpush.msrb.mxu3 %v4272_v33  ;;  %v3825_v11 = vrot.slane %v3817_v61, 2  ;;  %v3826_v21 = vrot.slane %v3817_v61, 4  ;;  %v3827_v32 = vrot.slane %v3817_v61, 6  ;;  %v3849_v58 = vsel %vm823_vm0, %v3817_v61, -inf  ;;  %v4300_v33 = vld [vmem:[%s7114_s1 + $0x270] sm:$0xff] }
 0x3a7   :  { %v3699_v43 = vmax.f32 %v3627_v2, %v3655_v12  ;;  %v3700_v16 = vmax.f32 %v3634_v15, %v3662_v6  ;;  %v3780_v13 = vsel %vm2900_vm4, %v3698_v53, %v3779_v14  ;;  %v3701_v46 = vmax.f32 %v3641_v9, %v3669_v23  ;;  %4092 = vmatpush.msra.mxu2 %v4300_v33 }
 0x3a8   :  { %4020 = vmatpush.msrb.mxu3 %v4271_v39  ;;  %v3856_v42 = vsel %vm823_vm0, %v3825_v11, -inf  ;;  %v3863_v24 = vsel %vm823_vm0, %v3826_v21, -inf  ;;  %v3870_v54 = vsel %vm823_vm0, %v3827_v32, -inf  ;;  %v3850_v44 = vrot.slane %v3849_v58, 4 }
 0x3a9   :  { %v3781_v19 = vsel %vm2902_vm5, %v3699_v43, %v3780_v13  ;;  %v3857_v49 = vrot.slane %v3856_v42, 4  ;;  %v3864_v5 = vrot.slane %v3863_v24, 4  ;;  %v3871_v7 = vrot.slane %v3870_v54, 4 }
 0x3aa   :  { %v3782_v18 = vsel %vm2904_vm6, %v3700_v16, %v3781_v19  ;;  %4021 = vmatpush.msrb.mxu3 %v4270_v25  ;;  %v3851_v62 = vmax.f32 %v3849_v58, %v3850_v44 }
 0x3ab   :  { %v3783_v1 = vsel %vm2906_vm7, %v3701_v46, %v3782_v18  ;;  %v3858_v36 = vmax.f32 %v3856_v42, %v3857_v49  ;;  %v3865_v35 = vmax.f32 %v3863_v24, %v3864_v5  ;;  %v3872_v10 = vmax.f32 %v3870_v54, %v3871_v7  ;;  %v4298_v54 = vld [vmem:[%s7114_s1 + $0x260] sm:$0xff]  ;;  %v4297_v5 = vld [vmem:[%s7114_s1 + $0x258] sm:$0xff] }
 0x3ac   :  { %3813 = vmatmul.f32.gmra.mxu2 %v3783_v1  ;;  %4022 = vmatpush.msrb.mxu3 %v4269_v57  ;;  %v3852_v23 = vrot.slane %v3851_v62, 2 }
 0x3ad   :  { %v3859_v45 = vrot.slane %v3858_v36, 2  ;;  %v3866_v2 = vrot.slane %v3865_v35, 2  ;;  %v3873_v15 = vrot.slane %v3872_v10, 2 }
 0x3ae   :  { %v3853_v39 = vmax.f32 %v3851_v62, %v3852_v23 }
 0x3af   :  { %v3860_v46 = vmax.f32 %v3858_v36, %v3859_v45  ;;  %v3867_v18 = vmax.f32 %v3865_v35, %v3866_v2  ;;  %v3874_v1 = vmax.f32 %v3872_v10, %v3873_v15 }
 0x3b1   :  { %v3861_v11 = vrot.slane %v3860_v46, 1  ;;  %v3868_v21 = vrot.slane %v3867_v18, 1  ;;  %v3875_v32 = vrot.slane %v3874_v1, 1 }
 0x3b3   :  { %v3862_v7 = vmax.f32 %v3860_v46, %v3861_v11 }
 0x3c7   :  { %v3808_v55 = vpop.f32.mrf.mxu2 }
 0x3c8   :  { %v3809_v63 = vadd.f32 %v6906_v56, %v3808_v55 }
 0x3ca   :  { %v3818_v26 = vmax.f32 %v3809_v63, 0.0  ;;  %v4299_v63 = vld [vmem:[%s7114_s1 + $0x268] sm:$0xff] }
 0x3cb   :  { %4093 = vmatpush.msra.mxu2 %v4299_v63 }
 0x3cc   :  { %v3829_v27 = vrot.slane %v3818_v26, 4  ;;  %v3828_v3 = vrot.slane %v3818_v26, 2  ;;  %v3830_v22 = vrot.slane %v3818_v26, 6  ;;  %v3877_v50 = vsel %vm823_vm0, %v3818_v26, -inf }
 0x3cd   :  { %v3878_v41 = vrot.slane %v3877_v50, 4  ;;  %4094 = vmatpush.msra.mxu2 %v4298_v54 }
 0x3ce   :  { %v3891_v20 = vsel %vm823_vm0, %v3829_v27, -inf  ;;  %v3884_v0 = vsel %vm823_vm0, %v3828_v3, -inf  ;;  %v3898_v59 = vsel %vm823_vm0, %v3830_v22, -inf  ;;  %v3854_v27 = vrot.slane %v3853_v39, 1 }
 0x3cf   :  { %v3892_v60 = vrot.slane %v3891_v20, 4  ;;  %v3885_v12 = vrot.slane %v3884_v0, 4  ;;  %v3899_v6 = vrot.slane %v3898_v59, 4  ;;  %v3879_v13 = vmax.f32 %v3877_v50, %v3878_v41  ;;  %4095 = vmatpush.msra.mxu2 %v4297_v5 }
 0x3d0   :  { %v3869_v3 = vmax.f32 %v3867_v18, %v3868_v21  ;;  %v3876_v22 = vmax.f32 %v3874_v1, %v3875_v32  ;;  %v3855_v35 = vmax.f32 %v3853_v39, %v3854_v27 }
 0x3d1   :  { %v3893_v30 = vmax.f32 %v3891_v20, %v3892_v60  ;;  %v3886_v9 = vmax.f32 %v3884_v0, %v3885_v12  ;;  %v3900_v19 = vmax.f32 %v3898_v59, %v3899_v6  ;;  %v3880_v28 = vrot.slane %v3879_v13, 2 }
 0x3d2   :  { %v3961_v60 = vmax.f32 %v3855_v35, %v3869_v3  ;;  %v3962_v62 = vmax.f32 %v3862_v7, %v3876_v22 }
 0x3d3   :  { %v3894_v4 = vrot.slane %v3893_v30, 2  ;;  %v3887_v55 = vrot.slane %v3886_v9, 2  ;;  %v3901_v61 = vrot.slane %v3900_v19, 2 }
 0x3d5   :  { %v3895_v26 = vmax.f32 %v3893_v30, %v3894_v4  ;;  %v3888_v58 = vmax.f32 %v3886_v9, %v3887_v55  ;;  %v3902_v49 = vmax.f32 %v3900_v19, %v3901_v61  ;;  %v3999_v61 = vsel %vm2894_vm1, %v3962_v62, %v3961_v60  ;;  %v4294_v60 = vld [vmem:[%s7114_s1 + $0x240] sm:$0xff]  ;;  %v4293_v62 = vld [vmem:[%s7114_s1 + $0x238] sm:$0xff] }
 0x3d7   :  { %v3896_v57 = vrot.slane %v3895_v26, 1  ;;  %v3889_v0 = vrot.slane %v3888_v58, 1  ;;  %v3903_v59 = vrot.slane %v3902_v49, 1 }
 0x407   :  { %v3811_v47 = vpop.f32.mrf.mxu2 }
 0x408   :  { %v3812_v8 = vadd.f32 %v6906_v56, %v3811_v47 }
 0x40a   :  { %v3819_v48 = vmax.f32 %v3812_v8, 0.0 }
 0x40c   :  { %v3832_v51 = vrot.slane %v3819_v48, 4  ;;  %v3831_v37 = vrot.slane %v3819_v48, 2  ;;  %v3833_v29 = vrot.slane %v3819_v48, 6  ;;  %v3905_v53 = vsel %vm823_vm0, %v3819_v48, -inf }
 0x40d   :  { %v3906_v34 = vrot.slane %v3905_v53, 4  ;;  %v3881_v48 = vmax.f32 %v3879_v13, %v3880_v28 }
 0x40e   :  { %v3919_v52 = vsel %vm823_vm0, %v3832_v51, -inf  ;;  %v3912_v43 = vsel %vm823_vm0, %v3831_v37, -inf  ;;  %v3926_v16 = vsel %vm823_vm0, %v3833_v29, -inf }
 0x40f   :  { %v3920_v14 = vrot.slane %v3919_v52, 4  ;;  %v3913_v40 = vrot.slane %v3912_v43, 4  ;;  %v3927_v17 = vrot.slane %v3926_v16, 4  ;;  %v3907_v47 = vmax.f32 %v3905_v53, %v3906_v34 }
 0x410   :  { %v3882_v50 = vrot.slane %v3881_v48, 1 }
 0x411   :  { %v3921_v31 = vmax.f32 %v3919_v52, %v3920_v14  ;;  %v3914_v8 = vmax.f32 %v3912_v43, %v3913_v40  ;;  %v3928_v24 = vmax.f32 %v3926_v16, %v3927_v17  ;;  %v3908_v25 = vrot.slane %v3907_v47, 2 }
 0x412   :  { %v3897_v52 = vmax.f32 %v3895_v26, %v3896_v57  ;;  %v3883_v53 = vmax.f32 %v3881_v48, %v3882_v50  ;;  %v3890_v14 = vmax.f32 %v3888_v58, %v3889_v0  ;;  %v4296_v0 = vld [vmem:[%s7114_s1 + $0x250] sm:$0xff] }
 0x413   :  { %v3922_v42 = vrot.slane %v3921_v31, 2  ;;  %v3915_v44 = vrot.slane %v3914_v8, 2  ;;  %v3929_v51 = vrot.slane %v3928_v24, 2  ;;  %v3909_v37 = vmax.f32 %v3907_v47, %v3908_v25  ;;  %4096 = vmatpush.msra.mxu2 %v4296_v0  ;;  %v4336_v0 = vld [vmem:[%s7114_s1 + $0x378] sm:$0xff] }
 0x414   :  { %v3963_v34 = vmax.f32 %v3883_v53, %v3897_v52  ;;  %v4290_v52 = vld [vmem:[%s7114_s1 + $0x220] sm:$0xff] }
 0x415   :  { %v3923_v20 = vmax.f32 %v3921_v31, %v3922_v42  ;;  %v3916_v41 = vmax.f32 %v3914_v8, %v3915_v44  ;;  %v3930_v6 = vmax.f32 %v3928_v24, %v3929_v51  ;;  %v3910_v43 = vrot.slane %v3909_v37, 1  ;;  %v4286_v53 = vld [vmem:[%s7114_s1 + $0x200] sm:$0xff] }
 0x416   :  { %v4000_v42 = vsel %vm2896_vm2, %v3963_v34, %v3999_v61 }
 0x417   :  { %v3924_v12 = vrot.slane %v3923_v20, 1  ;;  %v3917_v4 = vrot.slane %v3916_v41, 1  ;;  %v3931_v31 = vrot.slane %v3930_v6, 1  ;;  %v3911_v28 = vmax.f32 %v3909_v37, %v3910_v43  ;;  %v4292_v37 = vld [vmem:[%s7114_s1 + $0x230] sm:$0xff] }
 0x419   :  { %v3925_v40 = vmax.f32 %v3923_v20, %v3924_v12  ;;  %v3918_v47 = vmax.f32 %v3916_v41, %v3917_v4  ;;  %v3932_v26 = vmax.f32 %v3930_v6, %v3931_v31  ;;  %v4289_v41 = vld [vmem:[%s7114_s1 + $0x218] sm:$0xff]  ;;  %v4317_v6 = vld [vmem:[%s7114_s1 + $0x2f0] sm:$0xff] }
 0x41a   :  { %v4318_v12 = vld [vmem:[%s7114_s1 + $0x2f8] sm:$0xff] }
 0x41b   :  { %v3965_v8 = vmax.f32 %v3911_v28, %v3925_v40  ;;  %v3966_v3 = vmax.f32 %v3918_v47, %v3932_v26  ;;  %4136 = vmatpush.msra.mxu3 %v4318_v12  ;;  %v4310_v4 = vld [vmem:[%s7114_s1 + $0x2b8] sm:$0xff]  ;;  %v4307_v26 = vld [vmem:[%s7114_s1 + $0x2a0] sm:$0xff] }
 0x41c   :  { %v4329_v12 = vld [vmem:[%s7114_s1 + $0x340] sm:$0xff] }
 0x41d   :  { %4137 = vmatpush.msra.mxu3 %v4317_v6  ;;  %v4328_v6 = vld [vmem:[%s7114_s1 + $0x338] sm:$0xff] }
 0x42f   :  { %v3814_v36 = vpop.f32.mrf.mxu2 }
 0x430   :  { %v3815_v10 = vadd.f32 %v6906_v56, %v3814_v36  ;;  %v3904_v56 = vmax.f32 %v3902_v49, %v3903_v59  ;;  %v4295_v59 = vld [vmem:[%s7114_s1 + $0x248] sm:$0xff] }
 0x431   :  { %4097 = vmatpush.msra.mxu2 %v4295_v59  ;;  %v4335_v59 = vld [vmem:[%s7114_s1 + $0x370] sm:$0xff] }
 0x432   :  { %v3820_v29 = vmax.f32 %v3815_v10, 0.0  ;;  %v3964_v55 = vmax.f32 %v3890_v14, %v3904_v56  ;;  %v4390_v14 = vld [vmem:[%s7115_s2 + $0x3] ss:$0 sm:$0xff]  ;;  %v4314_v56 = vld [vmem:[%s7114_s1 + $0x2d8] sm:$0xff] }
 0x433   :  { %4098 = vmatpush.msra.mxu2 %v4294_v60  ;;  %v4303_v60 = vld [vmem:[%s7114_s1 + $0x280] sm:$0xff] }
 0x434   :  { %v3834_v45 = vrot.slane %v3820_v29, 2  ;;  %v3835_v2 = vrot.slane %v3820_v29, 4  ;;  %v3836_v15 = vrot.slane %v3820_v29, 6  ;;  %v3933_v30 = vsel %vm823_vm0, %v3820_v29, -inf  ;;  %v4291_v29 = vld [vmem:[%s7114_s1 + $0x228] sm:$0xff] }
 0x435   :  { %v3934_v23 = vrot.slane %v3933_v30, 4  ;;  %v4001_v7 = vsel %vm2898_vm3, %v3964_v55, %v4000_v42  ;;  %4099 = vmatpush.msra.mxu2 %v4293_v62  ;;  %v4334_v62 = vld [vmem:[%s7114_s1 + $0x368] sm:$0xff] }
 0x436   :  { %v3940_v16 = vsel %vm823_vm0, %v3834_v45, -inf  ;;  %v3947_v13 = vsel %vm823_vm0, %v3835_v2, -inf  ;;  %v3954_v9 = vsel %vm823_vm0, %v3836_v15, -inf  ;;  %v4002_v22 = vsel %vm2900_vm4, %v3965_v8, %v4001_v7  ;;  %v4288_v45 = vld [vmem:[%s7114_s1 + $0x210] sm:$0xff]  ;;  %v4316_v2 = vld [vmem:[%s7114_s1 + $0x2e8] sm:$0xff] }
 0x437   :  { %v3935_v19 = vmax.f32 %v3933_v30, %v3934_v23  ;;  %v3941_v46 = vrot.slane %v3940_v16, 4  ;;  %v3948_v18 = vrot.slane %v3947_v13, 4  ;;  %v3955_v1 = vrot.slane %v3954_v9, 4  ;;  %4100 = vmatpush.msra.mxu2 %v4292_v37  ;;  %v4287_v15 = vld [vmem:[%s7114_s1 + $0x208] sm:$0xff]  ;;  %v4315_v30 = vld [vmem:[%s7114_s1 + $0x2e0] sm:$0xff]  ;;  %4138 = vmatpush.msra.mxu3 %v4316_v2  ;;  %v4313_v23 = vld [vmem:[%s7114_s1 + $0x2d0] sm:$0xff] }
 0x438   :  { %v4003_v35 = vsel %vm2902_vm5, %v3966_v3, %v4002_v22  ;;  %v4333_v37 = vld [vmem:[%s7114_s1 + $0x360] sm:$0xff]  ;;  %v4326_v2 = vld [vmem:[%s7114_s1 + $0x328] sm:$0xff] }
 0x439   :  { %v3936_v17 = vrot.slane %v3935_v19, 2  ;;  %v3942_v38 = vmax.f32 %v3940_v16, %v3941_v46  ;;  %v3949_v33 = vmax.f32 %v3947_v13, %v3948_v18  ;;  %v3956_v39 = vmax.f32 %v3954_v9, %v3955_v1  ;;  %4101 = vmatpush.msra.mxu2 %v4291_v29  ;;  %4139 = vmatpush.msra.mxu3 %v4315_v30  ;;  %v4312_v13 = vld [vmem:[%s7114_s1 + $0x2c8] sm:$0xff]  ;;  %v4332_v29 = vld [vmem:[%s7114_s1 + $0x358] sm:$0xff]  ;;  %v4391_v30 = vld [vmem:[%s7115_s2 + $0x4] ss:$0 sm:$0xff] }
 0x43b   :  { %v3937_v63 = vmax.f32 %v3935_v19, %v3936_v17  ;;  %v3950_v11 = vrot.slane %v3949_v33, 2  ;;  %v3943_v21 = vrot.slane %v3942_v38, 2  ;;  %v3957_v32 = vrot.slane %v3956_v39, 2  ;;  %4102 = vmatpush.msra.mxu2 %v4290_v52  ;;  %4140 = vmatpush.msra.mxu3 %v4314_v56  ;;  %v4311_v19 = vld [vmem:[%s7114_s1 + $0x2c0] sm:$0xff]  ;;  %v4331_v52 = vld [vmem:[%s7114_s1 + $0x350] sm:$0xff] }
 0x43c   :  { %v4112_v56 = vld [vmem:[%s7116_s3] sm:$0x3] }
 0x43d   :  { %v3938_v24 = vrot.slane %v3937_v63, 1  ;;  %v3944_v54 = vmax.f32 %v3942_v38, %v3943_v21  ;;  %v3951_v27 = vmax.f32 %v3949_v33, %v3950_v11  ;;  %v3958_v48 = vmax.f32 %v3956_v39, %v3957_v32  ;;  %4103 = vmatpush.msra.mxu2 %v4289_v41  ;;  %4141 = vmatpush.msra.mxu3 %v4313_v23  ;;  %v4309_v33 = vld [vmem:[%s7114_s1 + $0x2b0] sm:$0xff]  ;;  %v4330_v41 = vld [vmem:[%s7114_s1 + $0x348] sm:$0xff] }
 0x43f   :  { %v3945_v58 = vrot.slane %v3944_v54, 1  ;;  %v3952_v49 = vrot.slane %v3951_v27, 1  ;;  %v3959_v5 = vrot.slane %v3958_v48, 1  ;;  %v3939_v25 = vmax.f32 %v3937_v63, %v3938_v24  ;;  %4104 = vmatpush.msra.mxu2 %v4288_v45  ;;  %4142 = vmatpush.msra.mxu3 %v4312_v13  ;;  %v4308_v63 = vld [vmem:[%s7114_s1 + $0x2a8] sm:$0xff]  ;;  %v4327_v45 = vld [vmem:[%s7114_s1 + $0x330] sm:$0xff] }
 0x440   :  { %v4323_v13 = vld [vmem:[%s7114_s1 + $0x310] sm:$0xff] }
 0x441   :  { %v3946_v57 = vmax.f32 %v3944_v54, %v3945_v58  ;;  %v3953_v44 = vmax.f32 %v3951_v27, %v3952_v49  ;;  %v3960_v20 = vmax.f32 %v3958_v48, %v3959_v5  ;;  %4105 = vmatpush.msra.mxu2 %v4287_v15  ;;  %4143 = vmatpush.msra.mxu3 %v4311_v19  ;;  %v4325_v15 = vld [vmem:[%s7114_s1 + $0x320] sm:$0xff] }
 0x442   :  { %v4321_v19 = vld [vmem:[%s7114_s1 + $0x300] sm:$0xff] }
 0x443   :  { %v3967_v51 = vmax.f32 %v3939_v25, %v3953_v44  ;;  %v3968_v36 = vmax.f32 %v3946_v57, %v3960_v20  ;;  %4106 = vmatpush.msra.mxu2 %v4286_v53  ;;  %4144 = vmatpush.msra.mxu3 %v4310_v4 }
 0x445   :  { %v4004_v10 = vsel %vm2904_vm6, %v3967_v51, %v4003_v35  ;;  %4145 = vmatpush.msra.mxu3 %v4309_v33  ;;  %v4306_v35 = vld [vmem:[%s7114_s1 + $0x298] sm:$0xff]  ;;  %4182 = vmatpush.msrb.mxu2 %v4336_v0 }
 0x446   :  { %v4005_v50 = vsel %vm2906_vm7, %v3968_v36, %v4004_v10  ;;  %v4305_v10 = vld [vmem:[%s7114_s1 + $0x290] sm:$0xff] }
 0x447   :  { %4023 = vmatmul.f32.vlgmr.msrb.gmra.mxu3 %v4005_v50  ;;  %v4304_v50 = vld [vmem:[%s7114_s1 + $0x288] sm:$0xff]  ;;  %4183 = vmatpush.msrb.mxu2 %v4335_v59 }
 0x448   :  { %4146 = vmatpush.msra.mxu3 %v4308_v63 }
 0x449   :  { %4184 = vmatpush.msrb.mxu2 %v4334_v62 }
 0x44a   :  { %4147 = vmatpush.msra.mxu3 %v4307_v26 }
 0x44b   :  { %4185 = vmatpush.msrb.mxu2 %v4333_v37 }
 0x44c   :  { %4148 = vmatpush.msra.mxu3 %v4306_v35 }
 0x44d   :  { %4186 = vmatpush.msrb.mxu2 %v4332_v29 }
 0x44e   :  { %4149 = vmatpush.msra.mxu3 %v4305_v10 }
 0x44f   :  { %4187 = vmatpush.msrb.mxu2 %v4331_v52 }
 0x450   :  { %4150 = vmatpush.msra.mxu3 %v4304_v50 }
 0x451   :  { %4188 = vmatpush.msrb.mxu2 %v4330_v41 }
 0x452   :  { %4151 = vmatpush.msra.mxu3 %v4303_v60 }
 0x453   :  { %4189 = vmatpush.msrb.mxu2 %v4329_v12 }
 0x455   :  { %4190 = vmatpush.msrb.mxu2 %v4328_v6 }
 0x457   :  { %4191 = vmatpush.msrb.mxu2 %v4327_v45 }
 0x459   :  { %4192 = vmatpush.msrb.mxu2 %v4326_v2 }
 0x45b   :  { %4193 = vmatpush.msrb.mxu2 %v4325_v15 }
 0x4ca   :  { %v4024_v43 = vpop.f32.mrf.mxu3 }
 0x4cb   :  { %v4025_v16 = vadd.f32 %v4390_v14, %v4024_v43 }
 0x4cd   :  { %v4027_v9 = vmax.f32 %v4025_v16, 0.0  ;;  %v4324_v16 = vld [vmem:[%s7114_s1 + $0x318] sm:$0xff] }
 0x4ce   :  { %4194 = vmatpush.msrb.mxu2 %v4324_v16 }
 0x4cf   :  { %v4029_v46 = vrot.slane %v4027_v9, 2  ;;  %v4030_v18 = vrot.slane %v4027_v9, 4  ;;  %v4031_v1 = vrot.slane %v4027_v9, 6  ;;  %v4035_v34 = vsel %vm823_vm0, %v4027_v9, -inf  ;;  %v4322_v9 = vld [vmem:[%s7114_s1 + $0x308] sm:$0xff]  ;;  %s4430_s1 = smov [#allocation2]  }
 0x4d0   :  { %v4036_v40 = vrot.slane %v4035_v34, 4  ;;  %4195 = vmatpush.msrb.mxu2 %v4323_v13 }
 0x4d1   :  { %v4042_v31 = vsel %vm823_vm0, %v4029_v46, -inf  ;;  %v4049_v17 = vsel %vm823_vm0, %v4030_v18, -inf  ;;  %v4056_v38 = vsel %vm823_vm0, %v4031_v1, -inf  ;;  %v4392_v46 = vld [vmem:[%s7115_s2 + $0x5] ss:$0 sm:$0xff] }
 0x4d2   :  { %v4037_v39 = vmax.f32 %v4035_v34, %v4036_v40  ;;  %v4043_v28 = vrot.slane %v4042_v31, 4  ;;  %v4050_v55 = vrot.slane %v4049_v17, 4  ;;  %v4057_v61 = vrot.slane %v4056_v38, 4  ;;  %4196 = vmatpush.msrb.mxu2 %v4322_v9  ;;  %v4320_v34 = vld [vmem:[%s7116_s3 + $0x2] sm:$0x3] }
 0x4d4   :  { %v4038_v11 = vrot.slane %v4037_v39, 2  ;;  %v4044_v21 = vmax.f32 %v4042_v31, %v4043_v28  ;;  %v4051_v32 = vmax.f32 %v4049_v17, %v4050_v55  ;;  %v4058_v47 = vmax.f32 %v4056_v38, %v4057_v61  ;;  %4197 = vmatpush.msrb.mxu2 %v4321_v19  ;;  %v4393_v38 = vld [vmem:[%s7115_s2 + $0x6] ss:$0 sm:$0xff]  ;;  %s4224_s2 = sshll.u32 %s4430_s1, 4  ;;  %s4225_s2 = int_to_ptr.vmem [resolvable:$true] %s4224_s2 }
 0x4d5   :  { %v4202_v31 = vlaneseq }
 0x4d6   :  { %v4039_v8 = vmax.f32 %v4037_v39, %v4038_v11  ;;  %v4045_v42 = vrot.slane %v4044_v21, 2  ;;  %v4052_v24 = vrot.slane %v4051_v32, 2  ;;  %v4059_v54 = vrot.slane %v4058_v47, 2 }
 0x4d7   :  { %v4203_v17 = vand.u32 127, %v4202_v31 }
 0x4d8   :  { %v4040_v27 = vrot.slane %v4039_v8, 1  ;;  %v4046_v48 = vmax.f32 %v4044_v21, %v4045_v42  ;;  %v4053_v58 = vmax.f32 %v4051_v32, %v4052_v24  ;;  %v4060_v49 = vmax.f32 %v4058_v47, %v4059_v54 }
 0x4d9   :  { %vm4204_vm8 = vcmp.lt.s32.totalorder %v4203_v17, 3 }
 0x4da   :  { %v4047_v5 = vrot.slane %v4046_v48, 1  ;;  %v4054_v7 = vrot.slane %v4053_v58, 1  ;;  %v4061_v3 = vrot.slane %v4060_v49, 1  ;;  %v4041_v22 = vmax.f32 %v4039_v8, %v4040_v27 }
 0x4dc   :  { %v4048_v25 = vmax.f32 %v4046_v48, %v4047_v5  ;;  %v4055_v57 = vmax.f32 %v4053_v58, %v4054_v7  ;;  %v4062_v44 = vmax.f32 %v4060_v49, %v4061_v3 }
 0x4de   :  { %v4063_v20 = vmax.f32 %v4041_v22, %v4048_v25  ;;  %v4064_v51 = vmax.f32 %v4055_v57, %v4062_v44 }
 0x4e0   :  { %v4089_v36 = vsel %vm2894_vm1, %v4064_v51, %v4063_v20 }
 0x4e1   :  { %4107 = vmatmul.f32.vlgmr.msra.gmra.mxu2 %v4089_v36 }
 0x564   :  { %v4108_v53 = vpop.f32.mrf.mxu2 }
 0x565   :  { %v4109_v14 = vadd.f32 %v4391_v30, %v4108_v53 }
 0x567   :  { %v4111_v23 = vmax.f32 %v4109_v14, 0.0 }
 0x569   :  { %v4113_v43 = vmul.f32 %v4112_v56, %v4111_v23 }
 0x56b   :  { %4152 = vmatmul.f32.vlgmr.msra.gmra.mxu3 %v4113_v43 }
 0x5ee   :  { %v4153_v18 = vpop.f32.mrf.mxu3 }
 0x5ef   :  { %v4154_v1 = vadd.f32 %v4392_v46, %v4153_v18 }
 0x5f1   :  { %v4156_v4 = vmax.f32 %v4154_v1, 0.0 }
 0x5f3   :  { %v4159_v40 = vmul.f32 %v4320_v34, %v4156_v4 }
 0x5f5   :  { %4198 = vmatmul.f32.vlgmr.msrb.gmra.mxu2 %v4159_v40 }
 0x678   :  { %v4199_v33 = vpop.f32.mrf.mxu2 }
 0x679   :  { %v4200_v39 = vadd.f32 %v4393_v38, %v4199_v33 }
 0x67b   :  { %v4205_v28 = vsel %vm4204_vm8, %v4200_v39, -1e+30 }
 0x67c   :  { %v4206_v55 = vsel %vm823_vm0, %v4205_v28, -inf }
 0x67d   :  { %4207 = vmax.xlane.f32.xlu0 %v4206_v55 }
 0x6f0   :  { %v4208_v61 = vpop.xlane.xlu0 %4207 }
 0x6f1   :  { %v4209_v63 = vsub.f32 %v4205_v28, %v4208_v61 }
 0x6f3   :  { %v4210_v11 = vmul.f32 1.442695, %v4209_v63 }
 0x6f5   :  { %4394 = vpow2.f32 %v4210_v11 }
 0x6fb   :  { %v4395_v21 = vpop.eup %4394 }
 0x6fc   :  { %v4212_v32 = vsel %vm823_vm0, %v4395_v21, 0.0 }
 0x6fd   :  { %4213 = vadd.xlane.f32.xlu0 %v4212_v32 }
 0x770   :  { %v4214_v47 = vpop.xlane.xlu0 %4213 }
 0x771   :  { %4396 = vlog2.f32 %v4214_v47 }
 0x777   :  { %v4397_v26 = vpop.eup %4396 }
 0x778   :  { %v4216_v8 = vmul.f32 0.6931472, %v4397_v26 }
 0x77a   :  { %v4217_v42 = vsub.f32 %v4209_v63, %v4216_v8 }
 0x77c   :  { %4218 = vst [vmem:[#allocation2] sm:$0x3] %v4217_v42 }
 0x77d   :  { %4229 = dma.vmem_to_hbm [thread:$0]  %s4225_s2, 32, %s4227_s27, [#allocation3]  }
 0x77e   :  { %4428 = dma.done.wait [#allocation3], 32  }
 0x77f   :  { %4429 = vsyncadd [#allocation3], 4294967264 }
 0x780   :  { %4234 = vsyncpa [#allocation3], 1 }

</bundles_post_ra>
